<compile_context>
chip_gen: v7x
topology: tpu7x:2x2x1
jax: 0.10.0
libtpu: 0.0.40
codegen_flags: <defaults>
</compile_context>

<pallas_src>
import functools

import jax
import jax.numpy as jnp
from jax.experimental import pallas as pl
from jax.experimental.pallas import tpu as pltpu


_LANE = 128   # matmul output (lane) dims are padded to multiples of this


# --------------------- generation-aware sizing / helpers ---------------------


def _round_up(x, m):
    return (x + m - 1) // m * m


def _tpu_vmem_bytes():
    try:
        return int(pltpu.get_tpu_info().vmem_capacity_bytes)
    except Exception:
        return 64 * 1024 * 1024          # conservative (v7x-sized) fallback


_VMEM_PHYS = _tpu_vmem_bytes()
_SMALL_VMEM = _VMEM_PHYS < (96 << 20)    # v7x: 64 MiB per TensorCore
_VMEM_LIMIT = (48 << 20) if _SMALL_VMEM else (96 << 20)
_DESIRED_TM = 512 if _SMALL_VMEM else 1024

try:                                      # pipeline_mode may not exist everywhere
    pl.BlockSpec((8, 128), lambda i: (0, 0), pipeline_mode=pl.Buffered(1))
    _HAS_BUFFERED = True
except Exception:                         # pragma: no cover
    _HAS_BUFFERED = False


def _spec(shape, index_map, resident=False):
    """BlockSpec; grid-invariant (resident) blocks request single buffering."""
    if resident and _HAS_BUFFERED:
        return pl.BlockSpec(shape, index_map, pipeline_mode=pl.Buffered(1))
    return pl.BlockSpec(shape, index_map)


def _pick_tm(m):
    # Largest row tile <= desired; multiple of 64 keeps bf16 DMA offsets aligned.
    return min(_DESIRED_TM, _round_up(m, 64))


def _pick_tn(n):
    if n <= 512:
        return n
    for tn in (512, 256, 128):
        if n % tn == 0:
            return tn
    return n


def _pad_rows(x, rows):
    if x.shape[0] == rows:
        return x
    return jnp.pad(x, ((0, rows - x.shape[0]), (0, 0)))


def _pad_dim(a, axis, target, value=0.0):
    axis = axis if axis >= 0 else a.ndim + axis
    if a.shape[axis] == target:
        return a
    pads = [(0, 0)] * a.ndim
    pads[axis] = (0, target - a.shape[axis])
    return jnp.pad(a, pads, constant_values=value)


def fold_bn(conv_bias, gamma, beta, mean, var, eps=1e-5):
    """Fold conv bias + inference-mode BatchNorm into per-channel (scale, bias)."""
    scale = gamma / jnp.sqrt(var + eps)
    bias = (conv_bias - mean) * scale + beta
    return scale, bias


# ------------------------------ Pallas kernels --------------------------------


def _mm_affine_kernel(relu, x_ref, w_ref, s_ref, b_ref, o_ref):
    # bf16 x bf16 MXU matmul, f32 accumulate, fused per-channel affine (+ReLU).
    acc = jnp.dot(x_ref[...], w_ref[...], preferred_element_type=jnp.float32)
    y = acc * s_ref[...] + b_ref[...]
    if relu:
        y = jnp.maximum(y, 0.0)
    o_ref[...] = y.astype(o_ref.dtype)


def _mm_residual_kernel(x_ref, w_ref, xs_ref, ws_ref, s_ref, b_ref, o_ref):
    # conv3 (1x1) + bn3 affine + shortcut 1x1 conv + residual add + ReLU,
    # all in-register -- the shortcut tensor never touches HBM.
    acc = jnp.dot(x_ref[...], w_ref[...], preferred_element_type=jnp.float32)
    acc = acc * s_ref[...] + b_ref[...]
    acc = acc + jnp.dot(xs_ref[...], ws_ref[...],
                        preferred_element_type=jnp.float32)
    o_ref[...] = jnp.maximum(acc, 0.0).astype(o_ref.dtype)


def _conv3x3_kernel(taps, tm, win, inner, x_hbm, w_ref, s_ref, b_ref, o_ref,
                    xwin, sem):
    """3x3 conv (stride 1, spatial pad pre-applied) as 9 accumulated tap
    matmuls over a double-buffered, DMA'd bf16 row window.  No im2col in HBM,
    no f32 staging, value-carried accumulation."""
    c = pl.program_id(0)          # megacore split ("parallel")
    j = pl.program_id(1)          # sequential within a core ("arbitrary")
    step = c * inner + j

    def start_fetch(s, slot):
        row0 = pl.multiple_of(s * tm, tm)
        pltpu.make_async_copy(x_hbm.at[pl.ds(row0, win), :],
                              xwin.at[slot], sem.at[slot]).start()

    @pl.when(j == 0)              # prime the pipeline on this core
    def _():
        start_fetch(step, step & 1)

    @pl.when(j + 1 < inner)       # prefetch next window while computing this one
    def _():
        start_fetch(step + 1, (step + 1) & 1)

    slot = step & 1
    pltpu.make_async_copy(x_hbm.at[pl.ds(0, win), :],   # dummy src; shapes match
                          xwin.at[slot], sem.at[slot]).wait()

    acc = None
    for t, off in enumerate(taps):            # static offsets -> cheap realign
        x_t = xwin[slot, pl.ds(off, tm), :]   # bf16 straight to the MXU
        contrib = jnp.dot(x_t, w_ref[t], preferred_element_type=jnp.float32)
        acc = contrib if acc is None else acc + contrib

    y = acc * s_ref[...] + b_ref[...]
    o_ref[...] = jnp.maximum(y, 0.0).astype(o_ref.dtype)


# ------------------------------ kernel wrappers --------------------------------


def fused_matmul_affine(x, w, scale, bias, *, relu=True,
                        out_dtype=jnp.bfloat16, tm=None):
    """y = act((x @ w) * scale + bias).  x:(M,K) bf16, w:(K,N) bf16, N % 128 == 0."""
    m, k = x.shape
    n = w.shape[1]
    tm = _pick_tm(m) if tm is None else tm
    tn = _pick_tn(n)
    mp = _round_up(m, tm)
    xp = _pad_rows(x, mp)
    s2 = scale.reshape(1, n).astype(jnp.float32)
    b2 = bias.reshape(1, n).astype(jnp.float32)
    n_steps = n // tn
    resident = n_steps == 1
    out = pl.pallas_call(
        functools.partial(_mm_affine_kernel, relu),
        grid=(mp // tm, n_steps),
        in_specs=[
            pl.BlockSpec((tm, k), lambda i, j: (i, 0)),
            _spec((k, tn), lambda i, j: (0, j), resident),
            _spec((1, tn), lambda i, j: (0, j), resident),
            _spec((1, tn), lambda i, j: (0, j), resident),
        ],
        out_specs=pl.BlockSpec((tm, tn), lambda i, j: (i, j)),
        out_shape=jax.ShapeDtypeStruct((mp, n), out_dtype),
        compiler_params=pltpu.CompilerParams(
            dimension_semantics=("parallel", "parallel"),
            vmem_limit_bytes=_VMEM_LIMIT),
    )(xp, w, s2, b2)
    return out if mp == m else out[:m]


def fused_matmul_residual(x, w, xs, ws, scale, bias, *,
                          out_dtype=jnp.bfloat16, tm=None):
    """relu((x @ w) * scale + bias + xs @ ws) in a single fused kernel."""
    m, k = x.shape
    n = w.shape[1]
    ks = xs.shape[1]
    tm = _pick_tm(m) if tm is None else tm
    tn = _pick_tn(n)
    mp = _round_up(m, tm)
    xp, xsp = _pad_rows(x, mp), _pad_rows(xs, mp)
    s2 = scale.reshape(1, n).astype(jnp.float32)
    b2 = bias.reshape(1, n).astype(jnp.float32)
    n_steps = n // tn
    resident = n_steps == 1
    out = pl.pallas_call(
        _mm_residual_kernel,
        grid=(mp // tm, n_steps),
        in_specs=[
            pl.BlockSpec((tm, k), lambda i, j: (i, 0)),
            _spec((k, tn), lambda i, j: (0, j), resident),
            pl.BlockSpec((tm, ks), lambda i, j: (i, 0)),
            _spec((ks, tn), lambda i, j: (0, j), resident),
            _spec((1, tn), lambda i, j: (0, j), resident),
            _spec((1, tn), lambda i, j: (0, j), resident),
        ],
        out_specs=pl.BlockSpec((tm, tn), lambda i, j: (i, j)),
        out_shape=jax.ShapeDtypeStruct((mp, n), out_dtype),
        compiler_params=pltpu.CompilerParams(
            dimension_semantics=("parallel", "parallel"),
            vmem_limit_bytes=_VMEM_LIMIT),
    )(xp, w, xsp, ws, s2, b2)
    return out if mp == m else out[:m]


def conv3x3_bn_relu(x_pad_flat, w_taps, scale, bias, *, wpad,
                    out_dtype=jnp.bfloat16, tm=None):
    """3x3 / pad=1 / stride=1 conv + BN + ReLU on a spatially pre-padded,
    row-flattened NHWC activation.

    x_pad_flat : (Mg, C) bf16 with Mg = N*(H+2)*(W+2), C % 128 == 0
    w_taps     : (9, C, Nout) bf16, tap t = dh*3 + dw
    Returns (Mg, Nout); only rows whose padded-grid (i, j) satisfy i < H, j < W
    hold valid conv outputs (the caller slices the top-left corner).
    """
    mg, c = x_pad_flat.shape
    nout = w_taps.shape[2]
    tm = _pick_tm(mg) if tm is None else tm
    mp = _round_up(mg, tm)
    steps = mp // tm
    outer = 2 if (steps % 2 == 0 and steps >= 2) else 1   # megacore split (v7x)
    inner = steps // outer
    win = _round_up(tm + 2 * wpad + 2, 16)     # row window incl. max tap shift
    src_rows = mp - tm + win                   # last window must stay in bounds
    x_src = _pad_rows(x_pad_flat, src_rows)
    taps = tuple(dh * wpad + dw for dh in range(3) for dw in range(3))
    s2 = scale.reshape(1, nout).astype(jnp.float32)
    b2 = bias.reshape(1, nout).astype(jnp.float32)
    out = pl.pallas_call(
        functools.partial(_conv3x3_kernel, taps, tm, win, inner),
        grid=(outer, inner),
        in_specs=[
            pl.BlockSpec(memory_space=pl.ANY),             # raw HBM; overlapping windows
            _spec((9, c, nout), lambda co, j: (0, 0, 0), True),
            _spec((1, nout), lambda co, j: (0, 0), True),
            _spec((1, nout), lambda co, j: (0, 0), True),
        ],
        out_specs=pl.BlockSpec((tm, nout), lambda co, j: (co * inner + j, 0)),
        out_shape=jax.ShapeDtypeStruct((mp, nout), out_dtype),
        scratch_shapes=[
            pltpu.VMEM((2, win, c), jnp.bfloat16),          # double-buffered window
            pltpu.SemaphoreType.DMA((2,)),
        ],
        compiler_params=pltpu.CompilerParams(
            dimension_semantics=("parallel", "arbitrary"),
            vmem_limit_bytes=_VMEM_LIMIT),
    )(x_src, w_taps, s2, b2)
    return out[:mg]


# ------------------------------- block forward ---------------------------------


def residual_block_forward(x_nchw, p, stride=1):
    """Pallas implementation of residualBlock.forward (NCHW in, NCHW out)."""
    x = jnp.transpose(x_nchw, (0, 2, 3, 1))                   # NHWC, f32
    n, h, w, cin = x.shape
    oc = p["w1"].shape[0]
    oc4 = 4 * oc
    ocp = _round_up(oc, _LANE)        # lane-dense intermediate channel width
    oc4p = _round_up(oc4, _LANE)

    xb = x.astype(jnp.bfloat16)
    x_flat = xb.reshape(n * h * w, cin)

    # ---- conv1 (1x1) + bn1 + relu  ->  bf16, channels zero-padded to ocp ----
    w1 = _pad_dim(p["w1"][:, :, 0, 0].T, 1, ocp)               # (cin, ocp)
    s1, b1 = fold_bn(p["b1"], p["g1"], p["be1"], p["m1"], p["v1"])
    s1 = _pad_dim(s1, 0, ocp, 1.0)
    b1 = _pad_dim(b1, 0, ocp, 0.0)
    h1 = fused_matmul_affine(x_flat, w1.astype(jnp.bfloat16), s1, b1,
                             relu=True)                         # (n*h*w, ocp) bf16

    # ---- conv2 (3x3, pad=1) + bn2 + relu: 9 in-kernel tap matmuls ----
    hpad, wpad = h + 2, w + 2
    h1p = jnp.pad(h1.reshape(n, h, w, ocp), ((0, 0), (1, 1), (1, 1), (0, 0)))
    h1p_flat = h1p.reshape(n * hpad * wpad, ocp)
    w2 = jnp.transpose(p["w2"], (2, 3, 1, 0)).reshape(9, oc, oc)  # (tap, cin, cout)
    w2 = _pad_dim(_pad_dim(w2, 1, ocp), 2, ocp)                   # (9, ocp, ocp)
    s2, b2 = fold_bn(p["b2"], p["g2"], p["be2"], p["m2"], p["v2"])
    s2 = _pad_dim(s2, 0, ocp, 1.0)
    b2 = _pad_dim(b2, 0, ocp, 0.0)
    h2p = conv3x3_bn_relu(h1p_flat, w2.astype(jnp.bfloat16), s2, b2,
                          wpad=wpad)                              # (n*hpad*wpad, ocp)
    # Valid conv outputs live in the top-left h x w corner of the padded grid.
    h2 = h2p.reshape(n, hpad, wpad, ocp)[:, :h:stride, :w:stride, :]
    ho, wo = h2.shape[1], h2.shape[2]
    h2_flat = h2.reshape(n * ho * wo, ocp)

    # ---- conv3 (1x1) + bn3 + shortcut (1x1, stride) + add + relu, one kernel ----
    # (shortcut is a conv, matching in_channels != 4*out_channels in the module)
    xs_flat = xb[:, ::stride, ::stride, :].reshape(n * ho * wo, cin)
    w3 = _pad_dim(_pad_dim(p["w3"][:, :, 0, 0].T, 0, ocp), 1, oc4p)  # (ocp, oc4p)
    s3, b3 = fold_bn(p["b3"], p["g3"], p["be3"], p["m3"], p["v3"])
    s3 = _pad_dim(s3, 0, oc4p, 1.0)
    b3 = _pad_dim(b3, 0, oc4p, 0.0)
    ws = _pad_dim(p["ws"][:, :, 0, 0].T, 1, oc4p)                    # (cin, oc4p)
    bs = _pad_dim(p["bs"], 0, oc4p, 0.0)
    out = fused_matmul_residual(h2_flat, w3.astype(jnp.bfloat16),
                                xs_flat, ws.astype(jnp.bfloat16),
                                s3, b3 + bs)                         # (M, oc4p) bf16

    out = out[:, :oc4].reshape(n, ho, wo, oc4)
    return jnp.transpose(out, (0, 3, 1, 2)).astype(jnp.float32)      # NCHW, f32


# ----------------------------- pure-JAX reference -------------------------------


def reference_forward(x, p, stride=1, eps=1e-5):
    def conv(x, w, b, s, pad):
        y = jax.lax.conv_general_dilated(
            x, w, (s, s), pad, dimension_numbers=("NCHW", "OIHW", "NCHW"))
        return y + b[None, :, None, None]

    def bn(x, g, be, m, v):
        return ((x - m[None, :, None, None])
                / jnp.sqrt(v[None, :, None, None] + eps)
                * g[None, :, None, None] + be[None, :, None, None])

    h = jax.nn.relu(bn(conv(x, p["w1"], p["b1"], 1, "VALID"),
                       p["g1"], p["be1"], p["m1"], p["v1"]))
    h = jax.nn.relu(bn(conv(h, p["w2"], p["b2"], stride, ((1, 1), (1, 1))),
                       p["g2"], p["be2"], p["m2"], p["v2"]))
    h = bn(conv(h, p["w3"], p["b3"], 1, "VALID"),
           p["g3"], p["be3"], p["m3"], p["v3"])
    sc = conv(x, p["ws"], p["bs"], stride, "VALID")
    return jax.nn.relu(h + sc)


# ------------------------------------ main --------------------------------------


def init_params(key, in_channels, out_channels):
    ks = jax.random.split(key, 24)
    r = lambda k, s, scl=0.1: scl * jax.random.normal(k, s, jnp.float32)
    ic, oc = in_channels, out_channels
    return {
        "w1": r(ks[0], (oc, ic, 1, 1)), "b1": r(ks[1], (oc,)),
        "g1": 1.0 + r(ks[2], (oc,)), "be1": r(ks[3], (oc,)),
        "m1": r(ks[4], (oc,)), "v1": 0.5 + jnp.abs(r(ks[5], (oc,))),
        "w2": r(ks[6], (oc, oc, 3, 3)), "b2": r(ks[7], (oc,)),
        "g2": 1.0 + r(ks[8], (oc,)), "be2": r(ks[9], (oc,)),
        "m2": r(ks[10], (oc,)), "v2": 0.5 + jnp.abs(r(ks[11], (oc,))),
        "w3": r(ks[12], (4 * oc, oc, 1, 1)), "b3": r(ks[13], (4 * oc,)),
        "g3": 1.0 + r(ks[14], (4 * oc,)), "be3": r(ks[15], (4 * oc,)),
        "m3": r(ks[16], (4 * oc,)), "v3": 0.5 + jnp.abs(r(ks[17], (4 * oc,))),
        "ws": r(ks[18], (4 * oc, ic, 1, 1)), "bs": r(ks[19], (4 * oc,)),
    }


if __name__ == "__main__":
    key = jax.random.PRNGKey(0)
    k_x, k_p = jax.random.split(key)

    in_channels, out_channels, stride = 4, 4, 1
    x = jax.random.normal(k_x, (2, in_channels, 16, 16), jnp.float32)  # NCHW
    params = init_params(k_p, in_channels, out_channels)

    fwd = jax.jit(functools.partial(residual_block_forward, stride=stride))
    out = jax.block_until_ready(fwd(x, params))
    ref = jax.block_until_ready(reference_forward(x, params, stride=stride))

    assert out.shape == (2, 4 * out_channels, 16, 16), out.shape
    max_err = float(jnp.max(jnp.abs(out - ref)))
    # bf16 matmul operands / bf16 output -> loosened tolerance vs. f32 reference.
    assert jnp.allclose(out, ref, atol=5e-2, rtol=5e-2), max_err

    print("KERNEL_OK")
</pallas_src>

<mosaic_0001>
module attributes {stable_mosaic.version = 11 : i64} {
  func.func @_mm_affine_kernel(%arg0: i32, %arg1: i32, %arg2: memref<512x4xbf16, #tpu.memory_space<vmem>>, %arg3: memref<4x128xbf16, #tpu.memory_space<vmem>>, %arg4: memref<1x128xf32, #tpu.memory_space<vmem>>, %arg5: memref<1x128xf32, #tpu.memory_space<vmem>>, %arg6: memref<512x128xbf16, #tpu.memory_space<vmem>>) attributes {dimension_semantics = [#tpu.dimension_semantics<parallel>, #tpu.dimension_semantics<parallel>], iteration_bounds = array<i64: 1, 1>, scalar_prefetch = 0 : i64, scratch_operands = 0 : i64, tpu.core_type = #tpu.core_type<tc>, window_params = [{transform_indices = @transform_0, window_bounds = array<i64: 512, 4>}, {pipeline_mode = #tpu.pipeline_mode<synchronous>, transform_indices = @transform_1, window_bounds = array<i64: 4, 128>}, {pipeline_mode = #tpu.pipeline_mode<synchronous>, transform_indices = @transform_2, window_bounds = array<i64: 1, 128>}, {pipeline_mode = #tpu.pipeline_mode<synchronous>, transform_indices = @transform_3, window_bounds = array<i64: 1, 128>}, {transform_indices = @transform_4, window_bounds = array<i64: 512, 128>}]} {
    %c0 = arith.constant 0 : index
    %c0_0 = arith.constant 0 : index
    %0 = vector.load %arg2[%c0, %c0_0] : memref<512x4xbf16, #tpu.memory_space<vmem>>, vector<512x4xbf16>
    %c0_1 = arith.constant 0 : index
    %c0_2 = arith.constant 0 : index
    %1 = vector.load %arg3[%c0_1, %c0_2] : memref<4x128xbf16, #tpu.memory_space<vmem>>, vector<4x128xbf16>
    %cst = arith.constant dense<0.000000e+00> : vector<512x128xf32>
    %2 = tpu.matmul %0, %1, %cst {dimension_numbers = #tpu.dot_dimension_numbers<[1], [0], [0], [1], [0, 0, 1, 1], [], []>} : vector<512x4xbf16>, vector<4x128xbf16>, vector<512x128xf32> -> vector<512x128xf32>
    %c0_3 = arith.constant 0 : index
    %c0_4 = arith.constant 0 : index
    %3 = vector.load %arg4[%c0_3, %c0_4] : memref<1x128xf32, #tpu.memory_space<vmem>>, vector<1x128xf32>
    %4 = vector.broadcast %3 : vector<1x128xf32> to vector<512x128xf32>
    %5 = arith.mulf %2, %4 : vector<512x128xf32>
    %c0_5 = arith.constant 0 : index
    %c0_6 = arith.constant 0 : index
    %6 = vector.load %arg5[%c0_5, %c0_6] : memref<1x128xf32, #tpu.memory_space<vmem>>, vector<1x128xf32>
    %7 = vector.broadcast %6 : vector<1x128xf32> to vector<512x128xf32>
    %8 = arith.addf %5, %7 : vector<512x128xf32>
    %cst_7 = arith.constant 0.000000e+00 : f32
    %9 = vector.broadcast %cst_7 : f32 to vector<512x128xf32>
    %10 = arith.maximumf %8, %9 : vector<512x128xf32>
    %11 = arith.truncf %10 : vector<512x128xf32> to vector<512x128xbf16>
    %c0_8 = arith.constant 0 : index
    %c0_9 = arith.constant 0 : index
    %12 = vector.load %arg6[%c0_8, %c0_9] : memref<512x128xbf16, #tpu.memory_space<vmem>>, vector<512x128xbf16>
    tpu.vector_store %arg6[%c0_8, %c0_9], %11 {strides = array<i32>} : memref<512x128xbf16, #tpu.memory_space<vmem>>, vector<512x128xbf16>,
    return
  }
  func.func @transform_0(%arg0: i32, %arg1: i32) -> (i32, i32) {
    %c0_i32 = arith.constant 0 : i32
    %c0_i32_0 = arith.constant 0 : i32
    return %arg0, %c0_i32 : i32, i32
  }
  func.func @transform_1(%arg0: i32, %arg1: i32) -> (i32, i32) {
    %c0_i32 = arith.constant 0 : i32
    %c0_i32_0 = arith.constant 0 : i32
    return %c0_i32, %arg1 : i32, i32
  }
  func.func @transform_2(%arg0: i32, %arg1: i32) -> (i32, i32) {
    %c0_i32 = arith.constant 0 : i32
    %c0_i32_0 = arith.constant 0 : i32
    return %c0_i32, %arg1 : i32, i32
  }
  func.func @transform_3(%arg0: i32, %arg1: i32) -> (i32, i32) {
    %c0_i32 = arith.constant 0 : i32
    %c0_i32_0 = arith.constant 0 : i32
    return %c0_i32, %arg1 : i32, i32
  }
  func.func @transform_4(%arg0: i32, %arg1: i32) -> (i32, i32) {
    %c0_i32 = arith.constant 0 : i32
    return %arg0, %arg1 : i32, i32
  }
}

module attributes {stable_mosaic.version = 11 : i64} {
  func.func @_conv3x3_kernel(%arg0: i32, %arg1: i32, %arg2: memref<1072x128xbf16, #tpu.memory_space<any>>, %arg3: memref<9x128x128xbf16, #tpu.memory_space<vmem>>, %arg4: memref<1x128xf32, #tpu.memory_space<vmem>>, %arg5: memref<1x128xf32, #tpu.memory_space<vmem>>, %arg6: memref<512x128xbf16, #tpu.memory_space<vmem>>, %arg7: memref<2x560x128xbf16, #tpu.memory_space<vmem>>, %arg8: memref<2x!tpu.dma_semaphore, #tpu.memory_space<semaphore_mem>>) attributes {dimension_semantics = [#tpu.dimension_semantics<parallel>, #tpu.dimension_semantics<arbitrary>], iteration_bounds = array<i64: 2, 1>, scalar_prefetch = 0 : i64, scratch_operands = 2 : i64, tpu.core_type = #tpu.core_type<tc>, window_params = [{}, {pipeline_mode = #tpu.pipeline_mode<synchronous>, transform_indices = @transform_1, window_bounds = array<i64: 9, 128, 128>}, {pipeline_mode = #tpu.pipeline_mode<synchronous>, transform_indices = @transform_2, window_bounds = array<i64: 1, 128>}, {pipeline_mode = #tpu.pipeline_mode<synchronous>, transform_indices = @transform_3, window_bounds = array<i64: 1, 128>}, {transform_indices = @transform_4, window_bounds = array<i64: 512, 128>}]} {
    %c1_i32 = arith.constant 1 : i32
    %0 = arith.muli %arg0, %c1_i32 : i32
    %1 = arith.addi %0, %arg1 : i32
    %c0_i32 = arith.constant 0 : i32
    %2 = arith.cmpi eq, %arg1, %c0_i32 : i32
    %3 = arith.extui %2 : i1 to i32
    %c0_i32_0 = arith.constant 0 : i32
    %4 = arith.cmpi ne, %3, %c0_i32_0 : i32
    scf.if %4 {
      %c1_i32_54 = arith.constant 1 : i32
      %87 = arith.andi %1, %c1_i32_54 : i32
      %c512_i32 = arith.constant 512 : i32
      %88 = arith.muli %1, %c512_i32 : i32
      %89 = tpu.assume_multiple %88, 512 : i32
      %c0_i32_55 = arith.constant 0 : i32
      %90 = tpu.memref_slice %arg2[%89, %c0_i32_55] : memref<1072x128xbf16, #tpu.memory_space<any>> -> memref<560x128xbf16, #tpu.memory_space<any>>
      %c0_i32_56 = arith.constant 0 : i32
      %c0_i32_57 = arith.constant 0 : i32
      %91 = tpu.memref_slice %arg7[%87, %c0_i32_56, %c0_i32_57] : memref<2x560x128xbf16, #tpu.memory_space<vmem>> -> memref<1x560x128xbf16, #tpu.memory_space<vmem>>
      %92 = tpu.memref_squeeze %91 : memref<1x560x128xbf16, #tpu.memory_space<vmem>> -> memref<560x128xbf16, #tpu.memory_space<vmem>>
      %93 = tpu.memref_slice %arg8[%87] : memref<2x!tpu.dma_semaphore, #tpu.memory_space<semaphore_mem>> -> memref<1x!tpu.dma_semaphore, #tpu.memory_space<semaphore_mem>>
      %94 = tpu.memref_squeeze %93 : memref<1x!tpu.dma_semaphore, #tpu.memory_space<semaphore_mem>> -> memref<!tpu.dma_semaphore, #tpu.memory_space<semaphore_mem>>
      tpu.enqueue_dma source(%90 : memref<560x128xbf16, #tpu.memory_space<any>>) target(%92 : memref<560x128xbf16, #tpu.memory_space<vmem>>) target_semaphore(%94 : memref<!tpu.dma_semaphore, #tpu.memory_space<semaphore_mem>>)
    } else {
    }
    %c1_i32_1 = arith.constant 1 : i32
    %5 = arith.addi %arg1, %c1_i32_1 : i32
    %c1_i32_2 = arith.constant 1 : i32
    %6 = arith.cmpi slt, %5, %c1_i32_2 : i32
    %7 = arith.extui %6 : i1 to i32
    %c0_i32_3 = arith.constant 0 : i32
    %8 = arith.cmpi ne, %7, %c0_i32_3 : i32
    scf.if %8 {
      %c1_i32_54 = arith.constant 1 : i32
      %87 = arith.addi %1, %c1_i32_54 : i32
      %c1_i32_55 = arith.constant 1 : i32
      %88 = arith.addi %1, %c1_i32_55 : i32
      %c1_i32_56 = arith.constant 1 : i32
      %89 = arith.andi %88, %c1_i32_56 : i32
      %c512_i32 = arith.constant 512 : i32
      %90 = arith.muli %87, %c512_i32 : i32
      %91 = tpu.assume_multiple %90, 512 : i32
      %c0_i32_57 = arith.constant 0 : i32
      %92 = tpu.memref_slice %arg2[%91, %c0_i32_57] : memref<1072x128xbf16, #tpu.memory_space<any>> -> memref<560x128xbf16, #tpu.memory_space<any>>
      %c0_i32_58 = arith.constant 0 : i32
      %c0_i32_59 = arith.constant 0 : i32
      %93 = tpu.memref_slice %arg7[%89, %c0_i32_58, %c0_i32_59] : memref<2x560x128xbf16, #tpu.memory_space<vmem>> -> memref<1x560x128xbf16, #tpu.memory_space<vmem>>
      %94 = tpu.memref_squeeze %93 : memref<1x560x128xbf16, #tpu.memory_space<vmem>> -> memref<560x128xbf16, #tpu.memory_space<vmem>>
      %95 = tpu.memref_slice %arg8[%89] : memref<2x!tpu.dma_semaphore, #tpu.memory_space<semaphore_mem>> -> memref<1x!tpu.dma_semaphore, #tpu.memory_space<semaphore_mem>>
      %96 = tpu.memref_squeeze %95 : memref<1x!tpu.dma_semaphore, #tpu.memory_space<semaphore_mem>> -> memref<!tpu.dma_semaphore, #tpu.memory_space<semaphore_mem>>
      tpu.enqueue_dma source(%92 : memref<560x128xbf16, #tpu.memory_space<any>>) target(%94 : memref<560x128xbf16, #tpu.memory_space<vmem>>) target_semaphore(%96 : memref<!tpu.dma_semaphore, #tpu.memory_space<semaphore_mem>>)
    } else {
    }
    %c1_i32_4 = arith.constant 1 : i32
    %9 = arith.andi %1, %c1_i32_4 : i32
    %c0_i32_5 = arith.constant 0 : i32
    %c0_i32_6 = arith.constant 0 : i32
    %10 = tpu.memref_slice %arg2[%c0_i32_5, %c0_i32_6] : memref<1072x128xbf16, #tpu.memory_space<any>> -> memref<560x128xbf16, #tpu.memory_space<any>>
    %c0_i32_7 = arith.constant 0 : i32
    %c0_i32_8 = arith.constant 0 : i32
    %11 = tpu.memref_slice %arg7[%9, %c0_i32_7, %c0_i32_8] : memref<2x560x128xbf16, #tpu.memory_space<vmem>> -> memref<1x560x128xbf16, #tpu.memory_space<vmem>>
    %12 = tpu.memref_squeeze %11 : memref<1x560x128xbf16, #tpu.memory_space<vmem>> -> memref<560x128xbf16, #tpu.memory_space<vmem>>
    %13 = tpu.memref_slice %arg8[%9] : memref<2x!tpu.dma_semaphore, #tpu.memory_space<semaphore_mem>> -> memref<1x!tpu.dma_semaphore, #tpu.memory_space<semaphore_mem>>
    %14 = tpu.memref_squeeze %13 : memref<1x!tpu.dma_semaphore, #tpu.memory_space<semaphore_mem>> -> memref<!tpu.dma_semaphore, #tpu.memory_space<semaphore_mem>>
    tpu.wait_dma2 semaphore(%14 : memref<!tpu.dma_semaphore, #tpu.memory_space<semaphore_mem>>) src(%10 : memref<560x128xbf16, #tpu.memory_space<any>>) dst(%12 : memref<560x128xbf16, #tpu.memory_space<vmem>>)
    %15 = arith.index_cast %9 : i32 to index
    %c0 = arith.constant 0 : index
    %c0_9 = arith.constant 0 : index
    %16 = vector.load %arg7[%15, %c0, %c0_9] : memref<2x560x128xbf16, #tpu.memory_space<vmem>>, vector<1x512x128xbf16>
    %17 = vector.shape_cast %16 : vector<1x512x128xbf16> to vector<512x128xbf16>
    %c0_10 = arith.constant 0 : index
    %c0_11 = arith.constant 0 : index
    %c0_12 = arith.constant 0 : index
    %18 = vector.load %arg3[%c0_10, %c0_11, %c0_12] : memref<9x128x128xbf16, #tpu.memory_space<vmem>>, vector<1x128x128xbf16>
    %19 = vector.shape_cast %18 : vector<1x128x128xbf16> to vector<128x128xbf16>
    %cst = arith.constant dense<0.000000e+00> : vector<512x128xf32>
    %20 = tpu.matmul %17, %19, %cst {dimension_numbers = #tpu.dot_dimension_numbers<[1], [0], [0], [1], [0, 0, 1, 1], [], []>} : vector<512x128xbf16>, vector<128x128xbf16>, vector<512x128xf32> -> vector<512x128xf32>
    %21 = arith.index_cast %9 : i32 to index
    %c1 = arith.constant 1 : index
    %c0_13 = arith.constant 0 : index
    %22 = vector.load %arg7[%21, %c1, %c0_13] : memref<2x560x128xbf16, #tpu.memory_space<vmem>>, vector<1x512x128xbf16>
    %23 = vector.shape_cast %22 : vector<1x512x128xbf16> to vector<512x128xbf16>
    %c1_14 = arith.constant 1 : index
    %c0_15 = arith.constant 0 : index
    %c0_16 = arith.constant 0 : index
    %24 = vector.load %arg3[%c1_14, %c0_15, %c0_16] : memref<9x128x128xbf16, #tpu.memory_space<vmem>>, vector<1x128x128xbf16>
    %25 = vector.shape_cast %24 : vector<1x128x128xbf16> to vector<128x128xbf16>
    %cst_17 = arith.constant dense<0.000000e+00> : vector<512x128xf32>
    %26 = tpu.matmul %23, %25, %cst_17 {dimension_numbers = #tpu.dot_dimension_numbers<[1], [0], [0], [1], [0, 0, 1, 1], [], []>} : vector<512x128xbf16>, vector<128x128xbf16>, vector<512x128xf32> -> vector<512x128xf32>
    %27 = arith.addf %20, %26 : vector<512x128xf32>
    %28 = arith.index_cast %9 : i32 to index
    %c2 = arith.constant 2 : index
    %c0_18 = arith.constant 0 : index
    %29 = vector.load %arg7[%28, %c2, %c0_18] : memref<2x560x128xbf16, #tpu.memory_space<vmem>>, vector<1x512x128xbf16>
    %30 = vector.shape_cast %29 : vector<1x512x128xbf16> to vector<512x128xbf16>
    %c2_19 = arith.constant 2 : index
    %c0_20 = arith.constant 0 : index
    %c0_21 = arith.constant 0 : index
    %31 = vector.load %arg3[%c2_19, %c0_20, %c0_21] : memref<9x128x128xbf16, #tpu.memory_space<vmem>>, vector<1x128x128xbf16>
    %32 = vector.shape_cast %31 : vector<1x128x128xbf16> to vector<128x128xbf16>
    %cst_22 = arith.constant dense<0.000000e+00> : vector<512x128xf32>
    %33 = tpu.matmul %30, %32, %cst_22 {dimension_numbers = #tpu.dot_dimension_numbers<[1], [0], [0], [1], [0, 0, 1, 1], [], []>} : vector<512x128xbf16>, vector<128x128xbf16>, vector<512x128xf32> -> vector<512x128xf32>
    %34 = arith.addf %27, %33 : vector<512x128xf32>
    %35 = arith.index_cast %9 : i32 to index
    %c18 = arith.constant 18 : index
    %c0_23 = arith.constant 0 : index
    %36 = vector.load %arg7[%35, %c18, %c0_23] : memref<2x560x128xbf16, #tpu.memory_space<vmem>>, vector<1x512x128xbf16>
    %37 = vector.shape_cast %36 : vector<1x512x128xbf16> to vector<512x128xbf16>
    %c3 = arith.constant 3 : index
    %c0_24 = arith.constant 0 : index
    %c0_25 = arith.constant 0 : index
    %38 = vector.load %arg3[%c3, %c0_24, %c0_25] : memref<9x128x128xbf16, #tpu.memory_space<vmem>>, vector<1x128x128xbf16>
    %39 = vector.shape_cast %38 : vector<1x128x128xbf16> to vector<128x128xbf16>
    %cst_26 = arith.constant dense<0.000000e+00> : vector<512x128xf32>
    %40 = tpu.matmul %37, %39, %cst_26 {dimension_numbers = #tpu.dot_dimension_numbers<[1], [0], [0], [1], [0, 0, 1, 1], [], []>} : vector<512x128xbf16>, vector<128x128xbf16>, vector<512x128xf32> -> vector<512x128xf32>
    %41 = arith.addf %34, %40 : vector<512x128xf32>
    %42 = arith.index_cast %9 : i32 to index
    %c19 = arith.constant 19 : index
    %c0_27 = arith.constant 0 : index
    %43 = vector.load %arg7[%42, %c19, %c0_27] : memref<2x560x128xbf16, #tpu.memory_space<vmem>>, vector<1x512x128xbf16>
    %44 = vector.shape_cast %43 : vector<1x512x128xbf16> to vector<512x128xbf16>
    %c4 = arith.constant 4 : index
    %c0_28 = arith.constant 0 : index
    %c0_29 = arith.constant 0 : index
    %45 = vector.load %arg3[%c4, %c0_28, %c0_29] : memref<9x128x128xbf16, #tpu.memory_space<vmem>>, vector<1x128x128xbf16>
    %46 = vector.shape_cast %45 : vector<1x128x128xbf16> to vector<128x128xbf16>
    %cst_30 = arith.constant dense<0.000000e+00> : vector<512x128xf32>
    %47 = tpu.matmul %44, %46, %cst_30 {dimension_numbers = #tpu.dot_dimension_numbers<[1], [0], [0], [1], [0, 0, 1, 1], [], []>} : vector<512x128xbf16>, vector<128x128xbf16>, vector<512x128xf32> -> vector<512x128xf32>
    %48 = arith.addf %41, %47 : vector<512x128xf32>
    %49 = arith.index_cast %9 : i32 to index
    %c20 = arith.constant 20 : index
    %c0_31 = arith.constant 0 : index
    %50 = vector.load %arg7[%49, %c20, %c0_31] : memref<2x560x128xbf16, #tpu.memory_space<vmem>>, vector<1x512x128xbf16>
    %51 = vector.shape_cast %50 : vector<1x512x128xbf16> to vector<512x128xbf16>
    %c5 = arith.constant 5 : index
    %c0_32 = arith.constant 0 : index
    %c0_33 = arith.constant 0 : index
    %52 = vector.load %arg3[%c5, %c0_32, %c0_33] : memref<9x128x128xbf16, #tpu.memory_space<vmem>>, vector<1x128x128xbf16>
    %53 = vector.shape_cast %52 : vector<1x128x128xbf16> to vector<128x128xbf16>
    %cst_34 = arith.constant dense<0.000000e+00> : vector<512x128xf32>
    %54 = tpu.matmul %51, %53, %cst_34 {dimension_numbers = #tpu.dot_dimension_numbers<[1], [0], [0], [1], [0, 0, 1, 1], [], []>} : vector<512x128xbf16>, vector<128x128xbf16>, vector<512x128xf32> -> vector<512x128xf32>
    %55 = arith.addf %48, %54 : vector<512x128xf32>
    %56 = arith.index_cast %9 : i32 to index
    %c36 = arith.constant 36 : index
    %c0_35 = arith.constant 0 : index
    %57 = vector.load %arg7[%56, %c36, %c0_35] : memref<2x560x128xbf16, #tpu.memory_space<vmem>>, vector<1x512x128xbf16>
    %58 = vector.shape_cast %57 : vector<1x512x128xbf16> to vector<512x128xbf16>
    %c6 = arith.constant 6 : index
    %c0_36 = arith.constant 0 : index
    %c0_37 = arith.constant 0 : index
    %59 = vector.load %arg3[%c6, %c0_36, %c0_37] : memref<9x128x128xbf16, #tpu.memory_space<vmem>>, vector<1x128x128xbf16>
    %60 = vector.shape_cast %59 : vector<1x128x128xbf16> to vector<128x128xbf16>
    %cst_38 = arith.constant dense<0.000000e+00> : vector<512x128xf32>
    %61 = tpu.matmul %58, %60, %cst_38 {dimension_numbers = #tpu.dot_dimension_numbers<[1], [0], [0], [1], [0, 0, 1, 1], [], []>} : vector<512x128xbf16>, vector<128x128xbf16>, vector<512x128xf32> -> vector<512x128xf32>
    %62 = arith.addf %55, %61 : vector<512x128xf32>
    %63 = arith.index_cast %9 : i32 to index
    %c37 = arith.constant 37 : index
    %c0_39 = arith.constant 0 : index
    %64 = vector.load %arg7[%63, %c37, %c0_39] : memref<2x560x128xbf16, #tpu.memory_space<vmem>>, vector<1x512x128xbf16>
    %65 = vector.shape_cast %64 : vector<1x512x128xbf16> to vector<512x128xbf16>
    %c7 = arith.constant 7 : index
    %c0_40 = arith.constant 0 : index
    %c0_41 = arith.constant 0 : index
    %66 = vector.load %arg3[%c7, %c0_40, %c0_41] : memref<9x128x128xbf16, #tpu.memory_space<vmem>>, vector<1x128x128xbf16>
    %67 = vector.shape_cast %66 : vector<1x128x128xbf16> to vector<128x128xbf16>
    %cst_42 = arith.constant dense<0.000000e+00> : vector<512x128xf32>
    %68 = tpu.matmul %65, %67, %cst_42 {dimension_numbers = #tpu.dot_dimension_numbers<[1], [0], [0], [1], [0, 0, 1, 1], [], []>} : vector<512x128xbf16>, vector<128x128xbf16>, vector<512x128xf32> -> vector<512x128xf32>
    %69 = arith.addf %62, %68 : vector<512x128xf32>
    %70 = arith.index_cast %9 : i32 to index
    %c38 = arith.constant 38 : index
    %c0_43 = arith.constant 0 : index
    %71 = vector.load %arg7[%70, %c38, %c0_43] : memref<2x560x128xbf16, #tpu.memory_space<vmem>>, vector<1x512x128xbf16>
    %72 = vector.shape_cast %71 : vector<1x512x128xbf16> to vector<512x128xbf16>
    %c8 = arith.constant 8 : index
    %c0_44 = arith.constant 0 : index
    %c0_45 = arith.constant 0 : index
    %73 = vector.load %arg3[%c8, %c0_44, %c0_45] : memref<9x128x128xbf16, #tpu.memory_space<vmem>>, vector<1x128x128xbf16>
    %74 = vector.shape_cast %73 : vector<1x128x128xbf16> to vector<128x128xbf16>
    %cst_46 = arith.constant dense<0.000000e+00> : vector<512x128xf32>
    %75 = tpu.matmul %72, %74, %cst_46 {dimension_numbers = #tpu.dot_dimension_numbers<[1], [0], [0], [1], [0, 0, 1, 1], [], []>} : vector<512x128xbf16>, vector<128x128xbf16>, vector<512x128xf32> -> vector<512x128xf32>
    %76 = arith.addf %69, %75 : vector<512x128xf32>
    %c0_47 = arith.constant 0 : index
    %c0_48 = arith.constant 0 : index
    %77 = vector.load %arg4[%c0_47, %c0_48] : memref<1x128xf32, #tpu.memory_space<vmem>>, vector<1x128xf32>
    %78 = vector.broadcast %77 : vector<1x128xf32> to vector<512x128xf32>
    %79 = arith.mulf %76, %78 : vector<512x128xf32>
    %c0_49 = arith.constant 0 : index
    %c0_50 = arith.constant 0 : index
    %80 = vector.load %arg5[%c0_49, %c0_50] : memref<1x128xf32, #tpu.memory_space<vmem>>, vector<1x128xf32>
    %81 = vector.broadcast %80 : vector<1x128xf32> to vector<512x128xf32>
    %82 = arith.addf %79, %81 : vector<512x128xf32>
    %cst_51 = arith.constant 0.000000e+00 : f32
    %83 = vector.broadcast %cst_51 : f32 to vector<512x128xf32>
    %84 = arith.maximumf %82, %83 : vector<512x128xf32>
    %85 = arith.truncf %84 : vector<512x128xf32> to vector<512x128xbf16>
    %c0_52 = arith.constant 0 : index
    %c0_53 = arith.constant 0 : index
    %86 = vector.load %arg6[%c0_52, %c0_53] : memref<512x128xbf16, #tpu.memory_space<vmem>>, vector<512x128xbf16>
    tpu.vector_store %arg6[%c0_52, %c0_53], %85 {strides = array<i32>} : memref<512x128xbf16, #tpu.memory_space<vmem>>, vector<512x128xbf16>,
    return
  }
  func.func @transform_1(%arg0: i32, %arg1: i32) -> (i32, i32, i32) {
    %c0_i32 = arith.constant 0 : i32
    %c0_i32_0 = arith.constant 0 : i32
    %c0_i32_1 = arith.constant 0 : i32
    %c0_i32_2 = arith.constant 0 : i32
    return %c0_i32, %c0_i32_0, %c0_i32_1 : i32, i32, i32
  }
  func.func @transform_2(%arg0: i32, %arg1: i32) -> (i32, i32) {
    %c0_i32 = arith.constant 0 : i32
    %c0_i32_0 = arith.constant 0 : i32
    %c0_i32_1 = arith.constant 0 : i32
    return %c0_i32, %c0_i32_0 : i32, i32
  }
  func.func @transform_3(%arg0: i32, %arg1: i32) -> (i32, i32) {
    %c0_i32 = arith.constant 0 : i32
    %c0_i32_0 = arith.constant 0 : i32
    %c0_i32_1 = arith.constant 0 : i32
    return %c0_i32, %c0_i32_0 : i32, i32
  }
  func.func @transform_4(%arg0: i32, %arg1: i32) -> (i32, i32) {
    %c1_i32 = arith.constant 1 : i32
    %0 = arith.muli %arg0, %c1_i32 : i32
    %1 = arith.addi %0, %arg1 : i32
    %c0_i32 = arith.constant 0 : i32
    %c0_i32_0 = arith.constant 0 : i32
    return %1, %c0_i32 : i32, i32
  }
}

module attributes {stable_mosaic.version = 11 : i64} {
  func.func @_mm_residual_kernel(%arg0: i32, %arg1: i32, %arg2: memref<512x128xbf16, #tpu.memory_space<vmem>>, %arg3: memref<128x128xbf16, #tpu.memory_space<vmem>>, %arg4: memref<512x4xbf16, #tpu.memory_space<vmem>>, %arg5: memref<4x128xbf16, #tpu.memory_space<vmem>>, %arg6: memref<1x128xf32, #tpu.memory_space<vmem>>, %arg7: memref<1x128xf32, #tpu.memory_space<vmem>>, %arg8: memref<512x128xbf16, #tpu.memory_space<vmem>>) attributes {dimension_semantics = [#tpu.dimension_semantics<parallel>, #tpu.dimension_semantics<parallel>], iteration_bounds = array<i64: 1, 1>, scalar_prefetch = 0 : i64, scratch_operands = 0 : i64, tpu.core_type = #tpu.core_type<tc>, window_params = [{transform_indices = @transform_0, window_bounds = array<i64: 512, 128>}, {pipeline_mode = #tpu.pipeline_mode<synchronous>, transform_indices = @transform_1, window_bounds = array<i64: 128, 128>}, {transform_indices = @transform_2, window_bounds = array<i64: 512, 4>}, {pipeline_mode = #tpu.pipeline_mode<synchronous>, transform_indices = @transform_3, window_bounds = array<i64: 4, 128>}, {pipeline_mode = #tpu.pipeline_mode<synchronous>, transform_indices = @transform_4, window_bounds = array<i64: 1, 128>}, {pipeline_mode = #tpu.pipeline_mode<synchronous>, transform_indices = @transform_5, window_bounds = array<i64: 1, 128>}, {transform_indices = @transform_6, window_bounds = array<i64: 512, 128>}]} {
    %c0 = arith.constant 0 : index
    %c0_0 = arith.constant 0 : index
    %0 = vector.load %arg2[%c0, %c0_0] : memref<512x128xbf16, #tpu.memory_space<vmem>>, vector<512x128xbf16>
    %c0_1 = arith.constant 0 : index
    %c0_2 = arith.constant 0 : index
    %1 = vector.load %arg3[%c0_1, %c0_2] : memref<128x128xbf16, #tpu.memory_space<vmem>>, vector<128x128xbf16>
    %cst = arith.constant dense<0.000000e+00> : vector<512x128xf32>
    %2 = tpu.matmul %0, %1, %cst {dimension_numbers = #tpu.dot_dimension_numbers<[1], [0], [0], [1], [0, 0, 1, 1], [], []>} : vector<512x128xbf16>, vector<128x128xbf16>, vector<512x128xf32> -> vector<512x128xf32>
    %c0_3 = arith.constant 0 : index
    %c0_4 = arith.constant 0 : index
    %3 = vector.load %arg6[%c0_3, %c0_4] : memref<1x128xf32, #tpu.memory_space<vmem>>, vector<1x128xf32>
    %4 = vector.broadcast %3 : vector<1x128xf32> to vector<512x128xf32>
    %5 = arith.mulf %2, %4 : vector<512x128xf32>
    %c0_5 = arith.constant 0 : index
    %c0_6 = arith.constant 0 : index
    %6 = vector.load %arg7[%c0_5, %c0_6] : memref<1x128xf32, #tpu.memory_space<vmem>>, vector<1x128xf32>
    %7 = vector.broadcast %6 : vector<1x128xf32> to vector<512x128xf32>
    %8 = arith.addf %5, %7 : vector<512x128xf32>
    %c0_7 = arith.constant 0 : index
    %c0_8 = arith.constant 0 : index
    %9 = vector.load %arg4[%c0_7, %c0_8] : memref<512x4xbf16, #tpu.memory_space<vmem>>, vector<512x4xbf16>
    %c0_9 = arith.constant 0 : index
    %c0_10 = arith.constant 0 : index
    %10 = vector.load %arg5[%c0_9, %c0_10] : memref<4x128xbf16, #tpu.memory_space<vmem>>, vector<4x128xbf16>
    %cst_11 = arith.constant dense<0.000000e+00> : vector<512x128xf32>
    %11 = tpu.matmul %9, %10, %cst_11 {dimension_numbers = #tpu.dot_dimension_numbers<[1], [0], [0], [1], [0, 0, 1, 1], [], []>} : vector<512x4xbf16>, vector<4x128xbf16>, vector<512x128xf32> -> vector<512x128xf32>
    %12 = arith.addf %8, %11 : vector<512x128xf32>
    %cst_12 = arith.constant 0.000000e+00 : f32
    %13 = vector.broadcast %cst_12 : f32 to vector<512x128xf32>
    %14 = arith.maximumf %12, %13 : vector<512x128xf32>
    %15 = arith.truncf %14 : vector<512x128xf32> to vector<512x128xbf16>
    %c0_13 = arith.constant 0 : index
    %c0_14 = arith.constant 0 : index
    %16 = vector.load %arg8[%c0_13, %c0_14] : memref<512x128xbf16, #tpu.memory_space<vmem>>, vector<512x128xbf16>
    tpu.vector_store %arg8[%c0_13, %c0_14], %15 {strides = array<i32>} : memref<512x128xbf16, #tpu.memory_space<vmem>>, vector<512x128xbf16>,
    return
  }
  func.func @transform_0(%arg0: i32, %arg1: i32) -> (i32, i32) {
    %c0_i32 = arith.constant 0 : i32
    %c0_i32_0 = arith.constant 0 : i32
    return %arg0, %c0_i32 : i32, i32
  }
  func.func @transform_1(%arg0: i32, %arg1: i32) -> (i32, i32) {
    %c0_i32 = arith.constant 0 : i32
    %c0_i32_0 = arith.constant 0 : i32
    return %c0_i32, %arg1 : i32, i32
  }
  func.func @transform_2(%arg0: i32, %arg1: i32) -> (i32, i32) {
    %c0_i32 = arith.constant 0 : i32
    %c0_i32_0 = arith.constant 0 : i32
    return %arg0, %c0_i32 : i32, i32
  }
  func.func @transform_3(%arg0: i32, %arg1: i32) -> (i32, i32) {
    %c0_i32 = arith.constant 0 : i32
    %c0_i32_0 = arith.constant 0 : i32
    return %c0_i32, %arg1 : i32, i32
  }
  func.func @transform_4(%arg0: i32, %arg1: i32) -> (i32, i32) {
    %c0_i32 = arith.constant 0 : i32
    %c0_i32_0 = arith.constant 0 : i32
    return %c0_i32, %arg1 : i32, i32
  }
  func.func @transform_5(%arg0: i32, %arg1: i32) -> (i32, i32) {
    %c0_i32 = arith.constant 0 : i32
    %c0_i32_0 = arith.constant 0 : i32
    return %c0_i32, %arg1 : i32, i32
  }
  func.func @transform_6(%arg0: i32, %arg1: i32) -> (i32, i32) {
    %c0_i32 = arith.constant 0 : i32
    return %arg0, %arg1 : i32, i32
  }
}

</mosaic_0001>

<bundles_post_ra>
// kernel: residual_block_forward.3
= control target key start
LH: loop header
LB: loop body
LE: loop exit
PB: predicated region body
PF: predicated region fallthrough
CT: control target
= control target key end

     0   :  { %vm340_vm0 = vcmask 1041408   ;;  %vm243_vm1 = vcmask 31744   ;;  %s2073_s1 = inlined_call_operand.vmem [shape: bf16[4,128], index: 1, kind: input, shape index: {}]   ;;  %s2074_s0 = inlined_call_operand.vmem [shape: bf16[512,4], index: 0, kind: input, shape index: {}]   ;;  %s2075_s2 = inlined_call_operand.vmem [shape: f32[1,128], index: 2, kind: input, shape index: {}]   ;;  %s2076_s3 = inlined_call_operand.vmem [shape: f32[1,128], index: 3, kind: input, shape index: {}]   ;;  %s2077_s4 = inlined_call_operand.vmem [shape: bf16[512,128], index: 4, kind: output, shape index: {}]  }
   0x1   :  { %v82_v0 = vld [vmem:[%s2073_s1] sm:$0x3]  ;;  %v1653_v4 = vld [vmem:[%s2074_s0 + $0x8] sm:$0xff]   ;;  %v1655_v6 = vld [vmem:[%s2074_s0 + $0x10] sm:$0xff]  }
   0x2   :  { %1649 = vmatprep.subr.msk.bf16.mxu0 %vm340_vm0, %v82_v0  ;;  %1650 = vmatprep.subr.msk.bf16.mxu1 %vm340_vm0, %v82_v0  ;;  %v342_v1 = vsel %vm340_vm0, %v82_v0, 0  ;;  %v1651_v2 = vld [vmem:[%s2074_s0] sm:$0xff]   ;;  %v1654_v5 = vld [vmem:[%s2074_s0 + $0x88] sm:$0xff]   ;;  %v1656_v7 = vld [vmem:[%s2074_s0 + $0x90] sm:$0xff]  }
   0x3   :  { %1582 = vmatpush3.bf16.msra.mxu0 %v342_v1  ;;  %1648 = vmatpush3.bf16.msra.mxu1 %v342_v1  ;;  %v1652_v3 = vld [vmem:[%s2074_s0 + $0x80] sm:$0xff]   ;;  %v1657_v8 = vld [vmem:[%s2074_s0 + $0x18] sm:$0xff]   ;;  %v1661_v12 = vld [vmem:[%s2074_s0 + $0x28] sm:$0xff]  }
   0x4   :  { %1583 = vmatprep.mubr.msk.bf16.mxu0 %vm243_vm1, %v1651_v2  ;;  %1615 = vmatprep.mubr.msk.bf16.mxu1 %vm243_vm1, %v1652_v3  ;;  %v1658_v9 = vld [vmem:[%s2074_s0 + $0x98] sm:$0xff]   ;;  %v1659_v10 = vld [vmem:[%s2074_s0 + $0x20] sm:$0xff]   ;;  %v1662_v13 = vld [vmem:[%s2074_s0 + $0xa8] sm:$0xff]  }
   0x5   :  { %v1660_v11 = vld [vmem:[%s2074_s0 + $0xa0] sm:$0xff]   ;;  %v1663_v14 = vld [vmem:[%s2074_s0 + $0x30] sm:$0xff]   ;;  %v1665_v16 = vld [vmem:[%s2074_s0 + $0x38] sm:$0xff]  }
   0x6   :  { %1584 = vmatmul.mubr.msk.bf16.vlgmr.msra.gmra.mrb[0].mxu0 %vm243_vm1, %v1653_v4  ;;  %1616 = vmatmul.mubr.msk.bf16.vlgmr.msra.gmra.mrb[0].mxu1 %vm243_vm1, %v1654_v5  ;;  %v1664_v15 = vld [vmem:[%s2074_s0 + $0xb0] sm:$0xff]   ;;  %v1666_v17 = vld [vmem:[%s2074_s0 + $0xb8] sm:$0xff]   ;;  %v1667_v18 = vld [vmem:[%s2074_s0 + $0x40] sm:$0xff]  }
   0x7   :  { %1587 = vmatprep.mubr.msk.bf16.mxu0 %vm243_vm1, %v1655_v6  ;;  %1619 = vmatprep.mubr.msk.bf16.mxu1 %vm243_vm1, %v1656_v7  ;;  %v1668_v19 = vld [vmem:[%s2074_s0 + $0xc0] sm:$0xff]   ;;  %v1669_v20 = vld [vmem:[%s2074_s0 + $0x48] sm:$0xff]   ;;  %v1671_v22 = vld [vmem:[%s2074_s0 + $0x50] sm:$0xff]  }
   0x8   :  { %v1670_v21 = vld [vmem:[%s2074_s0 + $0xc8] sm:$0xff]   ;;  %v1672_v23 = vld [vmem:[%s2074_s0 + $0xd0] sm:$0xff]   ;;  %v1673_v24 = vld [vmem:[%s2074_s0 + $0x58] sm:$0xff]  }
   0x9   :  { %v1674_v25 = vld [vmem:[%s2074_s0 + $0xd8] sm:$0xff]   ;;  %v1675_v26 = vld [vmem:[%s2074_s0 + $0x60] sm:$0xff]   ;;  %v1677_v28 = vld [vmem:[%s2074_s0 + $0x68] sm:$0xff]  }
   0xa   :  { %v1676_v27 = vld [vmem:[%s2074_s0 + $0xe0] sm:$0xff]   ;;  %v1678_v29 = vld [vmem:[%s2074_s0 + $0xe8] sm:$0xff]   ;;  %v1679_v30 = vld [vmem:[%s2074_s0 + $0x70] sm:$0xff]  }
   0xb   :  { %v1680_v31 = vld [vmem:[%s2074_s0 + $0xf0] sm:$0xff]   ;;  %v1681_v32 = vld [vmem:[%s2074_s0 + $0x78] sm:$0xff]   ;;  %v1842_v34 = vld [vmem:[%s2075_s2] ss:$0 sm:$0xff] }
   0xc   :  { %v1682_v33 = vld [vmem:[%s2074_s0 + $0xf8] sm:$0xff]   ;;  %v1847_v36 = vld [vmem:[%s2076_s3] ss:$0 sm:$0xff] }
   0xe   :  { %1588 = vmatmul.mubr.msk.bf16.gmra.mrb[4].mxu0 %vm243_vm1, %v1657_v8  ;;  %1620 = vmatmul.mubr.msk.bf16.gmra.mrb[4].mxu1 %vm243_vm1, %v1658_v9 }
   0xf   :  { %1591 = vmatprep.mubr.msk.bf16.mxu0 %vm243_vm1, %v1659_v10  ;;  %1623 = vmatprep.mubr.msk.bf16.mxu1 %vm243_vm1, %v1660_v11 }
  0x16   :  { %1592 = vmatmul.mubr.msk.bf16.gmra.mrb[8].mxu0 %vm243_vm1, %v1661_v12  ;;  %1624 = vmatmul.mubr.msk.bf16.gmra.mrb[8].mxu1 %vm243_vm1, %v1662_v13 }
  0x17   :  { %1595 = vmatprep.mubr.msk.bf16.mxu0 %vm243_vm1, %v1663_v14  ;;  %1627 = vmatprep.mubr.msk.bf16.mxu1 %vm243_vm1, %v1664_v15 }
  0x1e   :  { %1596 = vmatmul.mubr.msk.bf16.gmra.mrb[12].mxu0 %vm243_vm1, %v1665_v16  ;;  %1628 = vmatmul.mubr.msk.bf16.gmra.mrb[12].mxu1 %vm243_vm1, %v1666_v17 }
  0x1f   :  { %1599 = vmatprep.mubr.msk.bf16.mxu0 %vm243_vm1, %v1667_v18  ;;  %1631 = vmatprep.mubr.msk.bf16.mxu1 %vm243_vm1, %v1668_v19 }
  0x26   :  { %1600 = vmatmul.mubr.msk.bf16.gmra.mrb[16].mxu0 %vm243_vm1, %v1669_v20  ;;  %1632 = vmatmul.mubr.msk.bf16.gmra.mrb[16].mxu1 %vm243_vm1, %v1670_v21 }
  0x27   :  { %1603 = vmatprep.mubr.msk.bf16.mxu0 %vm243_vm1, %v1671_v22  ;;  %1635 = vmatprep.mubr.msk.bf16.mxu1 %vm243_vm1, %v1672_v23 }
  0x2e   :  { %1604 = vmatmul.mubr.msk.bf16.gmra.mrb[20].mxu0 %vm243_vm1, %v1673_v24  ;;  %1636 = vmatmul.mubr.msk.bf16.gmra.mrb[20].mxu1 %vm243_vm1, %v1674_v25 }
  0x2f   :  { %1607 = vmatprep.mubr.msk.bf16.mxu0 %vm243_vm1, %v1675_v26  ;;  %1639 = vmatprep.mubr.msk.bf16.mxu1 %vm243_vm1, %v1676_v27 }
  0x36   :  { %1608 = vmatmul.mubr.msk.bf16.gmra.mrb[24].mxu0 %vm243_vm1, %v1677_v28  ;;  %1640 = vmatmul.mubr.msk.bf16.gmra.mrb[24].mxu1 %vm243_vm1, %v1678_v29 }
  0x37   :  { %1611 = vmatprep.mubr.msk.bf16.mxu0 %vm243_vm1, %v1679_v30  ;;  %1643 = vmatprep.mubr.msk.bf16.mxu1 %vm243_vm1, %v1680_v31 }
  0x3e   :  { %1612 = vmatmul.mubr.msk.bf16.gmra.mrb[28].mxu0 %vm243_vm1, %v1681_v32  ;;  %1644 = vmatmul.mubr.msk.bf16.gmra.mrb[28].mxu1 %vm243_vm1, %v1682_v33 }
  0xd9   :  { %v1585_v35 = vpop.f32.mrb[0].mxu0  ;;  %v1617_v38 = vpop.f32.mrb[0].mxu1 }
  0xda   :  { %v642_v37 = vmul.f32 %v1585_v35, %v1842_v34  ;;  %v378_v39 = vpop.f32.mrb[1].mxu0  ;;  %v674_v40 = vmul.f32 %v1617_v38, %v1842_v34  ;;  %v506_v42 = vpop.f32.mrb[1].mxu1 }
  0xdb   :  { %v640_v41 = vmul.f32 %v1842_v34, %v378_v39  ;;  %v1586_v43 = vpop.f32.mrb[2].mxu0  ;;  %v672_v45 = vmul.f32 %v1842_v34, %v506_v42  ;;  %v1618_v47 = vpop.f32.mrb[2].mxu1 }
  0xdc   :  { %v713_v44 = vadd.f32 %v1847_v36, %v642_v37  ;;  %v643_v46 = vmul.f32 %v1586_v43, %v1842_v34  ;;  %v381_v48 = vpop.f32.mrb[3].mxu0  ;;  %v745_v49 = vadd.f32 %v1847_v36, %v674_v40  ;;  %v675_v51 = vmul.f32 %v1618_v47, %v1842_v34  ;;  %v509_v53 = vpop.f32.mrb[3].mxu1 }
  0xdd   :  { %v711_v50 = vadd.f32 %v1847_v36, %v640_v41  ;;  %v641_v52 = vmul.f32 %v1842_v34, %v381_v48  ;;  %v743_v54 = vadd.f32 %v1847_v36, %v672_v45  ;;  %v673_v56 = vmul.f32 %v1842_v34, %v509_v53 }
  0xde   :  { %v714_v55 = vadd.f32 %v1847_v36, %v643_v46  ;;  %v746_v57 = vadd.f32 %v1847_v36, %v675_v51  ;;  %v777_v59 = vmax.f32 %v713_v44, 0.0  ;;  %v809_v62 = vmax.f32 %v745_v49, 0.0 }
  0xdf   :  { %v712_v58 = vadd.f32 %v1847_v36, %v641_v52  ;;  %v744_v61 = vadd.f32 %v1847_v36, %v673_v56  ;;  %v775_v63 = vmax.f32 %v711_v50, 0.0  ;;  %v807_v3 = vmax.f32 %v743_v54, 0.0 }
  0xe0   :  { %v778_v60 = vmax.f32 %v714_v55, 0.0  ;;  %v810_v0 = vmax.f32 %v746_v57, 0.0 }
  0xe1   :  { %v776_v1 = vmax.f32 %v712_v58, 0.0  ;;  %v1589_v2 = vpop.f32.mrb[4].mxu0  ;;  %v808_v5 = vmax.f32 %v744_v61, 0.0  ;;  %v1621_v7 = vpop.f32.mrb[4].mxu1 }
  0xe2   :  { %v1365_v4 = vpack.c.bf16 %v778_v60, %v777_v59  ;;  %v646_v6 = vmul.f32 %v1589_v2, %v1842_v34  ;;  %v394_v8 = vpop.f32.mrb[5].mxu0  ;;  %v1445_v9 = vpack.c.bf16 %v810_v0, %v809_v62  ;;  %v678_v11 = vmul.f32 %v1621_v7, %v1842_v34  ;;  %v522_v13 = vpop.f32.mrb[5].mxu1 }
  0xe3   :  { %v1360_v10 = vpack.c.bf16 %v776_v1, %v775_v63  ;;  %v644_v12 = vmul.f32 %v1842_v34, %v394_v8  ;;  %v1590_v14 = vpop.f32.mrb[6].mxu0  ;;  %v1440_v15 = vpack.c.bf16 %v808_v5, %v807_v3  ;;  %v676_v17 = vmul.f32 %v1842_v34, %v522_v13  ;;  %v1622_v19 = vpop.f32.mrb[6].mxu1 }
  0xe4   :  { %1517 = vst [vmem:[%s2077_s4 + $0x8] sm:$0xff] %v1365_v4   ;;  %v717_v16 = vadd.f32 %v1847_v36, %v646_v6  ;;  %v647_v18 = vmul.f32 %v1590_v14, %v1842_v34  ;;  %v397_v20 = vpop.f32.mrb[7].mxu0  ;;  %1533 = vst [vmem:[%s2077_s4 + $0x88] sm:$0xff] %v1445_v9   ;;  %v749_v21 = vadd.f32 %v1847_v36, %v678_v11  ;;  %v525_v25 = vpop.f32.mrb[7].mxu1 }
  0xe5   :  { %1361 = vst [vmem:[%s2077_s4] sm:$0xff] %v1360_v10   ;;  %v715_v22 = vadd.f32 %v1847_v36, %v644_v12  ;;  %v679_v23 = vmul.f32 %v1622_v19, %v1842_v34  ;;  %v645_v24 = vmul.f32 %v1842_v34, %v397_v20  ;;  %1532 = vst [vmem:[%s2077_s4 + $0x80] sm:$0xff] %v1440_v15  }
  0xe6   :  { %v747_v26 = vadd.f32 %v1847_v36, %v676_v17  ;;  %v718_v27 = vadd.f32 %v1847_v36, %v647_v18  ;;  %v677_v28 = vmul.f32 %v1842_v34, %v525_v25  ;;  %v781_v31 = vmax.f32 %v717_v16, 0.0 }
  0xe7   :  { %v750_v29 = vadd.f32 %v1847_v36, %v679_v23  ;;  %v716_v30 = vadd.f32 %v1847_v36, %v645_v24  ;;  %v813_v35 = vmax.f32 %v749_v21, 0.0  ;;  %v779_v37 = vmax.f32 %v715_v22, 0.0 }
  0xe8   :  { %v782_v32 = vmax.f32 %v718_v27, 0.0  ;;  %v748_v33 = vadd.f32 %v1847_v36, %v677_v28  ;;  %v811_v41 = vmax.f32 %v747_v26, 0.0 }
  0xe9   :  { %v814_v38 = vmax.f32 %v750_v29, 0.0  ;;  %v780_v39 = vmax.f32 %v716_v30, 0.0  ;;  %v1593_v40 = vpop.f32.mrb[8].mxu0  ;;  %v1625_v45 = vpop.f32.mrb[8].mxu1 }
  0xea   :  { %v1375_v42 = vpack.c.bf16 %v782_v32, %v781_v31  ;;  %v812_v43 = vmax.f32 %v748_v33, 0.0  ;;  %v650_v44 = vmul.f32 %v1593_v40, %v1842_v34  ;;  %v410_v46 = vpop.f32.mrb[9].mxu0  ;;  %v682_v49 = vmul.f32 %v1625_v45, %v1842_v34  ;;  %v538_v51 = vpop.f32.mrb[9].mxu1 }
  0xeb   :  { %v1455_v47 = vpack.c.bf16 %v814_v38, %v813_v35  ;;  %v1370_v48 = vpack.c.bf16 %v780_v39, %v779_v37  ;;  %v648_v50 = vmul.f32 %v1842_v34, %v410_v46  ;;  %v1594_v52 = vpop.f32.mrb[10].mxu0  ;;  %v680_v55 = vmul.f32 %v1842_v34, %v538_v51  ;;  %v1626_v57 = vpop.f32.mrb[10].mxu1 }
  0xec   :  { %1519 = vst [vmem:[%s2077_s4 + $0x18] sm:$0xff] %v1375_v42   ;;  %v1450_v53 = vpack.c.bf16 %v812_v43, %v811_v41  ;;  %v721_v54 = vadd.f32 %v1847_v36, %v650_v44  ;;  %v651_v56 = vmul.f32 %v1594_v52, %v1842_v34  ;;  %v413_v58 = vpop.f32.mrb[11].mxu0  ;;  %v753_v59 = vadd.f32 %v1847_v36, %v682_v49  ;;  %v541_v63 = vpop.f32.mrb[11].mxu1 }
  0xed   :  { %1535 = vst [vmem:[%s2077_s4 + $0x98] sm:$0xff] %v1455_v47   ;;  %1518 = vst [vmem:[%s2077_s4 + $0x10] sm:$0xff] %v1370_v48   ;;  %v719_v60 = vadd.f32 %v1847_v36, %v648_v50  ;;  %v683_v61 = vmul.f32 %v1626_v57, %v1842_v34  ;;  %v649_v62 = vmul.f32 %v1842_v34, %v413_v58 }
  0xee   :  { %1534 = vst [vmem:[%s2077_s4 + $0x90] sm:$0xff] %v1450_v53   ;;  %v751_v0 = vadd.f32 %v1847_v36, %v680_v55  ;;  %v722_v1 = vadd.f32 %v1847_v36, %v651_v56  ;;  %v681_v2 = vmul.f32 %v1842_v34, %v541_v63  ;;  %v785_v5 = vmax.f32 %v721_v54, 0.0 }
  0xef   :  { %v754_v3 = vadd.f32 %v1847_v36, %v683_v61  ;;  %v720_v4 = vadd.f32 %v1847_v36, %v649_v62  ;;  %v817_v8 = vmax.f32 %v753_v59, 0.0  ;;  %v783_v9 = vmax.f32 %v719_v60, 0.0 }
  0xf0   :  { %v786_v6 = vmax.f32 %v722_v1, 0.0  ;;  %v752_v7 = vadd.f32 %v1847_v36, %v681_v2  ;;  %v815_v13 = vmax.f32 %v751_v0, 0.0 }
  0xf1   :  { %v818_v10 = vmax.f32 %v754_v3, 0.0  ;;  %v784_v11 = vmax.f32 %v720_v4, 0.0  ;;  %v1597_v12 = vpop.f32.mrb[12].mxu0  ;;  %v1629_v17 = vpop.f32.mrb[12].mxu1 }
  0xf2   :  { %v1385_v14 = vpack.c.bf16 %v786_v6, %v785_v5  ;;  %v816_v15 = vmax.f32 %v752_v7, 0.0  ;;  %v654_v16 = vmul.f32 %v1597_v12, %v1842_v34  ;;  %v426_v18 = vpop.f32.mrb[13].mxu0  ;;  %v686_v21 = vmul.f32 %v1629_v17, %v1842_v34  ;;  %v554_v23 = vpop.f32.mrb[13].mxu1 }
  0xf3   :  { %v1465_v19 = vpack.c.bf16 %v818_v10, %v817_v8  ;;  %v1380_v20 = vpack.c.bf16 %v784_v11, %v783_v9  ;;  %v652_v22 = vmul.f32 %v1842_v34, %v426_v18  ;;  %v1598_v24 = vpop.f32.mrb[14].mxu0  ;;  %v684_v27 = vmul.f32 %v1842_v34, %v554_v23  ;;  %v1630_v29 = vpop.f32.mrb[14].mxu1 }
  0xf4   :  { %1521 = vst [vmem:[%s2077_s4 + $0x28] sm:$0xff] %v1385_v14   ;;  %v1460_v25 = vpack.c.bf16 %v816_v15, %v815_v13  ;;  %v725_v26 = vadd.f32 %v1847_v36, %v654_v16  ;;  %v655_v28 = vmul.f32 %v1598_v24, %v1842_v34  ;;  %v429_v30 = vpop.f32.mrb[15].mxu0  ;;  %v757_v31 = vadd.f32 %v1847_v36, %v686_v21  ;;  %v557_v37 = vpop.f32.mrb[15].mxu1 }
  0xf5   :  { %1537 = vst [vmem:[%s2077_s4 + $0xa8] sm:$0xff] %v1465_v19   ;;  %1520 = vst [vmem:[%s2077_s4 + $0x20] sm:$0xff] %v1380_v20   ;;  %v723_v32 = vadd.f32 %v1847_v36, %v652_v22  ;;  %v687_v33 = vmul.f32 %v1630_v29, %v1842_v34  ;;  %v653_v35 = vmul.f32 %v1842_v34, %v429_v30 }
  0xf6   :  { %1536 = vst [vmem:[%s2077_s4 + $0xa0] sm:$0xff] %v1460_v25   ;;  %v755_v38 = vadd.f32 %v1847_v36, %v684_v27  ;;  %v726_v39 = vadd.f32 %v1847_v36, %v655_v28  ;;  %v685_v40 = vmul.f32 %v1842_v34, %v557_v37  ;;  %v789_v43 = vmax.f32 %v725_v26, 0.0 }
  0xf7   :  { %v758_v41 = vadd.f32 %v1847_v36, %v687_v33  ;;  %v724_v42 = vadd.f32 %v1847_v36, %v653_v35  ;;  %v821_v46 = vmax.f32 %v757_v31, 0.0  ;;  %v787_v47 = vmax.f32 %v723_v32, 0.0 }
  0xf8   :  { %v790_v44 = vmax.f32 %v726_v39, 0.0  ;;  %v756_v45 = vadd.f32 %v1847_v36, %v685_v40  ;;  %v819_v51 = vmax.f32 %v755_v38, 0.0 }
  0xf9   :  { %v822_v48 = vmax.f32 %v758_v41, 0.0  ;;  %v788_v49 = vmax.f32 %v724_v42, 0.0  ;;  %v1601_v50 = vpop.f32.mrb[16].mxu0  ;;  %v1633_v55 = vpop.f32.mrb[16].mxu1 }
  0xfa   :  { %v1395_v52 = vpack.c.bf16 %v790_v44, %v789_v43  ;;  %v820_v53 = vmax.f32 %v756_v45, 0.0  ;;  %v658_v54 = vmul.f32 %v1601_v50, %v1842_v34  ;;  %v442_v56 = vpop.f32.mrb[17].mxu0  ;;  %v690_v59 = vmul.f32 %v1633_v55, %v1842_v34  ;;  %v570_v61 = vpop.f32.mrb[17].mxu1 }
  0xfb   :  { %v1475_v57 = vpack.c.bf16 %v822_v48, %v821_v46  ;;  %v1390_v58 = vpack.c.bf16 %v788_v49, %v787_v47  ;;  %v656_v60 = vmul.f32 %v1842_v34, %v442_v56  ;;  %v1602_v62 = vpop.f32.mrb[18].mxu0  ;;  %v688_v1 = vmul.f32 %v1842_v34, %v570_v61  ;;  %v1634_v3 = vpop.f32.mrb[18].mxu1 }
  0xfc   :  { %1523 = vst [vmem:[%s2077_s4 + $0x38] sm:$0xff] %v1395_v52   ;;  %v1470_v63 = vpack.c.bf16 %v820_v53, %v819_v51  ;;  %v729_v0 = vadd.f32 %v1847_v36, %v658_v54  ;;  %v659_v2 = vmul.f32 %v1602_v62, %v1842_v34  ;;  %v445_v4 = vpop.f32.mrb[19].mxu0  ;;  %v761_v5 = vadd.f32 %v1847_v36, %v690_v59  ;;  %v573_v9 = vpop.f32.mrb[19].mxu1 }
  0xfd   :  { %1539 = vst [vmem:[%s2077_s4 + $0xb8] sm:$0xff] %v1475_v57   ;;  %1522 = vst [vmem:[%s2077_s4 + $0x30] sm:$0xff] %v1390_v58   ;;  %v727_v6 = vadd.f32 %v1847_v36, %v656_v60  ;;  %v691_v7 = vmul.f32 %v1634_v3, %v1842_v34  ;;  %v657_v8 = vmul.f32 %v1842_v34, %v445_v4 }
  0xfe   :  { %1538 = vst [vmem:[%s2077_s4 + $0xb0] sm:$0xff] %v1470_v63   ;;  %v759_v10 = vadd.f32 %v1847_v36, %v688_v1  ;;  %v730_v11 = vadd.f32 %v1847_v36, %v659_v2  ;;  %v689_v12 = vmul.f32 %v1842_v34, %v573_v9  ;;  %v793_v15 = vmax.f32 %v729_v0, 0.0 }
  0xff   :  { %v762_v13 = vadd.f32 %v1847_v36, %v691_v7  ;;  %v728_v14 = vadd.f32 %v1847_v36, %v657_v8  ;;  %v825_v18 = vmax.f32 %v761_v5, 0.0  ;;  %v791_v19 = vmax.f32 %v727_v6, 0.0 }
 0x100   :  { %v794_v16 = vmax.f32 %v730_v11, 0.0  ;;  %v760_v17 = vadd.f32 %v1847_v36, %v689_v12  ;;  %v823_v23 = vmax.f32 %v759_v10, 0.0 }
 0x101   :  { %v826_v20 = vmax.f32 %v762_v13, 0.0  ;;  %v792_v21 = vmax.f32 %v728_v14, 0.0  ;;  %v1605_v22 = vpop.f32.mrb[20].mxu0  ;;  %v1637_v27 = vpop.f32.mrb[20].mxu1 }
 0x102   :  { %v1405_v24 = vpack.c.bf16 %v794_v16, %v793_v15  ;;  %v824_v25 = vmax.f32 %v760_v17, 0.0  ;;  %v662_v26 = vmul.f32 %v1605_v22, %v1842_v34  ;;  %v458_v28 = vpop.f32.mrb[21].mxu0  ;;  %v694_v31 = vmul.f32 %v1637_v27, %v1842_v34  ;;  %v586_v33 = vpop.f32.mrb[21].mxu1 }
 0x103   :  { %v1485_v29 = vpack.c.bf16 %v826_v20, %v825_v18  ;;  %v1400_v30 = vpack.c.bf16 %v792_v21, %v791_v19  ;;  %v660_v32 = vmul.f32 %v1842_v34, %v458_v28  ;;  %v1606_v35 = vpop.f32.mrb[22].mxu0  ;;  %v692_v39 = vmul.f32 %v1842_v34, %v586_v33  ;;  %v1638_v41 = vpop.f32.mrb[22].mxu1 }
 0x104   :  { %1525 = vst [vmem:[%s2077_s4 + $0x48] sm:$0xff] %v1405_v24   ;;  %v1480_v37 = vpack.c.bf16 %v824_v25, %v823_v23  ;;  %v733_v38 = vadd.f32 %v1847_v36, %v662_v26  ;;  %v663_v40 = vmul.f32 %v1606_v35, %v1842_v34  ;;  %v461_v42 = vpop.f32.mrb[23].mxu0  ;;  %v765_v43 = vadd.f32 %v1847_v36, %v694_v31  ;;  %v589_v47 = vpop.f32.mrb[23].mxu1 }
 0x105   :  { %1541 = vst [vmem:[%s2077_s4 + $0xc8] sm:$0xff] %v1485_v29   ;;  %1524 = vst [vmem:[%s2077_s4 + $0x40] sm:$0xff] %v1400_v30   ;;  %v731_v44 = vadd.f32 %v1847_v36, %v660_v32  ;;  %v695_v45 = vmul.f32 %v1638_v41, %v1842_v34  ;;  %v661_v46 = vmul.f32 %v1842_v34, %v461_v42 }
 0x106   :  { %1540 = vst [vmem:[%s2077_s4 + $0xc0] sm:$0xff] %v1480_v37   ;;  %v763_v48 = vadd.f32 %v1847_v36, %v692_v39  ;;  %v734_v49 = vadd.f32 %v1847_v36, %v663_v40  ;;  %v693_v50 = vmul.f32 %v1842_v34, %v589_v47  ;;  %v797_v53 = vmax.f32 %v733_v38, 0.0 }
 0x107   :  { %v766_v51 = vadd.f32 %v1847_v36, %v695_v45  ;;  %v732_v52 = vadd.f32 %v1847_v36, %v661_v46  ;;  %v829_v56 = vmax.f32 %v765_v43, 0.0  ;;  %v795_v57 = vmax.f32 %v731_v44, 0.0 }
 0x108   :  { %v798_v54 = vmax.f32 %v734_v49, 0.0  ;;  %v764_v55 = vadd.f32 %v1847_v36, %v693_v50  ;;  %v827_v61 = vmax.f32 %v763_v48, 0.0 }
 0x109   :  { %v830_v58 = vmax.f32 %v766_v51, 0.0  ;;  %v796_v59 = vmax.f32 %v732_v52, 0.0  ;;  %v1609_v60 = vpop.f32.mrb[24].mxu0  ;;  %v1641_v1 = vpop.f32.mrb[24].mxu1 }
 0x10a   :  { %v1415_v62 = vpack.c.bf16 %v798_v54, %v797_v53  ;;  %v828_v63 = vmax.f32 %v764_v55, 0.0  ;;  %v666_v0 = vmul.f32 %v1609_v60, %v1842_v34  ;;  %v474_v2 = vpop.f32.mrb[25].mxu0  ;;  %v698_v5 = vmul.f32 %v1641_v1, %v1842_v34  ;;  %v602_v7 = vpop.f32.mrb[25].mxu1 }
 0x10b   :  { %v1495_v3 = vpack.c.bf16 %v830_v58, %v829_v56  ;;  %v1410_v4 = vpack.c.bf16 %v796_v59, %v795_v57  ;;  %v664_v6 = vmul.f32 %v1842_v34, %v474_v2  ;;  %v1610_v8 = vpop.f32.mrb[26].mxu0  ;;  %v696_v11 = vmul.f32 %v1842_v34, %v602_v7  ;;  %v1642_v13 = vpop.f32.mrb[26].mxu1 }
 0x10c   :  { %1527 = vst [vmem:[%s2077_s4 + $0x58] sm:$0xff] %v1415_v62   ;;  %v1490_v9 = vpack.c.bf16 %v828_v63, %v827_v61  ;;  %v737_v10 = vadd.f32 %v1847_v36, %v666_v0  ;;  %v667_v12 = vmul.f32 %v1610_v8, %v1842_v34  ;;  %v477_v14 = vpop.f32.mrb[27].mxu0  ;;  %v769_v15 = vadd.f32 %v1847_v36, %v698_v5  ;;  %v605_v19 = vpop.f32.mrb[27].mxu1 }
 0x10d   :  { %1543 = vst [vmem:[%s2077_s4 + $0xd8] sm:$0xff] %v1495_v3   ;;  %1526 = vst [vmem:[%s2077_s4 + $0x50] sm:$0xff] %v1410_v4   ;;  %v735_v16 = vadd.f32 %v1847_v36, %v664_v6  ;;  %v699_v17 = vmul.f32 %v1642_v13, %v1842_v34  ;;  %v665_v18 = vmul.f32 %v1842_v34, %v477_v14 }
 0x10e   :  { %1542 = vst [vmem:[%s2077_s4 + $0xd0] sm:$0xff] %v1490_v9   ;;  %v767_v20 = vadd.f32 %v1847_v36, %v696_v11  ;;  %v738_v21 = vadd.f32 %v1847_v36, %v667_v12  ;;  %v697_v22 = vmul.f32 %v1842_v34, %v605_v19  ;;  %v801_v25 = vmax.f32 %v737_v10, 0.0 }
 0x10f   :  { %v770_v23 = vadd.f32 %v1847_v36, %v699_v17  ;;  %v736_v24 = vadd.f32 %v1847_v36, %v665_v18  ;;  %v833_v28 = vmax.f32 %v769_v15, 0.0  ;;  %v799_v29 = vmax.f32 %v735_v16, 0.0 }
 0x110   :  { %v802_v26 = vmax.f32 %v738_v21, 0.0  ;;  %v768_v27 = vadd.f32 %v1847_v36, %v697_v22  ;;  %v831_v33 = vmax.f32 %v767_v20, 0.0 }
 0x111   :  { %v834_v30 = vmax.f32 %v770_v23, 0.0  ;;  %v800_v31 = vmax.f32 %v736_v24, 0.0  ;;  %v1613_v32 = vpop.f32.mrb[28].mxu0  ;;  %v1645_v39 = vpop.f32.mrb[28].mxu1 }
 0x112   :  { %v1425_v35 = vpack.c.bf16 %v802_v26, %v801_v25  ;;  %v832_v37 = vmax.f32 %v768_v27, 0.0  ;;  %v670_v38 = vmul.f32 %v1613_v32, %v1842_v34  ;;  %v490_v40 = vpop.f32.mrb[29].mxu0  ;;  %v702_v43 = vmul.f32 %v1645_v39, %v1842_v34  ;;  %v618_v45 = vpop.f32.mrb[29].mxu1 }
 0x113   :  { %v1505_v41 = vpack.c.bf16 %v834_v30, %v833_v28  ;;  %v1420_v42 = vpack.c.bf16 %v800_v31, %v799_v29  ;;  %v668_v44 = vmul.f32 %v1842_v34, %v490_v40  ;;  %v1614_v46 = vpop.f32.mrb[30].mxu0  ;;  %v700_v49 = vmul.f32 %v1842_v34, %v618_v45  ;;  %v1646_v51 = vpop.f32.mrb[30].mxu1 }
 0x114   :  { %1529 = vst [vmem:[%s2077_s4 + $0x68] sm:$0xff] %v1425_v35   ;;  %v1500_v47 = vpack.c.bf16 %v832_v37, %v831_v33  ;;  %v741_v48 = vadd.f32 %v1847_v36, %v670_v38  ;;  %v671_v50 = vmul.f32 %v1614_v46, %v1842_v34  ;;  %v493_v52 = vpop.f32.mrb[31].mxu0  ;;  %v773_v53 = vadd.f32 %v1847_v36, %v702_v43  ;;  %v621_v57 = vpop.f32.mrb[31].mxu1 }
 0x115   :  { %1545 = vst [vmem:[%s2077_s4 + $0xe8] sm:$0xff] %v1505_v41   ;;  %1528 = vst [vmem:[%s2077_s4 + $0x60] sm:$0xff] %v1420_v42   ;;  %v739_v54 = vadd.f32 %v1847_v36, %v668_v44  ;;  %v703_v55 = vmul.f32 %v1646_v51, %v1842_v34  ;;  %v669_v56 = vmul.f32 %v1842_v34, %v493_v52 }
 0x116   :  { %1544 = vst [vmem:[%s2077_s4 + $0xe0] sm:$0xff] %v1500_v47   ;;  %v771_v58 = vadd.f32 %v1847_v36, %v700_v49  ;;  %v742_v59 = vadd.f32 %v1847_v36, %v671_v50  ;;  %v701_v60 = vmul.f32 %v1842_v34, %v621_v57  ;;  %v805_v63 = vmax.f32 %v741_v48, 0.0 }
 0x117   :  { %v774_v61 = vadd.f32 %v1847_v36, %v703_v55  ;;  %v740_v62 = vadd.f32 %v1847_v36, %v669_v56  ;;  %v837_v2 = vmax.f32 %v773_v53, 0.0  ;;  %v803_v3 = vmax.f32 %v739_v54, 0.0 }
 0x118   :  { %v806_v0 = vmax.f32 %v742_v59, 0.0  ;;  %v772_v1 = vadd.f32 %v1847_v36, %v701_v60  ;;  %v835_v6 = vmax.f32 %v771_v58, 0.0 }
 0x119   :  { %v838_v4 = vmax.f32 %v774_v61, 0.0  ;;  %v804_v5 = vmax.f32 %v740_v62, 0.0 }
 0x11a   :  { %v1435_v7 = vpack.c.bf16 %v806_v0, %v805_v63  ;;  %v836_v8 = vmax.f32 %v772_v1, 0.0 }
 0x11b   :  { %v1515_v9 = vpack.c.bf16 %v838_v4, %v837_v2  ;;  %v1430_v10 = vpack.c.bf16 %v804_v5, %v803_v3 }
 0x11c   :  { %1531 = vst [vmem:[%s2077_s4 + $0x78] sm:$0xff] %v1435_v7   ;;  %v1510_v34 = vpack.c.bf16 %v836_v8, %v835_v6 }
 0x11d   :  { %1547 = vst [vmem:[%s2077_s4 + $0xf8] sm:$0xff] %v1515_v9   ;;  %1530 = vst [vmem:[%s2077_s4 + $0x70] sm:$0xff] %v1430_v10  }
 0x11e   :  { %1546 = vst [vmem:[%s2077_s4 + $0xf0] sm:$0xff] %v1510_v34  }

// kernel: residual_block_forward.5
= control target key start
LH: loop header
LB: loop body
LE: loop exit
PB: predicated region body
PF: predicated region fallthrough
CT: control target
= control target key end

     0   :  { %vm1097_vm0 = vcmask 1041408   ;;  %vm1000_vm1 = vcmask 31744   ;;  %s3247_s1 = inlined_call_operand.vmem [shape: bf16[128,128], index: 1, kind: input, shape index: {}]   ;;  %s3248_s3 = inlined_call_operand.vmem [shape: bf16[4,128], index: 3, kind: input, shape index: {}]   ;;  %s3249_s0 = inlined_call_operand.vmem [shape: bf16[512,128], index: 0, kind: input, shape index: {}]   ;;  %s3250_s2 = inlined_call_operand.vmem [shape: bf16[512,4], index: 2, kind: input, shape index: {}]   ;;  %s3251_s4 = inlined_call_operand.vmem [shape: f32[1,128], index: 4, kind: input, shape index: {}]   ;;  %s3252_s5 = inlined_call_operand.vmem [shape: f32[1,128], index: 5, kind: input, shape index: {}]   ;;  %s3253_s6 = inlined_call_operand.vmem [shape: bf16[512,128], index: 6, kind: output, shape index: {}]  }
   0x1   :  { %v2487_v0 = vld [vmem:[%s3247_s1] sm:$0xff]   ;;  %v2488_v1 = vld [vmem:[%s3247_s1 + $0x8] sm:$0xff]   ;;  %v2489_v2 = vld [vmem:[%s3247_s1 + $0x10] sm:$0xff]  }
   0x2   :  { %2340 = vmatprep.subr.bf16.mxu0 %v2487_v0  ;;  %v2490_v3 = vld [vmem:[%s3247_s1 + $0x18] sm:$0xff]   ;;  %v839_v4 = vld [vmem:[%s3248_s3] sm:$0x3]  ;;  %v2498_v9 = vld [vmem:[%s3250_s2 + $0x8] sm:$0xff]  }
   0x3   :  { %2341 = vmatpush3.bf16.msra.mxu0 %v2487_v0  ;;  %2486 = vmatprep.subr.msk.bf16.mxu1 %vm1097_vm0, %v839_v4  ;;  %v1099_v5 = vsel %vm1097_vm0, %v839_v4, 0  ;;  %v2495_v6 = vld [vmem:[%s3249_s0] sm:$0xff]   ;;  %v2501_v10 = vld [vmem:[%s3250_s2 + $0x10] sm:$0xff]   ;;  %v2492_v11 = vld [vmem:[%s3247_s1 + $0x28] sm:$0xff]  }
   0x4   :  { %2342 = vmatprep.subr.bf16.mxu0 %v2488_v1  ;;  %v2491_v7 = vld [vmem:[%s3247_s1 + $0x20] sm:$0xff]   ;;  %2421 = vmatpush3.bf16.msra.mxu1 %v1099_v5  ;;  %v2502_v12 = vld [vmem:[%s3250_s2 + $0x18] sm:$0xff]   ;;  %v2493_v14 = vld [vmem:[%s3247_s1 + $0x30] sm:$0xff]  }
   0x5   :  { %2356 = vmatprep.mubr.bf16.mxu0 %v2495_v6  ;;  %v2497_v8 = vld [vmem:[%s3250_s2] sm:$0xff]   ;;  %v2494_v15 = vld [vmem:[%s3247_s1 + $0x38] sm:$0xff]   ;;  %v2506_v16 = vld [vmem:[%s3250_s2 + $0x28] sm:$0xff]  }
   0x6   :  { %2422 = vmatprep.mubr.msk.bf16.mxu1 %vm1000_vm1, %v2497_v8  ;;  %v2505_v13 = vld [vmem:[%s3250_s2 + $0x20] sm:$0xff]   ;;  %v2509_v17 = vld [vmem:[%s3250_s2 + $0x30] sm:$0xff]   ;;  %v2496_v18 = vld [vmem:[%s3249_s0 + $0x8] sm:$0xff]  }
   0x7   :  { %2343 = vmatpush3.bf16.msra.mxu0 %v2488_v1  ;;  %2423 = vmatmul.mubr.msk.bf16.vlgmr.msra.gmra.mrb[0].mxu1 %vm1000_vm1, %v2498_v9  ;;  %v2499_v19 = vld [vmem:[%s3249_s0 + $0x10] sm:$0xff]   ;;  %v2510_v20 = vld [vmem:[%s3250_s2 + $0x38] sm:$0xff]   ;;  %v2513_v21 = vld [vmem:[%s3250_s2 + $0x40] sm:$0xff]  }
   0x8   :  { %2344 = vmatprep.subr.bf16.mxu0 %v2489_v2  ;;  %2426 = vmatprep.mubr.msk.bf16.mxu1 %vm1000_vm1, %v2501_v10  ;;  %v2500_v22 = vld [vmem:[%s3249_s0 + $0x18] sm:$0xff]   ;;  %v2503_v23 = vld [vmem:[%s3249_s0 + $0x20] sm:$0xff]   ;;  %v2514_v24 = vld [vmem:[%s3250_s2 + $0x48] sm:$0xff]  }
   0x9   :  { %v2517_v25 = vld [vmem:[%s3250_s2 + $0x50] sm:$0xff]   ;;  %v2504_v26 = vld [vmem:[%s3249_s0 + $0x28] sm:$0xff]   ;;  %v2518_v28 = vld [vmem:[%s3250_s2 + $0x58] sm:$0xff]  }
   0xa   :  { %v2507_v27 = vld [vmem:[%s3249_s0 + $0x30] sm:$0xff]   ;;  %v2521_v29 = vld [vmem:[%s3250_s2 + $0x60] sm:$0xff]   ;;  %v2508_v30 = vld [vmem:[%s3249_s0 + $0x38] sm:$0xff]  }
   0xb   :  { %2345 = vmatpush3.bf16.msra.mxu0 %v2489_v2  ;;  %v2511_v31 = vld [vmem:[%s3249_s0 + $0x40] sm:$0xff]   ;;  %v2522_v32 = vld [vmem:[%s3250_s2 + $0x68] sm:$0xff]   ;;  %v2525_v33 = vld [vmem:[%s3250_s2 + $0x70] sm:$0xff]  }
   0xc   :  { %2346 = vmatprep.subr.bf16.mxu0 %v2490_v3  ;;  %v2512_v34 = vld [vmem:[%s3249_s0 + $0x48] sm:$0xff]   ;;  %v2515_v35 = vld [vmem:[%s3249_s0 + $0x50] sm:$0xff]   ;;  %v2526_v36 = vld [vmem:[%s3250_s2 + $0x78] sm:$0xff]  }
   0xd   :  { %v2529_v37 = vld [vmem:[%s3250_s2 + $0x80] sm:$0xff]   ;;  %v2516_v38 = vld [vmem:[%s3249_s0 + $0x58] sm:$0xff]   ;;  %v2530_v40 = vld [vmem:[%s3250_s2 + $0x88] sm:$0xff]  }
   0xe   :  { %v2519_v39 = vld [vmem:[%s3249_s0 + $0x60] sm:$0xff]   ;;  %v2533_v41 = vld [vmem:[%s3250_s2 + $0x90] sm:$0xff]   ;;  %v2520_v42 = vld [vmem:[%s3249_s0 + $0x68] sm:$0xff]  }
   0xf   :  { %2347 = vmatpush3.bf16.msra.mxu0 %v2490_v3  ;;  %2427 = vmatmul.mubr.msk.bf16.gmra.mrb[4].mxu1 %vm1000_vm1, %v2502_v12  ;;  %v2523_v43 = vld [vmem:[%s3249_s0 + $0x70] sm:$0xff]   ;;  %v2534_v44 = vld [vmem:[%s3250_s2 + $0x98] sm:$0xff]   ;;  %v2537_v45 = vld [vmem:[%s3250_s2 + $0xa0] sm:$0xff]  }
  0x10   :  { %2348 = vmatprep.subr.bf16.mxu0 %v2491_v7  ;;  %2430 = vmatprep.mubr.msk.bf16.mxu1 %vm1000_vm1, %v2505_v13  ;;  %v2524_v46 = vld [vmem:[%s3249_s0 + $0x78] sm:$0xff]   ;;  %v2527_v47 = vld [vmem:[%s3249_s0 + $0x80] sm:$0xff]   ;;  %v2538_v48 = vld [vmem:[%s3250_s2 + $0xa8] sm:$0xff]  }
  0x11   :  { %v2541_v49 = vld [vmem:[%s3250_s2 + $0xb0] sm:$0xff]   ;;  %v2528_v50 = vld [vmem:[%s3249_s0 + $0x88] sm:$0xff]   ;;  %v2542_v52 = vld [vmem:[%s3250_s2 + $0xb8] sm:$0xff]  }
  0x12   :  { %v2531_v51 = vld [vmem:[%s3249_s0 + $0x90] sm:$0xff]   ;;  %v2545_v53 = vld [vmem:[%s3250_s2 + $0xc0] sm:$0xff]   ;;  %v2532_v54 = vld [vmem:[%s3249_s0 + $0x98] sm:$0xff]  }
  0x13   :  { %2349 = vmatpush3.bf16.msra.mxu0 %v2491_v7  ;;  %v2535_v55 = vld [vmem:[%s3249_s0 + $0xa0] sm:$0xff]   ;;  %v2546_v56 = vld [vmem:[%s3250_s2 + $0xc8] sm:$0xff]   ;;  %v2549_v57 = vld [vmem:[%s3250_s2 + $0xd0] sm:$0xff]  }
  0x14   :  { %2350 = vmatprep.subr.bf16.mxu0 %v2492_v11  ;;  %v2536_v58 = vld [vmem:[%s3249_s0 + $0xa8] sm:$0xff]   ;;  %v2539_v59 = vld [vmem:[%s3249_s0 + $0xb0] sm:$0xff]   ;;  %v2550_v60 = vld [vmem:[%s3250_s2 + $0xd8] sm:$0xff]  }
  0x15   :  { %v2553_v61 = vld [vmem:[%s3250_s2 + $0xe0] sm:$0xff]   ;;  %v2540_v62 = vld [vmem:[%s3249_s0 + $0xb8] sm:$0xff]   ;;  %v2554_v0 = vld [vmem:[%s3250_s2 + $0xe8] sm:$0xff]  }
  0x16   :  { %v2543_v63 = vld [vmem:[%s3249_s0 + $0xc0] sm:$0xff]   ;;  %v2557_v1 = vld [vmem:[%s3250_s2 + $0xf0] sm:$0xff]   ;;  %v2544_v2 = vld [vmem:[%s3249_s0 + $0xc8] sm:$0xff]  }
  0x17   :  { %2351 = vmatpush3.bf16.msra.mxu0 %v2492_v11  ;;  %2431 = vmatmul.mubr.msk.bf16.gmra.mrb[8].mxu1 %vm1000_vm1, %v2506_v16  ;;  %v2547_v3 = vld [vmem:[%s3249_s0 + $0xd0] sm:$0xff]   ;;  %v2558_v4 = vld [vmem:[%s3250_s2 + $0xf8] sm:$0xff]   ;;  %v2551_v6 = vld [vmem:[%s3249_s0 + $0xe0] sm:$0xff]  }
  0x18   :  { %2352 = vmatprep.subr.bf16.mxu0 %v2493_v14  ;;  %2434 = vmatprep.mubr.msk.bf16.mxu1 %vm1000_vm1, %v2509_v17  ;;  %v2548_v5 = vld [vmem:[%s3249_s0 + $0xd8] sm:$0xff]   ;;  %v2552_v7 = vld [vmem:[%s3249_s0 + $0xe8] sm:$0xff]   ;;  %v2555_v8 = vld [vmem:[%s3249_s0 + $0xf0] sm:$0xff]  }
  0x19   :  { %v2556_v9 = vld [vmem:[%s3249_s0 + $0xf8] sm:$0xff]  }
  0x1b   :  { %2353 = vmatpush3.bf16.msra.mxu0 %v2493_v14 }
  0x1c   :  { %2354 = vmatprep.subr.bf16.mxu0 %v2494_v15 }
  0x1f   :  { %2355 = vmatpush3.bf16.msra.mxu0 %v2494_v15  ;;  %2435 = vmatmul.mubr.msk.bf16.gmra.mrb[12].mxu1 %vm1000_vm1, %v2510_v20  ;;  %v2852_v20 = vld [vmem:[%s3251_s4] ss:$0 sm:$0xff] }
  0x20   :  { %2438 = vmatprep.mubr.msk.bf16.mxu1 %vm1000_vm1, %v2513_v21 }
  0x22   :  { %2357 = vmatmul.mubr.bf16.vlgmr.msra.gmra.mrb[0].mxu0 %v2496_v18 }
  0x23   :  { %2360 = vmatprep.mubr.bf16.mxu0 %v2499_v19 }
  0x27   :  { %2439 = vmatmul.mubr.msk.bf16.gmra.mrb[16].mxu1 %vm1000_vm1, %v2514_v24  ;;  %v2861_v24 = vld [vmem:[%s3252_s5] ss:$0 sm:$0xff] }
  0x28   :  { %2442 = vmatprep.mubr.msk.bf16.mxu1 %vm1000_vm1, %v2517_v25 }
  0x2a   :  { %2361 = vmatmul.mubr.bf16.gmra.mrb[4].mxu0 %v2500_v22 }
  0x2b   :  { %2364 = vmatprep.mubr.bf16.mxu0 %v2503_v23 }
  0x2f   :  { %2443 = vmatmul.mubr.msk.bf16.gmra.mrb[20].mxu1 %vm1000_vm1, %v2518_v28 }
  0x30   :  { %2446 = vmatprep.mubr.msk.bf16.mxu1 %vm1000_vm1, %v2521_v29 }
  0x32   :  { %2365 = vmatmul.mubr.bf16.gmra.mrb[8].mxu0 %v2504_v26 }
  0x33   :  { %2368 = vmatprep.mubr.bf16.mxu0 %v2507_v27 }
  0x37   :  { %2447 = vmatmul.mubr.msk.bf16.gmra.mrb[24].mxu1 %vm1000_vm1, %v2522_v32 }
  0x38   :  { %2450 = vmatprep.mubr.msk.bf16.mxu1 %vm1000_vm1, %v2525_v33 }
  0x3a   :  { %2369 = vmatmul.mubr.bf16.gmra.mrb[12].mxu0 %v2508_v30 }
  0x3b   :  { %2372 = vmatprep.mubr.bf16.mxu0 %v2511_v31 }
  0x3f   :  { %2451 = vmatmul.mubr.msk.bf16.gmra.mrb[28].mxu1 %vm1000_vm1, %v2526_v36 }
  0x40   :  { %2454 = vmatprep.mubr.msk.bf16.mxu1 %vm1000_vm1, %v2529_v37 }
  0x42   :  { %2373 = vmatmul.mubr.bf16.gmra.mrb[16].mxu0 %v2512_v34 }
  0x43   :  { %2376 = vmatprep.mubr.bf16.mxu0 %v2515_v35 }
  0x47   :  { %2455 = vmatmul.mubr.msk.bf16.gmra.mrb[32].mxu1 %vm1000_vm1, %v2530_v40 }
  0x48   :  { %2458 = vmatprep.mubr.msk.bf16.mxu1 %vm1000_vm1, %v2533_v41 }
  0x4a   :  { %2377 = vmatmul.mubr.bf16.gmra.mrb[20].mxu0 %v2516_v38 }
  0x4b   :  { %2380 = vmatprep.mubr.bf16.mxu0 %v2519_v39 }
  0x4f   :  { %2459 = vmatmul.mubr.msk.bf16.gmra.mrb[36].mxu1 %vm1000_vm1, %v2534_v44 }
  0x50   :  { %2462 = vmatprep.mubr.msk.bf16.mxu1 %vm1000_vm1, %v2537_v45 }
  0x52   :  { %2381 = vmatmul.mubr.bf16.gmra.mrb[24].mxu0 %v2520_v42 }
  0x53   :  { %2384 = vmatprep.mubr.bf16.mxu0 %v2523_v43 }
  0x57   :  { %2463 = vmatmul.mubr.msk.bf16.gmra.mrb[40].mxu1 %vm1000_vm1, %v2538_v48 }
  0x58   :  { %2466 = vmatprep.mubr.msk.bf16.mxu1 %vm1000_vm1, %v2541_v49 }
  0x5a   :  { %2385 = vmatmul.mubr.bf16.gmra.mrb[28].mxu0 %v2524_v46 }
  0x5b   :  { %2388 = vmatprep.mubr.bf16.mxu0 %v2527_v47 }
  0x5f   :  { %2467 = vmatmul.mubr.msk.bf16.gmra.mrb[44].mxu1 %vm1000_vm1, %v2542_v52 }
  0x60   :  { %2470 = vmatprep.mubr.msk.bf16.mxu1 %vm1000_vm1, %v2545_v53 }
  0x62   :  { %2389 = vmatmul.mubr.bf16.gmra.mrb[32].mxu0 %v2528_v50 }
  0x63   :  { %2392 = vmatprep.mubr.bf16.mxu0 %v2531_v51 }
  0x67   :  { %2471 = vmatmul.mubr.msk.bf16.gmra.mrb[48].mxu1 %vm1000_vm1, %v2546_v56 }
  0x68   :  { %2474 = vmatprep.mubr.msk.bf16.mxu1 %vm1000_vm1, %v2549_v57 }
  0x6a   :  { %2393 = vmatmul.mubr.bf16.gmra.mrb[36].mxu0 %v2532_v54 }
  0x6b   :  { %2396 = vmatprep.mubr.bf16.mxu0 %v2535_v55 }
  0x6f   :  { %2475 = vmatmul.mubr.msk.bf16.gmra.mrb[52].mxu1 %vm1000_vm1, %v2550_v60 }
  0x70   :  { %2478 = vmatprep.mubr.msk.bf16.mxu1 %vm1000_vm1, %v2553_v61 }
  0x72   :  { %2397 = vmatmul.mubr.bf16.gmra.mrb[40].mxu0 %v2536_v58 }
  0x73   :  { %2400 = vmatprep.mubr.bf16.mxu0 %v2539_v59 }
  0x77   :  { %2479 = vmatmul.mubr.msk.bf16.gmra.mrb[56].mxu1 %vm1000_vm1, %v2554_v0 }
  0x78   :  { %2482 = vmatprep.mubr.msk.bf16.mxu1 %vm1000_vm1, %v2557_v1 }
  0x7a   :  { %2401 = vmatmul.mubr.bf16.gmra.mrb[44].mxu0 %v2540_v62 }
  0x7b   :  { %2404 = vmatprep.mubr.bf16.mxu0 %v2543_v63 }
  0x7f   :  { %2483 = vmatmul.mubr.msk.bf16.gmra.mrb[60].mxu1 %vm1000_vm1, %v2558_v4 }
  0x82   :  { %2405 = vmatmul.mubr.bf16.gmra.mrb[48].mxu0 %v2544_v2 }
  0x83   :  { %2408 = vmatprep.mubr.bf16.mxu0 %v2547_v3 }
  0x8a   :  { %2409 = vmatmul.mubr.bf16.gmra.mrb[52].mxu0 %v2548_v5 }
  0x8b   :  { %2412 = vmatprep.mubr.bf16.mxu0 %v2551_v6 }
  0x92   :  { %2413 = vmatmul.mubr.bf16.gmra.mrb[56].mxu0 %v2552_v7 }
  0x93   :  { %2416 = vmatprep.mubr.bf16.mxu0 %v2555_v8 }
  0x9a   :  { %2417 = vmatmul.mubr.bf16.gmra.mrb[60].mxu0 %v2556_v9 }
  0xda   :  { %v2424_v10 = vpop.f32.mrb[0].mxu1 }
  0xdb   :  { %v1135_v11 = vpop.f32.mrb[1].mxu1 }
  0xdc   :  { %v2425_v12 = vpop.f32.mrb[2].mxu1 }
  0xdd   :  { %v1138_v13 = vpop.f32.mrb[3].mxu1 }
  0xe2   :  { %v2428_v14 = vpop.f32.mrb[4].mxu1 }
  0xe3   :  { %v1151_v15 = vpop.f32.mrb[5].mxu1 }
  0xe4   :  { %v2429_v16 = vpop.f32.mrb[6].mxu1 }
  0xe5   :  { %v1154_v17 = vpop.f32.mrb[7].mxu1 }
  0xea   :  { %v2845_v18 = vpop.f32.mrb[8].mxu1 }
  0xeb   :  { %v2847_v19 = vpop.f32.mrb[9].mxu1 }
  0xec   :  { %v2854_v21 = vpop.f32.mrb[10].mxu1 }
  0xed   :  { %v2856_v22 = vpop.f32.mrb[11].mxu1 }
  0xf2   :  { %v2869_v34 = vpop.f32.mrb[12].mxu1 }
  0xf3   :  { %v2872_v37 = vpop.f32.mrb[13].mxu1 }
  0xf4   :  { %v2875_v40 = vpop.f32.mrb[14].mxu1 }
  0xf5   :  { %v2358_v23 = vpop.f32.mrb[0].mxu0  ;;  %v2877_v42 = vpop.f32.mrb[15].mxu1 }
  0xf6   :  { %v642_v25 = vmul.f32 %v2358_v23, %v2852_v20  ;;  %v378_v26 = vpop.f32.mrb[1].mxu0 }
  0xf7   :  { %v640_v27 = vmul.f32 %v2852_v20, %v378_v26  ;;  %v2359_v28 = vpop.f32.mrb[2].mxu0 }
  0xf8   :  { %v713_v29 = vadd.f32 %v2861_v24, %v642_v25  ;;  %v643_v30 = vmul.f32 %v2359_v28, %v2852_v20  ;;  %v381_v31 = vpop.f32.mrb[3].mxu0 }
  0xf9   :  { %v711_v32 = vadd.f32 %v2861_v24, %v640_v27  ;;  %v641_v33 = vmul.f32 %v2852_v20, %v381_v31 }
  0xfa   :  { %v1392_v35 = vadd.f32 %v2424_v10, %v713_v29  ;;  %v714_v36 = vadd.f32 %v2861_v24, %v643_v30  ;;  %v2885_v60 = vpop.f32.mrb[16].mxu1 }
  0xfb   :  { %v1390_v38 = vadd.f32 %v1135_v11, %v711_v32  ;;  %v712_v39 = vadd.f32 %v2861_v24, %v641_v33  ;;  %v2891_v63 = vpop.f32.mrb[17].mxu1 }
  0xfc   :  { %v1393_v41 = vadd.f32 %v2425_v12, %v714_v36  ;;  %v1456_v45 = vmax.f32 %v1392_v35, 0.0  ;;  %v2897_v2 = vpop.f32.mrb[18].mxu1 }
  0xfd   :  { %v1391_v43 = vadd.f32 %v1138_v13, %v712_v39  ;;  %v2362_v44 = vpop.f32.mrb[4].mxu0  ;;  %v1454_v49 = vmax.f32 %v1390_v38, 0.0  ;;  %v2899_v4 = vpop.f32.mrb[19].mxu1 }
  0xfe   :  { %v1457_v46 = vmax.f32 %v1393_v41, 0.0  ;;  %v646_v47 = vmul.f32 %v2362_v44, %v2852_v20  ;;  %v394_v48 = vpop.f32.mrb[5].mxu0 }
  0xff   :  { %v1455_v50 = vmax.f32 %v1391_v43, 0.0  ;;  %v644_v51 = vmul.f32 %v2852_v20, %v394_v48  ;;  %v2363_v52 = vpop.f32.mrb[6].mxu0 }
 0x100   :  { %v2084_v53 = vpack.c.bf16 %v1457_v46, %v1456_v45  ;;  %v717_v54 = vadd.f32 %v2861_v24, %v646_v47  ;;  %v647_v55 = vmul.f32 %v2363_v52, %v2852_v20  ;;  %v397_v56 = vpop.f32.mrb[7].mxu0 }
 0x101   :  { %v2079_v57 = vpack.c.bf16 %v1455_v50, %v1454_v49  ;;  %v715_v58 = vadd.f32 %v2861_v24, %v644_v51  ;;  %v645_v59 = vmul.f32 %v2852_v20, %v397_v56 }
 0x102   :  { %2236 = vst [vmem:[%s3253_s6 + $0x8] sm:$0xff] %v2084_v53   ;;  %v1396_v61 = vadd.f32 %v2428_v14, %v717_v54  ;;  %v718_v62 = vadd.f32 %v2861_v24, %v647_v55  ;;  %v2907_v28 = vpop.f32.mrb[20].mxu1 }
 0x103   :  { %2080 = vst [vmem:[%s3253_s6] sm:$0xff] %v2079_v57   ;;  %v1394_v0 = vadd.f32 %v1151_v15, %v715_v58  ;;  %v716_v1 = vadd.f32 %v2861_v24, %v645_v59  ;;  %v2914_v31 = vpop.f32.mrb[21].mxu1 }
 0x104   :  { %v1397_v3 = vadd.f32 %v2429_v16, %v718_v62  ;;  %v1460_v7 = vmax.f32 %v1396_v61, 0.0  ;;  %v2921_v35 = vpop.f32.mrb[22].mxu1 }
 0x105   :  { %v1395_v5 = vadd.f32 %v1154_v17, %v716_v1  ;;  %v2366_v6 = vpop.f32.mrb[8].mxu0  ;;  %v1458_v11 = vmax.f32 %v1394_v0, 0.0  ;;  %v2924_v38 = vpop.f32.mrb[23].mxu1 }
 0x106   :  { %v1461_v8 = vmax.f32 %v1397_v3, 0.0  ;;  %v650_v9 = vmul.f32 %v2366_v6, %v2852_v20  ;;  %v410_v10 = vpop.f32.mrb[9].mxu0 }
 0x107   :  { %v1459_v12 = vmax.f32 %v1395_v5, 0.0  ;;  %v648_v13 = vmul.f32 %v2852_v20, %v410_v10  ;;  %v2367_v14 = vpop.f32.mrb[10].mxu0 }
 0x108   :  { %v2094_v15 = vpack.c.bf16 %v1461_v8, %v1460_v7  ;;  %v721_v23 = vadd.f32 %v2861_v24, %v650_v9  ;;  %v651_v25 = vmul.f32 %v2367_v14, %v2852_v20  ;;  %v413_v16 = vpop.f32.mrb[11].mxu0 }
 0x109   :  { %v2089_v26 = vpack.c.bf16 %v1459_v12, %v1458_v11  ;;  %v719_v17 = vadd.f32 %v2861_v24, %v648_v13  ;;  %v649_v27 = vmul.f32 %v2852_v20, %v413_v16 }
 0x10a   :  { %2238 = vst [vmem:[%s3253_s6 + $0x18] sm:$0xff] %v2094_v15   ;;  %v1400_v29 = vadd.f32 %v2845_v18, %v721_v23  ;;  %v722_v30 = vadd.f32 %v2861_v24, %v651_v25  ;;  %v2933_v54 = vpop.f32.mrb[24].mxu1 }
 0x10b   :  { %2237 = vst [vmem:[%s3253_s6 + $0x10] sm:$0xff] %v2089_v26   ;;  %v1398_v32 = vadd.f32 %v2847_v19, %v719_v17  ;;  %v720_v33 = vadd.f32 %v2861_v24, %v649_v27  ;;  %v2940_v57 = vpop.f32.mrb[25].mxu1 }
 0x10c   :  { %v1401_v36 = vadd.f32 %v2854_v21, %v722_v30  ;;  %v1464_v41 = vmax.f32 %v1400_v29, 0.0  ;;  %v2947_v61 = vpop.f32.mrb[26].mxu1 }
 0x10d   :  { %v1399_v18 = vadd.f32 %v2856_v22, %v720_v33  ;;  %v2370_v39 = vpop.f32.mrb[12].mxu0  ;;  %v1462_v46 = vmax.f32 %v1398_v32, 0.0  ;;  %v2950_v0 = vpop.f32.mrb[27].mxu1 }
 0x10e   :  { %v1465_v43 = vmax.f32 %v1401_v36, 0.0  ;;  %v654_v44 = vmul.f32 %v2370_v39, %v2852_v20  ;;  %v426_v45 = vpop.f32.mrb[13].mxu0 }
 0x10f   :  { %v1463_v47 = vmax.f32 %v1399_v18, 0.0  ;;  %v652_v19 = vmul.f32 %v2852_v20, %v426_v45  ;;  %v2371_v48 = vpop.f32.mrb[14].mxu0 }
 0x110   :  { %v2104_v49 = vpack.c.bf16 %v1465_v43, %v1464_v41  ;;  %v725_v50 = vadd.f32 %v2861_v24, %v654_v44  ;;  %v655_v21 = vmul.f32 %v2371_v48, %v2852_v20  ;;  %v429_v51 = vpop.f32.mrb[15].mxu0 }
 0x111   :  { %v2099_v52 = vpack.c.bf16 %v1463_v47, %v1462_v46  ;;  %v723_v22 = vadd.f32 %v2861_v24, %v652_v19  ;;  %v653_v53 = vmul.f32 %v2852_v20, %v429_v51 }
 0x112   :  { %2240 = vst [vmem:[%s3253_s6 + $0x28] sm:$0xff] %v2104_v49   ;;  %v1404_v55 = vadd.f32 %v2869_v34, %v725_v50  ;;  %v726_v56 = vadd.f32 %v2861_v24, %v655_v21  ;;  %v2959_v23 = vpop.f32.mrb[28].mxu1 }
 0x113   :  { %2239 = vst [vmem:[%s3253_s6 + $0x20] sm:$0xff] %v2099_v52   ;;  %v1402_v58 = vadd.f32 %v2872_v37, %v723_v22  ;;  %v724_v59 = vadd.f32 %v2861_v24, %v653_v53  ;;  %v2966_v26 = vpop.f32.mrb[29].mxu1 }
 0x114   :  { %v1405_v62 = vadd.f32 %v2875_v40, %v726_v56  ;;  %v1468_v3 = vmax.f32 %v1404_v55, 0.0  ;;  %v2973_v29 = vpop.f32.mrb[30].mxu1 }
 0x115   :  { %v1403_v34 = vadd.f32 %v2877_v42, %v724_v59  ;;  %v2374_v1 = vpop.f32.mrb[16].mxu0  ;;  %v1466_v8 = vmax.f32 %v1402_v58, 0.0  ;;  %v2976_v32 = vpop.f32.mrb[31].mxu1 }
 0x116   :  { %v1469_v5 = vmax.f32 %v1405_v62, 0.0  ;;  %v658_v6 = vmul.f32 %v2374_v1, %v2852_v20  ;;  %v442_v7 = vpop.f32.mrb[17].mxu0 }
 0x117   :  { %v1467_v9 = vmax.f32 %v1403_v34, 0.0  ;;  %v656_v37 = vmul.f32 %v2852_v20, %v442_v7  ;;  %v2375_v10 = vpop.f32.mrb[18].mxu0 }
 0x118   :  { %v2114_v11 = vpack.c.bf16 %v1469_v5, %v1468_v3  ;;  %v729_v12 = vadd.f32 %v2861_v24, %v658_v6  ;;  %v659_v40 = vmul.f32 %v2375_v10, %v2852_v20  ;;  %v445_v13 = vpop.f32.mrb[19].mxu0 }
 0x119   :  { %v2109_v14 = vpack.c.bf16 %v1467_v9, %v1466_v8  ;;  %v727_v42 = vadd.f32 %v2861_v24, %v656_v37  ;;  %v657_v15 = vmul.f32 %v2852_v20, %v445_v13 }
 0x11a   :  { %2242 = vst [vmem:[%s3253_s6 + $0x38] sm:$0xff] %v2114_v11   ;;  %v1408_v25 = vadd.f32 %v2885_v60, %v729_v12  ;;  %v730_v16 = vadd.f32 %v2861_v24, %v659_v40  ;;  %v2985_v50 = vpop.f32.mrb[32].mxu1 }
 0x11b   :  { %2241 = vst [vmem:[%s3253_s6 + $0x30] sm:$0xff] %v2109_v14   ;;  %v1406_v17 = vadd.f32 %v2891_v63, %v727_v42  ;;  %v728_v27 = vadd.f32 %v2861_v24, %v657_v15  ;;  %v2992_v52 = vpop.f32.mrb[33].mxu1 }
 0x11c   :  { %v1409_v30 = vadd.f32 %v2897_v2, %v730_v16  ;;  %v1472_v36 = vmax.f32 %v1408_v25, 0.0  ;;  %v2999_v55 = vpop.f32.mrb[34].mxu1 }
 0x11d   :  { %v1407_v60 = vadd.f32 %v2899_v4, %v728_v27  ;;  %v2378_v33 = vpop.f32.mrb[20].mxu0  ;;  %v1470_v43 = vmax.f32 %v1406_v17, 0.0  ;;  %v3002_v58 = vpop.f32.mrb[35].mxu1 }
 0x11e   :  { %v1473_v18 = vmax.f32 %v1409_v30, 0.0  ;;  %v662_v39 = vmul.f32 %v2378_v33, %v2852_v20  ;;  %v458_v41 = vpop.f32.mrb[21].mxu0 }
 0x11f   :  { %v1471_v44 = vmax.f32 %v1407_v60, 0.0  ;;  %v660_v63 = vmul.f32 %v2852_v20, %v458_v41  ;;  %v2379_v45 = vpop.f32.mrb[22].mxu0 }
 0x120   :  { %v2124_v46 = vpack.c.bf16 %v1473_v18, %v1472_v36  ;;  %v733_v47 = vadd.f32 %v2861_v24, %v662_v39  ;;  %v663_v2 = vmul.f32 %v2379_v45, %v2852_v20  ;;  %v461_v19 = vpop.f32.mrb[23].mxu0 }
 0x121   :  { %v2119_v48 = vpack.c.bf16 %v1471_v44, %v1470_v43  ;;  %v731_v4 = vadd.f32 %v2861_v24, %v660_v63  ;;  %v661_v49 = vmul.f32 %v2852_v20, %v461_v19 }
 0x122   :  { %2244 = vst [vmem:[%s3253_s6 + $0x48] sm:$0xff] %v2124_v46   ;;  %v1412_v21 = vadd.f32 %v2907_v28, %v733_v47  ;;  %v734_v51 = vadd.f32 %v2861_v24, %v663_v2  ;;  %v3011_v12 = vpop.f32.mrb[36].mxu1 }
 0x123   :  { %2243 = vst [vmem:[%s3253_s6 + $0x40] sm:$0xff] %v2119_v48   ;;  %v1410_v22 = vadd.f32 %v2914_v31, %v731_v4  ;;  %v732_v53 = vadd.f32 %v2861_v24, %v661_v49  ;;  %v3018_v14 = vpop.f32.mrb[37].mxu1 }
 0x124   :  { %v1413_v56 = vadd.f32 %v2921_v35, %v734_v51  ;;  %v1476_v62 = vmax.f32 %v1412_v21, 0.0  ;;  %v3025_v25 = vpop.f32.mrb[38].mxu1 }
 0x125   :  { %v1411_v28 = vadd.f32 %v2924_v38, %v732_v53  ;;  %v2382_v59 = vpop.f32.mrb[24].mxu0  ;;  %v1474_v5 = vmax.f32 %v1410_v22, 0.0  ;;  %v3028_v17 = vpop.f32.mrb[39].mxu1 }
 0x126   :  { %v1477_v34 = vmax.f32 %v1413_v56, 0.0  ;;  %v666_v1 = vmul.f32 %v2382_v59, %v2852_v20  ;;  %v474_v3 = vpop.f32.mrb[25].mxu0 }
 0x127   :  { %v1475_v6 = vmax.f32 %v1411_v28, 0.0  ;;  %v664_v31 = vmul.f32 %v2852_v20, %v474_v3  ;;  %v2383_v7 = vpop.f32.mrb[26].mxu0 }
 0x128   :  { %v2134_v8 = vpack.c.bf16 %v1477_v34, %v1476_v62  ;;  %v737_v9 = vadd.f32 %v2861_v24, %v666_v1  ;;  %v667_v35 = vmul.f32 %v2383_v7, %v2852_v20  ;;  %v477_v37 = vpop.f32.mrb[27].mxu0 }
 0x129   :  { %v2129_v10 = vpack.c.bf16 %v1475_v6, %v1474_v5  ;;  %v735_v38 = vadd.f32 %v2861_v24, %v664_v31  ;;  %v665_v11 = vmul.f32 %v2852_v20, %v477_v37 }
 0x12a   :  { %2246 = vst [vmem:[%s3253_s6 + $0x58] sm:$0xff] %v2134_v8   ;;  %v1416_v40 = vadd.f32 %v2933_v54, %v737_v9  ;;  %v738_v13 = vadd.f32 %v2861_v24, %v667_v35  ;;  %v3037_v47 = vpop.f32.mrb[40].mxu1 }
 0x12b   :  { %2245 = vst [vmem:[%s3253_s6 + $0x50] sm:$0xff] %v2129_v10   ;;  %v1414_v42 = vadd.f32 %v2940_v57, %v735_v38  ;;  %v736_v15 = vadd.f32 %v2861_v24, %v665_v11  ;;  %v3044_v48 = vpop.f32.mrb[41].mxu1 }
 0x12c   :  { %v1417_v16 = vadd.f32 %v2947_v61, %v738_v13  ;;  %v1480_v30 = vmax.f32 %v1416_v40, 0.0  ;;  %v3051_v21 = vpop.f32.mrb[42].mxu1 }
 0x12d   :  { %v1415_v54 = vadd.f32 %v2950_v0, %v736_v15  ;;  %v2386_v27 = vpop.f32.mrb[28].mxu0  ;;  %v1478_v18 = vmax.f32 %v1414_v42, 0.0  ;;  %v3054_v22 = vpop.f32.mrb[43].mxu1 }
 0x12e   :  { %v1481_v60 = vmax.f32 %v1417_v16, 0.0  ;;  %v670_v33 = vmul.f32 %v2386_v27, %v2852_v20  ;;  %v490_v36 = vpop.f32.mrb[29].mxu0 }
 0x12f   :  { %v1479_v39 = vmax.f32 %v1415_v54, 0.0  ;;  %v668_v57 = vmul.f32 %v2852_v20, %v490_v36  ;;  %v2387_v41 = vpop.f32.mrb[30].mxu0 }
 0x130   :  { %v2144_v43 = vpack.c.bf16 %v1481_v60, %v1480_v30  ;;  %v741_v44 = vadd.f32 %v2861_v24, %v670_v33  ;;  %v671_v61 = vmul.f32 %v2387_v41, %v2852_v20  ;;  %v493_v63 = vpop.f32.mrb[31].mxu0 }
 0x131   :  { %v2139_v45 = vpack.c.bf16 %v1479_v39, %v1478_v18  ;;  %v739_v0 = vadd.f32 %v2861_v24, %v668_v57  ;;  %v669_v46 = vmul.f32 %v2852_v20, %v493_v63 }
 0x132   :  { %2248 = vst [vmem:[%s3253_s6 + $0x68] sm:$0xff] %v2144_v43   ;;  %v1420_v2 = vadd.f32 %v2959_v23, %v741_v44  ;;  %v742_v19 = vadd.f32 %v2861_v24, %v671_v61  ;;  %v3063_v9 = vpop.f32.mrb[44].mxu1 }
 0x133   :  { %2247 = vst [vmem:[%s3253_s6 + $0x60] sm:$0xff] %v2139_v45   ;;  %v1418_v4 = vadd.f32 %v2966_v26, %v739_v0  ;;  %v740_v49 = vadd.f32 %v2861_v24, %v669_v46  ;;  %v3070_v10 = vpop.f32.mrb[45].mxu1 }
 0x134   :  { %v1421_v51 = vadd.f32 %v2973_v29, %v742_v19  ;;  %v1484_v56 = vmax.f32 %v1420_v2, 0.0  ;;  %v3077_v40 = vpop.f32.mrb[46].mxu1 }
 0x135   :  { %v1419_v23 = vadd.f32 %v2976_v32, %v740_v49  ;;  %v2390_v53 = vpop.f32.mrb[32].mxu0  ;;  %v1482_v34 = vmax.f32 %v1418_v4, 0.0  ;;  %v3080_v42 = vpop.f32.mrb[47].mxu1 }
 0x136   :  { %v1485_v28 = vmax.f32 %v1421_v51, 0.0  ;;  %v674_v59 = vmul.f32 %v2390_v53, %v2852_v20  ;;  %v506_v62 = vpop.f32.mrb[33].mxu0 }
 0x137   :  { %v1483_v1 = vmax.f32 %v1419_v23, 0.0  ;;  %v672_v26 = vmul.f32 %v2852_v20, %v506_v62  ;;  %v2391_v3 = vpop.f32.mrb[34].mxu0 }
 0x138   :  { %v2154_v5 = vpack.c.bf16 %v1485_v28, %v1484_v56  ;;  %v745_v6 = vadd.f32 %v2861_v24, %v674_v59  ;;  %v675_v29 = vmul.f32 %v2391_v3, %v2852_v20  ;;  %v509_v31 = vpop.f32.mrb[35].mxu0 }
 0x139   :  { %v2149_v7 = vpack.c.bf16 %v1483_v1, %v1482_v34  ;;  %v743_v32 = vadd.f32 %v2861_v24, %v672_v26  ;;  %v673_v8 = vmul.f32 %v2852_v20, %v509_v31 }
 0x13a   :  { %2250 = vst [vmem:[%s3253_s6 + $0x78] sm:$0xff] %v2154_v5   ;;  %v1424_v35 = vadd.f32 %v2985_v50, %v745_v6  ;;  %v746_v37 = vadd.f32 %v2861_v24, %v675_v29  ;;  %v3089_v44 = vpop.f32.mrb[48].mxu1 }
 0x13b   :  { %2249 = vst [vmem:[%s3253_s6 + $0x70] sm:$0xff] %v2149_v7   ;;  %v1422_v38 = vadd.f32 %v2992_v52, %v743_v32  ;;  %v744_v11 = vadd.f32 %v2861_v24, %v673_v8  ;;  %v3096_v45 = vpop.f32.mrb[49].mxu1 }
 0x13c   :  { %v1425_v13 = vadd.f32 %v2999_v55, %v746_v37  ;;  %v1488_v16 = vmax.f32 %v1424_v35, 0.0  ;;  %v3103_v2 = vpop.f32.mrb[50].mxu1 }
 0x13d   :  { %v1423_v50 = vadd.f32 %v3002_v58, %v744_v11  ;;  %v2394_v15 = vpop.f32.mrb[36].mxu0  ;;  %v1486_v60 = vmax.f32 %v1422_v38, 0.0  ;;  %v3106_v4 = vpop.f32.mrb[51].mxu1 }
 0x13e   :  { %v1489_v54 = vmax.f32 %v1425_v13, 0.0  ;;  %v678_v27 = vmul.f32 %v2394_v15, %v2852_v20  ;;  %v522_v30 = vpop.f32.mrb[37].mxu0 }
 0x13f   :  { %v1487_v33 = vmax.f32 %v1423_v50, 0.0  ;;  %v676_v52 = vmul.f32 %v2852_v20, %v522_v30  ;;  %v2395_v36 = vpop.f32.mrb[38].mxu0 }
 0x140   :  { %v2164_v18 = vpack.c.bf16 %v1489_v54, %v1488_v16  ;;  %v749_v39 = vadd.f32 %v2861_v24, %v678_v27  ;;  %v679_v55 = vmul.f32 %v2395_v36, %v2852_v20  ;;  %v525_v57 = vpop.f32.mrb[39].mxu0 }
 0x141   :  { %v2159_v41 = vpack.c.bf16 %v1487_v33, %v1486_v60  ;;  %v747_v58 = vadd.f32 %v2861_v24, %v676_v52  ;;  %v677_v43 = vmul.f32 %v2852_v20, %v525_v57 }
 0x142   :  { %2252 = vst [vmem:[%s3253_s6 + $0x88] sm:$0xff] %v2164_v18   ;;  %v1428_v61 = vadd.f32 %v3011_v12, %v749_v39  ;;  %v750_v63 = vadd.f32 %v2861_v24, %v679_v55  ;;  %v3115_v6 = vpop.f32.mrb[52].mxu1 }
 0x143   :  { %2251 = vst [vmem:[%s3253_s6 + $0x80] sm:$0xff] %v2159_v41   ;;  %v1426_v0 = vadd.f32 %v3018_v14, %v747_v58  ;;  %v748_v46 = vadd.f32 %v2861_v24, %v677_v43  ;;  %v3122_v7 = vpop.f32.mrb[53].mxu1 }
 0x144   :  { %v1429_v19 = vadd.f32 %v3025_v25, %v750_v63  ;;  %v1492_v51 = vmax.f32 %v1428_v61, 0.0  ;;  %v3129_v35 = vpop.f32.mrb[54].mxu1 }
 0x145   :  { %v1427_v12 = vadd.f32 %v3028_v17, %v748_v46  ;;  %v2398_v49 = vpop.f32.mrb[40].mxu0  ;;  %v1490_v28 = vmax.f32 %v1426_v0, 0.0  ;;  %v3132_v38 = vpop.f32.mrb[55].mxu1 }
 0x146   :  { %v1493_v23 = vmax.f32 %v1429_v19, 0.0  ;;  %v682_v53 = vmul.f32 %v2398_v49, %v2852_v20  ;;  %v538_v56 = vpop.f32.mrb[41].mxu0 }
 0x147   :  { %v1491_v59 = vmax.f32 %v1427_v12, 0.0  ;;  %v680_v14 = vmul.f32 %v2852_v20, %v538_v56  ;;  %v2399_v62 = vpop.f32.mrb[42].mxu0 }
 0x148   :  { %v2174_v34 = vpack.c.bf16 %v1493_v23, %v1492_v51  ;;  %v753_v1 = vadd.f32 %v2861_v24, %v682_v53  ;;  %v683_v25 = vmul.f32 %v2399_v62, %v2852_v20  ;;  %v541_v26 = vpop.f32.mrb[43].mxu0 }
 0x149   :  { %v2169_v3 = vpack.c.bf16 %v1491_v59, %v1490_v28  ;;  %v751_v17 = vadd.f32 %v2861_v24, %v680_v14  ;;  %v681_v5 = vmul.f32 %v2852_v20, %v541_v26 }
 0x14a   :  { %2254 = vst [vmem:[%s3253_s6 + $0x98] sm:$0xff] %v2174_v34   ;;  %v1432_v29 = vadd.f32 %v3037_v47, %v753_v1  ;;  %v754_v31 = vadd.f32 %v2861_v24, %v683_v25  ;;  %v3141_v39 = vpop.f32.mrb[56].mxu1 }
 0x14b   :  { %2253 = vst [vmem:[%s3253_s6 + $0x90] sm:$0xff] %v2169_v3   ;;  %v1430_v32 = vadd.f32 %v3044_v48, %v751_v17  ;;  %v752_v8 = vadd.f32 %v2861_v24, %v681_v5  ;;  %v3148_v41 = vpop.f32.mrb[57].mxu1 }
 0x14c   :  { %v1433_v37 = vadd.f32 %v3051_v21, %v754_v31  ;;  %v1496_v13 = vmax.f32 %v1432_v29, 0.0  ;;  %v3155_v61 = vpop.f32.mrb[58].mxu1 }
 0x14d   :  { %v1431_v47 = vadd.f32 %v3054_v22, %v752_v8  ;;  %v2402_v11 = vpop.f32.mrb[44].mxu0  ;;  %v1494_v54 = vmax.f32 %v1430_v32, 0.0  ;;  %v3158_v0 = vpop.f32.mrb[59].mxu1 }
 0x14e   :  { %v1497_v50 = vmax.f32 %v1433_v37, 0.0  ;;  %v686_v15 = vmul.f32 %v2402_v11, %v2852_v20  ;;  %v554_v16 = vpop.f32.mrb[45].mxu0 }
 0x14f   :  { %v1495_v27 = vmax.f32 %v1431_v47, 0.0  ;;  %v684_v48 = vmul.f32 %v2852_v20, %v554_v16  ;;  %v2403_v30 = vpop.f32.mrb[46].mxu0 }
 0x150   :  { %v2184_v60 = vpack.c.bf16 %v1497_v50, %v1496_v13  ;;  %v757_v33 = vadd.f32 %v2861_v24, %v686_v15  ;;  %v687_v21 = vmul.f32 %v2403_v30, %v2852_v20  ;;  %v557_v52 = vpop.f32.mrb[47].mxu0 }
 0x151   :  { %v2179_v36 = vpack.c.bf16 %v1495_v27, %v1494_v54  ;;  %v755_v22 = vadd.f32 %v2861_v24, %v684_v48  ;;  %v685_v18 = vmul.f32 %v2852_v20, %v557_v52 }
 0x152   :  { %2256 = vst [vmem:[%s3253_s6 + $0xa8] sm:$0xff] %v2184_v60   ;;  %v1436_v55 = vadd.f32 %v3063_v9, %v757_v33  ;;  %v758_v57 = vadd.f32 %v2861_v24, %v687_v21  ;;  %v3167_v1 = vpop.f32.mrb[60].mxu1 }
 0x153   :  { %2255 = vst [vmem:[%s3253_s6 + $0xa0] sm:$0xff] %v2179_v36   ;;  %v1434_v58 = vadd.f32 %v3070_v10, %v755_v22  ;;  %v756_v43 = vadd.f32 %v2861_v24, %v685_v18  ;;  %v3174_v3 = vpop.f32.mrb[61].mxu1 }
 0x154   :  { %v1437_v63 = vadd.f32 %v3077_v40, %v758_v57  ;;  %v1500_v19 = vmax.f32 %v1436_v55, 0.0  ;;  %v3181_v29 = vpop.f32.mrb[62].mxu1 }
 0x155   :  { %v1435_v9 = vadd.f32 %v3080_v42, %v756_v43  ;;  %v2406_v46 = vpop.f32.mrb[48].mxu0  ;;  %v1498_v23 = vmax.f32 %v1434_v58, 0.0  ;;  %v3184_v32 = vpop.f32.mrb[63].mxu1 }
 0x156   :  { %v1501_v12 = vmax.f32 %v1437_v63, 0.0  ;;  %v690_v49 = vmul.f32 %v2406_v46, %v2852_v20  ;;  %v570_v51 = vpop.f32.mrb[49].mxu0 }
 0x157   :  { %v1499_v53 = vmax.f32 %v1435_v9, 0.0  ;;  %v688_v10 = vmul.f32 %v2852_v20, %v570_v51  ;;  %v2407_v56 = vpop.f32.mrb[50].mxu0 }
 0x158   :  { %v2194_v28 = vpack.c.bf16 %v1501_v12, %v1500_v19  ;;  %v761_v59 = vadd.f32 %v2861_v24, %v690_v49  ;;  %v691_v40 = vmul.f32 %v2407_v56, %v2852_v20  ;;  %v573_v14 = vpop.f32.mrb[51].mxu0 }
 0x159   :  { %v2189_v62 = vpack.c.bf16 %v1499_v53, %v1498_v23  ;;  %v759_v42 = vadd.f32 %v2861_v24, %v688_v10  ;;  %v689_v34 = vmul.f32 %v2852_v20, %v573_v14 }
 0x15a   :  { %2258 = vst [vmem:[%s3253_s6 + $0xb8] sm:$0xff] %v2194_v28   ;;  %v1440_v25 = vadd.f32 %v3089_v44, %v761_v59  ;;  %v762_v26 = vadd.f32 %v2861_v24, %v691_v40 }
 0x15b   :  { %2257 = vst [vmem:[%s3253_s6 + $0xb0] sm:$0xff] %v2189_v62   ;;  %v1438_v17 = vadd.f32 %v3096_v45, %v759_v42  ;;  %v760_v5 = vadd.f32 %v2861_v24, %v689_v34 }
 0x15c   :  { %v1441_v31 = vadd.f32 %v3103_v2, %v762_v26  ;;  %v1504_v37 = vmax.f32 %v1440_v25, 0.0 }
 0x15d   :  { %v1439_v44 = vadd.f32 %v3106_v4, %v760_v5  ;;  %v2410_v8 = vpop.f32.mrb[52].mxu0  ;;  %v1502_v50 = vmax.f32 %v1438_v17, 0.0 }
 0x15e   :  { %v1505_v47 = vmax.f32 %v1441_v31, 0.0  ;;  %v694_v11 = vmul.f32 %v2410_v8, %v2852_v20  ;;  %v586_v13 = vpop.f32.mrb[53].mxu0 }
 0x15f   :  { %v1503_v15 = vmax.f32 %v1439_v44, 0.0  ;;  %v692_v45 = vmul.f32 %v2852_v20, %v586_v13  ;;  %v2411_v16 = vpop.f32.mrb[54].mxu0 }
 0x160   :  { %v2204_v54 = vpack.c.bf16 %v1505_v47, %v1504_v37  ;;  %v765_v27 = vadd.f32 %v2861_v24, %v694_v11  ;;  %v695_v2 = vmul.f32 %v2411_v16, %v2852_v20  ;;  %v589_v48 = vpop.f32.mrb[55].mxu0 }
 0x161   :  { %v2199_v30 = vpack.c.bf16 %v1503_v15, %v1502_v50  ;;  %v763_v4 = vadd.f32 %v2861_v24, %v692_v45  ;;  %v693_v60 = vmul.f32 %v2852_v20, %v589_v48 }
 0x162   :  { %2260 = vst [vmem:[%s3253_s6 + $0xc8] sm:$0xff] %v2204_v54   ;;  %v1444_v33 = vadd.f32 %v3115_v6, %v765_v27  ;;  %v766_v21 = vadd.f32 %v2861_v24, %v695_v2 }
 0x163   :  { %2259 = vst [vmem:[%s3253_s6 + $0xc0] sm:$0xff] %v2199_v30   ;;  %v1442_v52 = vadd.f32 %v3122_v7, %v763_v4  ;;  %v764_v36 = vadd.f32 %v2861_v24, %v693_v60 }
 0x164   :  { %v1445_v22 = vadd.f32 %v3129_v35, %v766_v21  ;;  %v1508_v57 = vmax.f32 %v1444_v33, 0.0 }
 0x165   :  { %v1443_v18 = vadd.f32 %v3132_v38, %v764_v36  ;;  %v2414_v55 = vpop.f32.mrb[56].mxu0  ;;  %v1506_v63 = vmax.f32 %v1442_v52, 0.0 }
 0x166   :  { %v1509_v58 = vmax.f32 %v1445_v22, 0.0  ;;  %v698_v43 = vmul.f32 %v2414_v55, %v2852_v20  ;;  %v602_v6 = vpop.f32.mrb[57].mxu0 }
 0x167   :  { %v1507_v9 = vmax.f32 %v1443_v18, 0.0  ;;  %v696_v46 = vmul.f32 %v2852_v20, %v602_v6  ;;  %v2415_v19 = vpop.f32.mrb[58].mxu0 }
 0x168   :  { %v2214_v12 = vpack.c.bf16 %v1509_v58, %v1508_v57  ;;  %v769_v7 = vadd.f32 %v2861_v24, %v698_v43  ;;  %v699_v49 = vmul.f32 %v2415_v19, %v2852_v20  ;;  %v605_v51 = vpop.f32.mrb[59].mxu0 }
 0x169   :  { %v2209_v35 = vpack.c.bf16 %v1507_v9, %v1506_v63  ;;  %v767_v38 = vadd.f32 %v2861_v24, %v696_v46  ;;  %v697_v23 = vmul.f32 %v2852_v20, %v605_v51 }
 0x16a   :  { %2262 = vst [vmem:[%s3253_s6 + $0xd8] sm:$0xff] %v2214_v12   ;;  %v1448_v53 = vadd.f32 %v3141_v39, %v769_v7  ;;  %v770_v10 = vadd.f32 %v2861_v24, %v699_v49 }
 0x16b   :  { %2261 = vst [vmem:[%s3253_s6 + $0xd0] sm:$0xff] %v2209_v35   ;;  %v1446_v56 = vadd.f32 %v3148_v41, %v767_v38  ;;  %v768_v28 = vadd.f32 %v2861_v24, %v697_v23 }
 0x16c   :  { %v1449_v59 = vadd.f32 %v3155_v61, %v770_v10  ;;  %v1512_v62 = vmax.f32 %v1448_v53, 0.0 }
 0x16d   :  { %v1447_v40 = vadd.f32 %v3158_v0, %v768_v28  ;;  %v2418_v14 = vpop.f32.mrb[60].mxu0  ;;  %v1510_v25 = vmax.f32 %v1446_v56, 0.0 }
 0x16e   :  { %v1513_v42 = vmax.f32 %v1449_v59, 0.0  ;;  %v702_v34 = vmul.f32 %v2418_v14, %v2852_v20  ;;  %v618_v39 = vpop.f32.mrb[61].mxu0 }
 0x16f   :  { %v1511_v26 = vmax.f32 %v1447_v40, 0.0  ;;  %v700_v17 = vmul.f32 %v2852_v20, %v618_v39  ;;  %v2419_v5 = vpop.f32.mrb[62].mxu0 }
 0x170   :  { %v2224_v31 = vpack.c.bf16 %v1513_v42, %v1512_v62  ;;  %v773_v41 = vadd.f32 %v2861_v24, %v702_v34  ;;  %v703_v44 = vmul.f32 %v2419_v5, %v2852_v20  ;;  %v621_v8 = vpop.f32.mrb[63].mxu0 }
 0x171   :  { %v2219_v61 = vpack.c.bf16 %v1511_v26, %v1510_v25  ;;  %v771_v0 = vadd.f32 %v2861_v24, %v700_v17  ;;  %v701_v37 = vmul.f32 %v2852_v20, %v621_v8 }
 0x172   :  { %2264 = vst [vmem:[%s3253_s6 + $0xe8] sm:$0xff] %v2224_v31   ;;  %v1452_v47 = vadd.f32 %v3167_v1, %v773_v41  ;;  %v774_v11 = vadd.f32 %v2861_v24, %v703_v44 }
 0x173   :  { %2263 = vst [vmem:[%s3253_s6 + $0xe0] sm:$0xff] %v2219_v61   ;;  %v1450_v13 = vadd.f32 %v3174_v3, %v771_v0  ;;  %v772_v50 = vadd.f32 %v2861_v24, %v701_v37 }
 0x174   :  { %v1453_v15 = vadd.f32 %v3181_v29, %v774_v11  ;;  %v1516_v45 = vmax.f32 %v1452_v47, 0.0 }
 0x175   :  { %v1451_v20 = vadd.f32 %v3184_v32, %v772_v50  ;;  %v1514_v54 = vmax.f32 %v1450_v13, 0.0 }
 0x176   :  { %v1517_v16 = vmax.f32 %v1453_v15, 0.0 }
 0x177   :  { %v1515_v27 = vmax.f32 %v1451_v20, 0.0 }
 0x178   :  { %v2234_v2 = vpack.c.bf16 %v1517_v16, %v1516_v45 }
 0x179   :  { %v2229_v1 = vpack.c.bf16 %v1515_v27, %v1514_v54 }
 0x17a   :  { %2266 = vst [vmem:[%s3253_s6 + $0xf8] sm:$0xff] %v2234_v2  }
 0x17b   :  { %2265 = vst [vmem:[%s3253_s6 + $0xf0] sm:$0xff] %v2229_v1  }

// kernel: residual_block_forward.4
= control target key start
LH: loop header
LB: loop body
LE: loop exit
PB: predicated region body
PF: predicated region fallthrough
CT: control target
= control target key end

     0   :  { %s8681_s15 = smov 0   ;;  %s8683_s16 = smov 0   ;;  %s10378_s0 = inlined_call_operand.vmem [shape: bf16[1072,128], index: 0, kind: input, shape index: {}]   ;;  %s10379_s1 = inlined_call_operand.vmem [shape: bf16[9,128,128], index: 1, kind: input, shape index: {}]   ;;  %s10380_s2 = inlined_call_operand.vmem [shape: f32[1,128], index: 2, kind: input, shape index: {}]   ;;  %s10381_s3 = inlined_call_operand.vmem [shape: f32[1,128], index: 3, kind: input, shape index: {}]   ;;  %s10382_s4 = inlined_call_operand.vmem [shape: bf16[1024,128], index: 4, kind: output, shape index: {}]  }
   0x1   :  { %s8685_s17 = smov 0  }
   0x2 LB: > { %s26_s18 = sadd.s32 1, %s8650_s16  ;;  %p6337_p0 = scmp.ge.s32.totalorder %s8654_s17, 1  ;;  %s8654_s17 = sphi %s8685_s17, %s14_s17   ;;  %s8650_s16 = sphi %s8683_s16, %s10455_s16   ;;  %s8646_s15 = sphi %s8681_s15, %s10454_s15  }
   0x3   : > { %p28_p1 = scmp.ge.s32.totalorder %s26_s18, 2  ;;  %p142_p2 = scmp.lt.s32.totalorder %s8654_s17, 3 }
   0x5   : > { %s10457_s18 = smov (%p28_p1, %s26_s18), 0  ;;  %p143_p3 = pnand %p6337_p0, %p142_p2 }
   0x7   : > { %146 = sbr.rel (%p143_p3) target bundleno = 868 (0x364), region = 32 }
   0xe   : > { %s6338_s19 = sshll.u32 %s8646_s15, 6  ;;  %s176_s20 = sand.u32 1, %s8646_s15 }
   0xf   : > { %p164_p4 = scmp.lt.s32.totalorder %s6338_s19, 127  ;;  %s6340_s21 = sshll.u32 %s8646_s15, 9 }
  0x10   : > { %s178_s22 = sshra.s32 %s6340_s21, 3  ;;  %s6617_s23 = smul.u32 280, %s176_s20 }
  0x11   : > { %s10459_s19 = smov (!%p164_p4, %s6338_s19), 127  ;;  %s6341_s24 = sshll.u32 %s178_s22, 2 }
  0x12   : > { %s6339_s25 = sshll.u32 %s10459_s19, 2  ;;  %s8709_s28 = scalar_lea.vmem %s10378_s0, %s6341_s24 }
  0x13   : > { %s8714_s5 = scalar_lea.vmem %s10382_s4, %s6339_s25  ;;  %v218_v0 = vld [vmem:[%s8709_s28] sm:$0xff]  ;;  %v220_v1 = vld [vmem:[%s8709_s28 + $0x8] sm:$0xff]  ;;  %v222_v2 = vld [vmem:[%s8709_s28 + $0x10] sm:$0xff]  ;;  %s8719_s6 = scalar_lea.vmem [#allocation2], %s6617_s23 }
  0x14   : > { %219 = vst [vmem:[%s8719_s6] sm:$0xff] %v218_v0  ;;  %221 = vst [vmem:[%s8719_s6 + $0x8] sm:$0xff] %v220_v1  ;;  %v224_v3 = vld [vmem:[%s8709_s28 + $0x18] sm:$0xff]  ;;  %v226_v4 = vld [vmem:[%s8709_s28 + $0x20] sm:$0xff]  ;;  %s185_s7 = scalar_lea.sflag [#allocation3], %s176_s20 }
  0x15   : > { %223 = vst [vmem:[%s8719_s6 + $0x10] sm:$0xff] %v222_v2  ;;  %v228_v5 = vld [vmem:[%s8709_s28 + $0x28] sm:$0xff]  ;;  %225 = vst [vmem:[%s8719_s6 + $0x18] sm:$0xff] %v224_v3  ;;  %v230_v6 = vld [vmem:[%s8709_s28 + $0x30] sm:$0xff] }
  0x16   : > { %227 = vst [vmem:[%s8719_s6 + $0x20] sm:$0xff] %v226_v4  ;;  %229 = vst [vmem:[%s8719_s6 + $0x28] sm:$0xff] %v228_v5  ;;  %v232_v7 = vld [vmem:[%s8709_s28 + $0x38] sm:$0xff]  ;;  %v234_v8 = vld [vmem:[%s8709_s28 + $0x40] sm:$0xff] }
  0x17   : > { %231 = vst [vmem:[%s8719_s6 + $0x30] sm:$0xff] %v230_v6  ;;  %233 = vst [vmem:[%s8719_s6 + $0x38] sm:$0xff] %v232_v7  ;;  %v236_v9 = vld [vmem:[%s8709_s28 + $0x48] sm:$0xff]  ;;  %v238_v10 = vld [vmem:[%s8709_s28 + $0x50] sm:$0xff] }
  0x18   : > { %235 = vst [vmem:[%s8719_s6 + $0x40] sm:$0xff] %v234_v8  ;;  %v240_v11 = vld [vmem:[%s8709_s28 + $0x58] sm:$0xff]  ;;  %237 = vst [vmem:[%s8719_s6 + $0x48] sm:$0xff] %v236_v9  ;;  %v242_v12 = vld [vmem:[%s8709_s28 + $0x60] sm:$0xff] }
  0x19   : > { %239 = vst [vmem:[%s8719_s6 + $0x50] sm:$0xff] %v238_v10  ;;  %241 = vst [vmem:[%s8719_s6 + $0x58] sm:$0xff] %v240_v11  ;;  %v244_v13 = vld [vmem:[%s8709_s28 + $0x68] sm:$0xff]  ;;  %v246_v14 = vld [vmem:[%s8709_s28 + $0x70] sm:$0xff] }
  0x1a   : > { %243 = vst [vmem:[%s8719_s6 + $0x60] sm:$0xff] %v242_v12  ;;  %245 = vst [vmem:[%s8719_s6 + $0x68] sm:$0xff] %v244_v13  ;;  %v248_v15 = vld [vmem:[%s8709_s28 + $0x78] sm:$0xff]  ;;  %v250_v16 = vld [vmem:[%s8709_s28 + $0x80] sm:$0xff] }
  0x1b   : > { %247 = vst [vmem:[%s8719_s6 + $0x70] sm:$0xff] %v246_v14  ;;  %v252_v17 = vld [vmem:[%s8709_s28 + $0x88] sm:$0xff]  ;;  %249 = vst [vmem:[%s8719_s6 + $0x78] sm:$0xff] %v248_v15  ;;  %v254_v18 = vld [vmem:[%s8709_s28 + $0x90] sm:$0xff] }
  0x1c   : > { %251 = vst [vmem:[%s8719_s6 + $0x80] sm:$0xff] %v250_v16  ;;  %253 = vst [vmem:[%s8719_s6 + $0x88] sm:$0xff] %v252_v17  ;;  %v256_v19 = vld [vmem:[%s8709_s28 + $0x98] sm:$0xff]  ;;  %v258_v20 = vld [vmem:[%s8709_s28 + $0xa0] sm:$0xff] }
  0x1d   : > { %255 = vst [vmem:[%s8719_s6 + $0x90] sm:$0xff] %v254_v18  ;;  %257 = vst [vmem:[%s8719_s6 + $0x98] sm:$0xff] %v256_v19  ;;  %v260_v21 = vld [vmem:[%s8709_s28 + $0xa8] sm:$0xff]  ;;  %v262_v22 = vld [vmem:[%s8709_s28 + $0xb0] sm:$0xff] }
  0x1e   : > { %259 = vst [vmem:[%s8719_s6 + $0xa0] sm:$0xff] %v258_v20  ;;  %v264_v23 = vld [vmem:[%s8709_s28 + $0xb8] sm:$0xff]  ;;  %261 = vst [vmem:[%s8719_s6 + $0xa8] sm:$0xff] %v260_v21  ;;  %v266_v24 = vld [vmem:[%s8709_s28 + $0xc0] sm:$0xff] }
  0x1f   : > { %263 = vst [vmem:[%s8719_s6 + $0xb0] sm:$0xff] %v262_v22  ;;  %265 = vst [vmem:[%s8719_s6 + $0xb8] sm:$0xff] %v264_v23  ;;  %v268_v25 = vld [vmem:[%s8709_s28 + $0xc8] sm:$0xff]  ;;  %v270_v26 = vld [vmem:[%s8709_s28 + $0xd0] sm:$0xff] }
  0x20   : > { %267 = vst [vmem:[%s8719_s6 + $0xc0] sm:$0xff] %v266_v24  ;;  %269 = vst [vmem:[%s8719_s6 + $0xc8] sm:$0xff] %v268_v25  ;;  %v272_v27 = vld [vmem:[%s8709_s28 + $0xd8] sm:$0xff]  ;;  %v274_v28 = vld [vmem:[%s8709_s28 + $0xe0] sm:$0xff] }
  0x21   : > { %271 = vst [vmem:[%s8719_s6 + $0xd0] sm:$0xff] %v270_v26  ;;  %v276_v29 = vld [vmem:[%s8709_s28 + $0xe8] sm:$0xff]  ;;  %273 = vst [vmem:[%s8719_s6 + $0xd8] sm:$0xff] %v272_v27  ;;  %v278_v30 = vld [vmem:[%s8709_s28 + $0xf0] sm:$0xff] }
  0x22   : > { %275 = vst [vmem:[%s8719_s6 + $0xe0] sm:$0xff] %v274_v28  ;;  %277 = vst [vmem:[%s8719_s6 + $0xe8] sm:$0xff] %v276_v29  ;;  %v280_v31 = vld [vmem:[%s8709_s28 + $0xf8] sm:$0xff]  ;;  %v282_v32 = vld [vmem:[%s8709_s28 + $0x100] sm:$0xff] }
  0x23   : > { %279 = vst [vmem:[%s8719_s6 + $0xf0] sm:$0xff] %v278_v30  ;;  %281 = vst [vmem:[%s8719_s6 + $0xf8] sm:$0xff] %v280_v31  ;;  %v284_v33 = vld [vmem:[%s8709_s28 + $0x108] sm:$0xff]  ;;  %v286_v34 = vld [vmem:[%s8709_s28 + $0x110] sm:$0xff] }
  0x24   : > { %283 = vst [vmem:[%s8719_s6 + $0x100] sm:$0xff] %v282_v32  ;;  %285 = vst [vmem:[%s8719_s6 + $0x108] sm:$0xff] %v284_v33 }
  0x25   : > { %287 = vst [vmem:[%s8719_s6 + $0x110] sm:$0xff] %v286_v34 }
  0x26   : > { %295 = vsyncadd %s185_s7, 4480 }
  0x27   : > { %8642 = dma.done.wait %s185_s7, 4480 }
  0x28   : > { %8643 = vsyncadd %s185_s7, 4294962816  ;;  %v8509_v35 = vld [vmem:[%s10379_s1 + $0x40] sm:$0xff]   ;;  %v8511_v37 = vld [vmem:[%s10379_s1 + $0x48] sm:$0xff]   ;;  %vm497_vm0 = vsmask.f32 7424  ;;  %vm3363_vm2 = vcmask 1045504  }
  0x29   : > { %v8510_v36 = vld [vmem:[%s10379_s1 + $0x100] sm:$0xff]   ;;  %7237 = vmatprep.subr.bf16.mxu1 %v8509_v35  ;;  %v8512_v38 = vld [vmem:[%s10379_s1 + $0x108] sm:$0xff]   ;;  %v8513_v39 = vld [vmem:[%s10379_s1 + $0x50] sm:$0xff]   ;;  %vm2613_vm1 = vsmask.f32 6400  ;;  %vm1515_vm3 = vcmask 1046528  }
  0x2a   : > { %7557 = vmatprep.subr.bf16.mxu0 %v8510_v36  ;;  %7238 = vmatpush3.bf16.msra.mxu1 %v8509_v35  ;;  %v8514_v40 = vld [vmem:[%s10379_s1 + $0x110] sm:$0xff]   ;;  %v8515_v41 = vld [vmem:[%s10379_s1 + $0x58] sm:$0xff]   ;;  %v8517_v43 = vld [vmem:[%s10379_s1 + $0x60] sm:$0xff]   ;;  %vm4461_vm4 = vsmask.f32 5376  ;;  %vm5211_vm5 = vcmask 1044480  }
  0x2b   : > { %7558 = vmatpush3.bf16.msra.mxu0 %v8510_v36  ;;  %7239 = vmatprep.subr.bf16.mxu1 %v8511_v37  ;;  %v8516_v42 = vld [vmem:[%s10379_s1 + $0x118] sm:$0xff]   ;;  %v8518_v44 = vld [vmem:[%s10379_s1 + $0x120] sm:$0xff]   ;;  %v8519_v45 = vld [vmem:[%s10379_s1 + $0x68] sm:$0xff]  }
  0x2c   : > { %7559 = vmatprep.subr.bf16.mxu0 %v8512_v38  ;;  %v431_v46 = vld [vmem:[%s8719_s6] sm:$0xff]  ;;  %v432_v47 = vld [vmem:[%s8719_s6 + $0x8] sm:$0xff]  ;;  %v8830_v53 = vld [vmem:[%s8719_s6 + $0x10] sm:$0xff] }
  0x2d   : > { %v2014_v48 = vld [vmem:[%s8719_s6 + $0x8] sm:$0xfe]  ;;  %v499_v50 = vshrl.u32 %v431_v46, 16  ;;  %v501_v51 = vshll.u32 %v431_v46, 16  ;;  %v506_v52 = vshll.u32 %v432_v47, 16  ;;  %v2623_v56 = vshrl.u32 %v8830_v53, 16 }
  0x2e   : > { %7240 = vmatpush3.bf16.msra.mxu1 %v8511_v37  ;;  %v8520_v49 = vld [vmem:[%s10379_s1 + $0x128] sm:$0xff]   ;;  %v2615_v54 = vshrl.u32 %v2014_v48, 16  ;;  %v2618_v55 = vshll.u32 %v2014_v48, 16  ;;  %v2626_v57 = vshll.u32 %v8830_v53, 16  ;;  %v8835_v61 = vld [vmem:[%s8719_s6 + $0x18] sm:$0xff]  ;;  %v8846_v6 = vld [vmem:[%s8719_s6 + $0x20] sm:$0xff] }
  0x2f   : > { %7560 = vmatpush3.bf16.msra.mxu0 %v8512_v38  ;;  %7241 = vmatprep.subr.bf16.mxu1 %v8513_v39  ;;  %v503_v58 = vrot.slane %v501_v51, 1  ;;  %v508_v59 = vrot.slane %v506_v52, 1  ;;  %v8521_v62 = vld [vmem:[%s10379_s1 + $0x70] sm:$0xff]   ;;  %v2625_v0 = vrot.slane %v2623_v56, 1  ;;  %v2632_v4 = vshrl.u32 %v8835_v61, 16  ;;  %v8523_v12 = vld [vmem:[%s10379_s1 + $0x78] sm:$0xff]  }
  0x30   : > { %7561 = vmatprep.subr.bf16.mxu0 %v8514_v40  ;;  %v2617_v60 = vrot.slane %v2615_v54, 1  ;;  %v2620_v63 = vrot.slane %v2618_v55, 2  ;;  %v2628_v1 = vrot.slane %v2626_v57, 2  ;;  %v8522_v2 = vld [vmem:[%s10379_s1 + $0x130] sm:$0xff]   ;;  %v2635_v5 = vshll.u32 %v8835_v61, 16  ;;  %v8524_v17 = vld [vmem:[%s10379_s1 + $0x138] sm:$0xff]  }
  0x31   : > { %v504_v3 = vor.u32 %v503_v58, %v499_v50  ;;  %v2641_v9 = vshrl.u32 %v8846_v6, 16  ;;  %v510_v11 = vshrl.u32 %v432_v47, 16  ;;  %v2634_v14 = vrot.slane %v2632_v4, 1  ;;  %v8859_v18 = vld [vmem:[%s8719_s6 + $0x28] sm:$0xff]  ;;  %v8862_v21 = vld [vmem:[%s8719_s6 + $0x30] sm:$0xff]  ;;  %v8892_v46 = vld [vmem:[%s8719_s6 + $0x40] sm:$0xff] }
  0x32   : > { %7242 = vmatpush3.bf16.msra.mxu1 %v8513_v39  ;;  %v2621_v7 = vor.u32 %v2620_v63, %v2617_v60  ;;  %v2629_v8 = vor.u32 %v2628_v1, %v2625_v0  ;;  %v2637_v15 = vrot.slane %v2635_v5, 2  ;;  %v2644_v16 = vshll.u32 %v8846_v6, 16  ;;  %v8525_v24 = vld [vmem:[%s10379_s1] sm:$0xff]   ;;  %v8527_v38 = vld [vmem:[%s10379_s1 + $0x148] sm:$0xff]   ;;  %v8882_v39 = vld [vmem:[%s8719_s6 + $0x38] sm:$0xff] }
  0x33   : > { %7562 = vmatpush3.bf16.msra.mxu0 %v8514_v40  ;;  %7243 = vmatprep.subr.bf16.mxu1 %v8515_v41  ;;  %v509_v10 = vsel %vm497_vm0, %v504_v3, %v508_v59  ;;  %v2643_v19 = vrot.slane %v2641_v9, 1  ;;  %v512_v22 = vor.u32 %v510_v11, %v508_v59  ;;  %v516_v23 = vrot.slane %v2626_v57, 1  ;;  %v8526_v26 = vld [vmem:[%s10379_s1 + $0x140] sm:$0xff]   ;;  %v8531_v54 = vld [vmem:[%s10379_s1 + $0x10] sm:$0xff]  }
  0x34   : > { %7563 = vmatprep.subr.bf16.mxu0 %v8516_v42  ;;  %v2630_v13 = vsel %vm2613_vm1, %v2621_v7, %v2629_v8  ;;  %7253 = vmatprep.mubr.bf16.mxu1 %v509_v10  ;;  %v2646_v20 = vrot.slane %v2644_v16, 2  ;;  %v2638_v25 = vor.u32 %v2637_v15, %v2634_v14  ;;  %v524_v27 = vrot.slane %v2635_v5, 1  ;;  %v8530_v5 = vld [vmem:[%s10379_s1 + $0x158] sm:$0xff]  }
  0x35   : > { %7573 = vmatprep.mubr.bf16.mxu0 %v2630_v13  ;;  %v2650_v28 = vshrl.u32 %v8859_v18, 16  ;;  %v2653_v29 = vshll.u32 %v8859_v18, 16  ;;  %v520_v30 = vor.u32 %v2623_v56, %v516_v23  ;;  %v2659_v31 = vshrl.u32 %v8862_v21, 16  ;;  %v8529_v56 = vld [vmem:[%s10379_s1 + $0x150] sm:$0xff]  }
  0x36   : > { %7244 = vmatpush3.bf16.msra.mxu1 %v8515_v41  ;;  %v2662_v32 = vshll.u32 %v8862_v21, 16  ;;  %v2647_v33 = vor.u32 %v2646_v20, %v2643_v19  ;;  %v517_v34 = vsel %vm497_vm0, %v512_v22, %v516_v23  ;;  %v2639_v35 = vsel %vm2613_vm1, %v2629_v8, %v2638_v25  ;;  %v8917_v8 = vld [vmem:[%s8719_s6 + $0x50] sm:$0xff]  ;;  %v8537_v22 = vld [vmem:[%s10379_s1 + $0x20] sm:$0xff]  }
  0x37   : > { %7564 = vmatpush3.bf16.msra.mxu0 %v8516_v42  ;;  %7245 = vmatprep.subr.bf16.mxu1 %v8517_v43  ;;  %v2652_v36 = vrot.slane %v2650_v28, 1  ;;  %v2655_v37 = vrot.slane %v2653_v29, 2  ;;  %v525_v40 = vsel %vm497_vm0, %v520_v30, %v524_v27  ;;  %v2661_v41 = vrot.slane %v2659_v31, 1 }
  0x38   : > { %7565 = vmatprep.subr.bf16.mxu0 %v8518_v44  ;;  %v2664_v42 = vrot.slane %v2662_v32, 2  ;;  %v528_v47 = vor.u32 %v2632_v4, %v524_v27  ;;  %v540_v48 = vrot.slane %v2653_v29, 1  ;;  %v2671_v52 = vshll.u32 %v8882_v39, 16  ;;  %v8911_v4 = vld [vmem:[%s8719_s6 + $0x48] sm:$0xff] }
  0x39   : > { %v2656_v50 = vor.u32 %v2655_v37, %v2652_v36  ;;  %v2677_v57 = vshrl.u32 %v8892_v46, 16  ;;  %v2680_v58 = vshll.u32 %v8892_v46, 16  ;;  %v548_v7 = vrot.slane %v2662_v32, 1 }
  0x3a   : > { %7246 = vmatpush3.bf16.msra.mxu1 %v8517_v43  ;;  %v2648_v43 = vsel %vm2613_vm1, %v2638_v25, %v2647_v33  ;;  %v2665_v55 = vor.u32 %v2664_v42, %v2661_v41  ;;  %v2673_v0 = vrot.slane %v2671_v52, 2  ;;  %v544_v10 = vor.u32 %v2650_v28, %v540_v48 }
  0x3b   : > { %7566 = vmatpush3.bf16.msra.mxu0 %v8518_v44  ;;  %7247 = vmatprep.subr.bf16.mxu1 %v8519_v45  ;;  %v532_v44 = vrot.slane %v2644_v16, 1  ;;  %v2657_v60 = vsel %vm2613_vm1, %v2647_v33, %v2656_v50  ;;  %v2682_v3 = vrot.slane %v2680_v58, 2  ;;  %v556_v11 = vrot.slane %v2671_v52, 1  ;;  %v8533_v33 = vld [vmem:[%s10379_s1 + $0x168] sm:$0xff]  }
  0x3c   : > { %7567 = vmatprep.subr.bf16.mxu0 %v8520_v49  ;;  %v2666_v1 = vsel %vm2613_vm1, %v2656_v50, %v2665_v55  ;;  %v552_v14 = vor.u32 %v2659_v31, %v548_v7  ;;  %v2686_v15 = vshrl.u32 %v8911_v4, 16  ;;  %v2689_v16 = vshll.u32 %v8911_v4, 16 }
  0x3d   : > { %v536_v51 = vor.u32 %v2641_v9, %v532_v44  ;;  %v533_v59 = vsel %vm497_vm0, %v528_v47, %v532_v44  ;;  %v8534_v9 = vld [vmem:[%s10379_s1 + $0x18] sm:$0xff]   ;;  %v2695_v19 = vshrl.u32 %v8917_v8, 16  ;;  %v2698_v20 = vshll.u32 %v8917_v8, 16 }
  0x3e   : > { %7248 = vmatpush3.bf16.msra.mxu1 %v8519_v45  ;;  %v8528_v45 = vld [vmem:[%s10379_s1 + $0x8] sm:$0xff]   ;;  %v549_v23 = vsel %vm497_vm0, %v544_v10, %v548_v7  ;;  %v2688_v27 = vrot.slane %v2686_v15, 1  ;;  %v2691_v28 = vrot.slane %v2689_v16, 2  ;;  %v564_v30 = vrot.slane %v2680_v58, 1 }
  0x3f   : > { %7568 = vmatpush3.bf16.msra.mxu0 %v8520_v49  ;;  %7249 = vmatprep.subr.bf16.mxu1 %v8521_v62  ;;  %v2668_v49 = vshrl.u32 %v8882_v39, 16  ;;  %v2697_v31 = vrot.slane %v2695_v19, 1  ;;  %v2700_v32 = vrot.slane %v2698_v20, 2 }
  0x40   : > { %7569 = vmatprep.subr.bf16.mxu0 %v8522_v2  ;;  %v568_v37 = vor.u32 %v2677_v57, %v564_v30 }
  0x41   : > { %v2670_v63 = vrot.slane %v2668_v49, 1  ;;  %v560_v36 = vor.u32 %v2668_v49, %v556_v11  ;;  %v2701_v44 = vor.u32 %v2700_v32, %v2697_v31 }
  0x42   : > { %7250 = vmatpush3.bf16.msra.mxu1 %v8521_v62  ;;  %v541_v62 = vsel %vm497_vm0, %v536_v51, %v540_v48  ;;  %v8541_v48 = vld [vmem:[%s10379_s1 + $0x30] sm:$0xff]  }
  0x43   : > { %7570 = vmatpush3.bf16.msra.mxu0 %v8522_v2  ;;  %7251 = vmatprep.subr.bf16.mxu1 %v8523_v12  ;;  %v2679_v2 = vrot.slane %v2677_v57, 1  ;;  %v2674_v13 = vor.u32 %v2673_v0, %v2670_v63  ;;  %v565_v49 = vsel %vm497_vm0, %v560_v36, %v564_v30  ;;  %v8543_v63 = vld [vmem:[%s10379_s1 + $0x38] sm:$0xff]  }
  0x44   : > { %7571 = vmatprep.subr.bf16.mxu0 %v8524_v17 }
  0x45   : > { %v2675_v25 = vsel %vm2613_vm1, %v2665_v55, %v2674_v13  ;;  %v8974_v55 = vld [vmem:[%s8719_s6 + $0x68] sm:$0xff] }
  0x46   : > { %7252 = vmatpush3.bf16.msra.mxu1 %v8523_v12  ;;  %v8532_v12 = vld [vmem:[%s10379_s1 + $0x160] sm:$0xff]   ;;  %v2722_v7 = vshrl.u32 %v8974_v55, 16 }
  0x47   : > { %7572 = vmatpush3.bf16.msra.mxu0 %v8524_v17  ;;  %7317 = vmatprep.subr.bf16.mxu1 %v8525_v24  ;;  %v2683_v17 = vor.u32 %v2682_v3, %v2679_v2  ;;  %v8993_v2 = vld [vmem:[%s10379_s1 + $0x180] sm:$0xff]  }
  0x48   : > { %7637 = vmatprep.subr.bf16.mxu0 %v8526_v26 }
  0x49   : > { %7254 = vmatmul.mubr.bf16.vlgmr.msra.gmra.mrb[0].mxu1 %v517_v34  ;;  %v2684_v29 = vsel %vm2613_vm1, %v2674_v13, %v2683_v17  ;;  %v8951_v34 = vld [vmem:[%s8719_s6 + $0x60] sm:$0xff] }
  0x4a   : > { %7574 = vmatmul.mubr.bf16.vlgmr.msra.gmra.mrb[0].mxu0 %v2639_v35  ;;  %7318 = vmatpush3.bf16.msra.mxu1 %v8525_v24  ;;  %v8938_v24 = vld [vmem:[%s8719_s6 + $0x58] sm:$0xff]  ;;  %v8539_v35 = vld [vmem:[%s10379_s1 + $0x28] sm:$0xff]   ;;  %v2716_v47 = vshll.u32 %v8951_v34, 16  ;;  %v9004_v13 = vld [vmem:[%s10379_s1 + $0x80] sm:$0xff]  }
  0x4b   : > { %7638 = vmatpush3.bf16.msra.mxu0 %v8526_v26  ;;  %7257 = vmatprep.mubr.bf16.mxu1 %v525_v40  ;;  %v557_v26 = vsel %vm497_vm0, %v552_v14, %v556_v11  ;;  %v572_v40 = vrot.slane %v2689_v16, 1  ;;  %v2704_v41 = vshrl.u32 %v8938_v24, 16  ;;  %v2707_v42 = vshll.u32 %v8938_v24, 16 }
  0x4c   : > { %7577 = vmatprep.mubr.bf16.mxu0 %v2648_v43  ;;  %7639 = vmatprep.subr.bf16.mxu0 %v8527_v38  ;;  %v8535_v43 = vld [vmem:[%s10379_s1 + $0x170] sm:$0xff]   ;;  %v2718_v58 = vrot.slane %v2716_v47, 2 }
  0x4d   : > { %7319 = vmatprep.subr.bf16.mxu1 %v8528_v45  ;;  %v573_v51 = vsel %vm497_vm0, %v568_v37, %v572_v40  ;;  %v2706_v52 = vrot.slane %v2704_v41, 1  ;;  %v576_v0 = vor.u32 %v2686_v15, %v572_v40 }
  0x4e   : > { %7320 = vmatpush3.bf16.msra.mxu1 %v8528_v45  ;;  %v2713_v45 = vshrl.u32 %v8951_v34, 16 }
  0x4f   : > { %7640 = vmatpush3.bf16.msra.mxu0 %v8527_v38  ;;  %7321 = vmatprep.subr.bf16.mxu1 %v8531_v54  ;;  %v2692_v38 = vor.u32 %v2691_v28, %v2688_v27  ;;  %v9015_v27 = vld [vmem:[%s8719_s6 + $0x80] sm:$0xff] }
  0x50   : > { %7641 = vmatprep.subr.bf16.mxu0 %v8529_v56  ;;  %v2715_v57 = vrot.slane %v2713_v45, 1  ;;  %v2749_v36 = vshrl.u32 %v9015_v27, 16  ;;  %v2752_v37 = vshll.u32 %v9015_v27, 16 }
  0x51   : > { %7258 = vmatmul.mubr.bf16.gmra.mrb[4].mxu1 %v533_v59  ;;  %v2693_v50 = vsel %vm2613_vm1, %v2683_v17, %v2692_v38  ;;  %v8980_v59 = vld [vmem:[%s8719_s6 + $0x70] sm:$0xff]  ;;  %v2724_v17 = vrot.slane %v2722_v7, 1 }
  0x52   : > { %7578 = vmatmul.mubr.bf16.gmra.mrb[4].mxu0 %v2657_v60  ;;  %7261 = vmatprep.mubr.bf16.mxu1 %v541_v62  ;;  %v8536_v60 = vld [vmem:[%s10379_s1 + $0x178] sm:$0xff]   ;;  %v580_v62 = vrot.slane %v2698_v20, 1  ;;  %v2719_v10 = vor.u32 %v2718_v58, %v2715_v57  ;;  %v2731_v11 = vshrl.u32 %v8980_v59, 16 }
  0x53   : > { %7581 = vmatprep.mubr.bf16.mxu0 %v2666_v1  ;;  %7642 = vmatpush3.bf16.msra.mxu0 %v8529_v56  ;;  %v2702_v56 = vsel %vm2613_vm1, %v2692_v38, %v2701_v44  ;;  %v588_v1 = vrot.slane %v2707_v42, 1 }
  0x54   : > { %7643 = vmatprep.subr.bf16.mxu0 %v8530_v5  ;;  %7322 = vmatpush3.bf16.msra.mxu1 %v8531_v54  ;;  %v2709_v54 = vrot.slane %v2707_v42, 2  ;;  %v581_v14 = vsel %vm497_vm0, %v576_v0, %v580_v62 }
  0x55   : > { %7323 = vmatprep.subr.bf16.mxu1 %v8534_v9  ;;  %v592_v28 = vor.u32 %v2704_v41, %v588_v1 }
  0x56   : > { %v2710_v3 = vor.u32 %v2709_v54, %v2706_v52 }
  0x57   : > { %7644 = vmatpush3.bf16.msra.mxu0 %v8530_v5  ;;  %v584_v5 = vor.u32 %v2695_v19, %v580_v62 }
  0x58   : > { %7645 = vmatprep.subr.bf16.mxu0 %v8532_v12  ;;  %7324 = vmatpush3.bf16.msra.mxu1 %v8534_v9  ;;  %v2725_v9 = vshll.u32 %v8974_v55, 16  ;;  %v2711_v15 = vsel %vm2613_vm1, %v2701_v44, %v2710_v3  ;;  %v2720_v20 = vsel %vm2613_vm1, %v2710_v3, %v2719_v10 }
  0x59   : > { %7262 = vmatmul.mubr.bf16.gmra.mrb[8].mxu1 %v549_v23  ;;  %7325 = vmatprep.subr.bf16.mxu1 %v8537_v22  ;;  %v589_v16 = vsel %vm497_vm0, %v584_v5, %v588_v1  ;;  %v628_v5 = vrot.slane %v2752_v37, 1 }
  0x5a   : > { %7582 = vmatmul.mubr.bf16.gmra.mrb[8].mxu0 %v2675_v25  ;;  %7265 = vmatprep.mubr.bf16.mxu1 %v557_v26  ;;  %v2727_v19 = vrot.slane %v2725_v9, 2  ;;  %v9011_v25 = vld [vmem:[%s8719_s6 + $0x78] sm:$0xff]  ;;  %v596_v26 = vrot.slane %v2716_v47, 1  ;;  %v2754_v47 = vrot.slane %v2752_v37, 2 }
  0x5b   : > { %7585 = vmatprep.mubr.bf16.mxu0 %v2684_v29  ;;  %7646 = vmatpush3.bf16.msra.mxu0 %v8532_v12  ;;  %v2734_v12 = vshll.u32 %v8980_v59, 16  ;;  %v604_v29 = vrot.slane %v2725_v9, 1  ;;  %v2740_v32 = vshrl.u32 %v9011_v25, 16 }
  0x5c   : > { %7647 = vmatprep.subr.bf16.mxu0 %v8533_v33  ;;  %7326 = vmatpush3.bf16.msra.mxu1 %v8537_v22  ;;  %v2733_v22 = vrot.slane %v2731_v11, 1  ;;  %v2728_v30 = vor.u32 %v2727_v19, %v2724_v17  ;;  %v600_v31 = vor.u32 %v2713_v45, %v596_v26  ;;  %v597_v38 = vsel %vm497_vm0, %v592_v28, %v596_v26 }
  0x5d   : > { %7327 = vmatprep.subr.bf16.mxu1 %v8539_v35  ;;  %v2736_v23 = vrot.slane %v2734_v12, 2  ;;  %v2742_v42 = vrot.slane %v2740_v32, 1  ;;  %v2751_v45 = vrot.slane %v2749_v36, 1  ;;  %v3365_v17 = vrot.slane %v8830_v53, 2 }
  0x5e   : > { %v2729_v40 = vsel %vm2613_vm1, %v2719_v10, %v2728_v30  ;;  %v605_v41 = vsel %vm497_vm0, %v600_v31, %v604_v29  ;;  %v9041_v10 = vld [vmem:[%s8719_s6 + $0x90] sm:$0xff] }
  0x5f   : > { %7648 = vmatpush3.bf16.msra.mxu0 %v8533_v33  ;;  %v2743_v33 = vshll.u32 %v9011_v25, 16  ;;  %v2755_v58 = vor.u32 %v2754_v47, %v2751_v45  ;;  %v642_v19 = vshll.u32 %v9041_v10, 16  ;;  %v646_v26 = vshrl.u32 %v9041_v10, 16 }
  0x60   : > { %7649 = vmatprep.subr.bf16.mxu0 %v8535_v43  ;;  %7328 = vmatpush3.bf16.msra.mxu1 %v8539_v35  ;;  %v2737_v35 = vor.u32 %v2736_v23, %v2733_v22 }
  0x61   : > { %7266 = vmatmul.mubr.bf16.gmra.mrb[12].mxu1 %v565_v49  ;;  %7329 = vmatprep.subr.bf16.mxu1 %v8541_v48  ;;  %v612_v49 = vrot.slane %v2734_v12, 1  ;;  %v632_v12 = vor.u32 %v2749_v36, %v628_v5  ;;  %v644_v53 = vrot.slane %v642_v19, 1  ;;  %v9105_v19 = vld [vmem:[%s8719_s6 + $0xc8] sm:$0xff] }
  0x62   : > { %7586 = vmatmul.mubr.bf16.gmra.mrb[12].mxu0 %v2693_v50  ;;  %7269 = vmatprep.mubr.bf16.mxu1 %v573_v51  ;;  %v2738_v44 = vsel %vm2613_vm1, %v2728_v30, %v2737_v35  ;;  %v608_v50 = vor.u32 %v2722_v7, %v604_v29  ;;  %v620_v51 = vrot.slane %v2743_v33, 1  ;;  %v3343_v7 = vld [vmem:[%s8719_s6 + $0x8] sm:$0xfc]  ;;  %v9058_v30 = vld [vmem:[%s8719_s6 + $0xa0] sm:$0xff] }
  0x63   : > { %7589 = vmatprep.mubr.bf16.mxu0 %v2702_v56  ;;  %7650 = vmatpush3.bf16.msra.mxu0 %v8535_v43  ;;  %v2745_v43 = vrot.slane %v2743_v33, 2  ;;  %v616_v54 = vor.u32 %v2731_v11, %v612_v49  ;;  %v3369_v33 = vrot.slane %v8846_v6, 2  ;;  %v648_v36 = vor.u32 %v646_v26, %v644_v53 }
  0x64   : > { %7651 = vmatprep.subr.bf16.mxu0 %v8536_v60  ;;  %7330 = vmatpush3.bf16.msra.mxu1 %v8541_v48  ;;  %v9031_v48 = vld [vmem:[%s8719_s6 + $0x88] sm:$0xff]  ;;  %v624_v9 = vor.u32 %v2740_v32, %v620_v51  ;;  %v3367_v32 = vrot.slane %v8835_v61, 2 }
  0x65   : > { %7331 = vmatprep.subr.bf16.mxu1 %v8543_v63  ;;  %v2746_v52 = vor.u32 %v2745_v43, %v2742_v42  ;;  %v2758_v56 = vshrl.u32 %v9031_v48, 16  ;;  %v2761_v57 = vshll.u32 %v9031_v48, 16  ;;  %v8540_v42 = vld [vmem:[%s10379_s1 + $0x188] sm:$0xff]   ;;  %v662_v43 = vshrl.u32 %v9058_v30, 16 }
  0x66   : > { %v3368_v61 = vsel %vm3363_vm2, %v3365_v17, %v3367_v32  ;;  %v3370_v45 = vsel %vm3363_vm2, %v3367_v32, %v3369_v33 }
  0x67   : > { %7652 = vmatpush3.bf16.msra.mxu0 %v8536_v60  ;;  %v613_v60 = vsel %vm497_vm0, %v608_v50, %v612_v49  ;;  %v2747_v62 = vsel %vm2613_vm1, %v2737_v35, %v2746_v52  ;;  %v2760_v0 = vrot.slane %v2758_v56, 1  ;;  %v2763_v1 = vrot.slane %v2761_v57, 2  ;;  %v9063_v35 = vld [vmem:[%s8719_s6 + $0xa8] sm:$0xff]  ;;  %v9077_v50 = vld [vmem:[%s8719_s6 + $0xb0] sm:$0xff] }
  0x68   : > { %7717 = vmatprep.subr.bf16.mxu0 %v8993_v2  ;;  %7332 = vmatpush3.bf16.msra.mxu1 %v8543_v63  ;;  %v621_v63 = vsel %vm497_vm0, %v616_v54, %v620_v51  ;;  %v2756_v3 = vsel %vm2613_vm1, %v2746_v52, %v2755_v58  ;;  %v3371_v51 = vrot.slane %v8859_v18, 2 }
  0x69   : > { %7270 = vmatmul.mubr.bf16.gmra.mrb[16].mxu1 %v581_v14  ;;  %7397 = vmatprep.subr.bf16.mxu1 %v9004_v13  ;;  %v9043_v11 = vor.u32 %v2763_v1, %v2760_v0  ;;  %v636_v14 = vrot.slane %v2761_v57, 1  ;;  %v9083_v57 = vld [vmem:[%s8719_s6 + $0xb8] sm:$0xff] }
  0x6a   : > { %7590 = vmatmul.mubr.bf16.gmra.mrb[16].mxu0 %v2711_v15  ;;  %7273 = vmatprep.mubr.bf16.mxu1 %v589_v16  ;;  %v9046_v15 = vld [vmem:[%s8719_s6 + $0x98] sm:$0xff]  ;;  %v3364_v16 = vrot.slane %v3343_v7, 2  ;;  %v3372_v18 = vsel %vm3363_vm2, %v3369_v33, %v3371_v51  ;;  %v682_v0 = vshll.u32 %v9083_v57, 16  ;;  %v686_v26 = vshrl.u32 %v9083_v57, 16 }
  0x6b   : > { %7593 = vmatprep.mubr.bf16.mxu0 %v2720_v20  ;;  %10417 = vst [vmem:[#allocation7_spill] sm:$0xff] %v9043_v11  ;;  %v629_v20 = vsel %vm497_vm0, %v624_v9, %v628_v5  ;;  %v2765_v22 = vsel %vm2613_vm1, %v2755_v58, %v9043_v11  ;;  %v637_v23 = vsel %vm497_vm0, %v632_v12, %v636_v14  ;;  %v650_v28 = vshll.u32 %v9046_v15, 16  ;;  %v8542_v58 = vld [vmem:[%s10379_s1 + $0x190] sm:$0xff]   ;;  %v9100_v9 = vld [vmem:[%s8719_s6 + $0xc0] sm:$0xff] }
  0x6c   : > { %v3366_v29 = vsel %vm3363_vm2, %v3364_v16, %v3365_v17  ;;  %v640_v31 = vor.u32 %v2758_v56, %v636_v14  ;;  %v3373_v56 = vrot.slane %v8862_v21, 2  ;;  %v678_v21 = vshrl.u32 %v9077_v50, 16 }
  0x6d   : > { %v652_v37 = vrot.slane %v650_v28, 1  ;;  %v3375_v12 = vrot.slane %v8882_v39, 2  ;;  %v684_v16 = vrot.slane %v682_v0, 1  ;;  %v3377_v17 = vrot.slane %v8892_v46, 2  ;;  %v9156_v0 = vld [vmem:[%s10379_s1 + $0x1c0] sm:$0xff]  }
  0x6e   : > { %v3374_v1 = vsel %vm3363_vm2, %v3371_v51, %v3373_v56  ;;  %v694_v46 = vshrl.u32 %v9100_v9, 16 }
  0x6f   : > { %v653_v6 = vsel %vm497_vm0, %v648_v36, %v652_v37  ;;  %v3376_v39 = vsel %vm3363_vm2, %v3373_v56, %v3375_v12  ;;  %v688_v33 = vor.u32 %v686_v26, %v684_v16  ;;  %v9122_v36 = vld [vmem:[%s8719_s6 + $0xd0] sm:$0xff]  ;;  %v3387_v26 = vrot.slane %v8974_v55, 2 }
  0x71   : > { %7274 = vmatmul.mubr.bf16.gmra.mrb[20].mxu1 %v597_v38  ;;  %v658_v38 = vshll.u32 %v9058_v30, 16 }
  0x72   : > { %7594 = vmatmul.mubr.bf16.gmra.mrb[20].mxu0 %v2729_v40  ;;  %7277 = vmatprep.mubr.bf16.mxu1 %v605_v41  ;;  %v645_v40 = vsel %vm497_vm0, %v640_v31, %v644_v53  ;;  %v654_v41 = vshrl.u32 %v9046_v15, 16  ;;  %v3378_v53 = vsel %vm3363_vm2, %v3375_v12, %v3377_v17  ;;  %v8548_v31 = vld [vmem:[%s10379_s1 + $0x1a8] sm:$0xff]  }
  0x73   : > { %7597 = vmatprep.mubr.bf16.mxu0 %v2738_v44  ;;  %v666_v44 = vshll.u32 %v9063_v35, 16  ;;  %v660_v47 = vrot.slane %v658_v38, 1 }
  0x74   : > { %v656_v49 = vor.u32 %v654_v41, %v652_v37  ;;  %v3379_v37 = vrot.slane %v8911_v4, 2  ;;  %v3381_v41 = vrot.slane %v8917_v8, 2 }
  0x75   : > { %v664_v52 = vor.u32 %v662_v43, %v660_v47  ;;  %v668_v54 = vrot.slane %v666_v44, 1  ;;  %v702_v44 = vshrl.u32 %v9105_v19, 16 }
  0x79   : > { %7278 = vmatmul.mubr.bf16.gmra.mrb[24].mxu1 %v613_v60  ;;  %v674_v60 = vshll.u32 %v9077_v50, 16 }
  0x7a   : > { %7598 = vmatmul.mubr.bf16.gmra.mrb[24].mxu0 %v2747_v62  ;;  %7281 = vmatprep.mubr.bf16.mxu1 %v621_v63  ;;  %v661_v62 = vsel %vm497_vm0, %v656_v49, %v660_v47  ;;  %v669_v63 = vsel %vm497_vm0, %v664_v52, %v668_v54  ;;  %v710_v49 = vshrl.u32 %v9122_v36, 16  ;;  %v3382_v52 = vsel %vm3363_vm2, %v3379_v37, %v3381_v41 }
  0x7b   : > { %7601 = vmatprep.mubr.bf16.mxu0 %v2756_v3  ;;  %v8544_v3 = vld [vmem:[%s10379_s1 + $0x198] sm:$0xff]   ;;  %v676_v5 = vrot.slane %v674_v60, 1 }
  0x7c   : > { %v9144_v60 = vld [vmem:[%s8719_s6 + $0xe0] sm:$0xff] }
  0x7d   : > { %v680_v14 = vor.u32 %v678_v21, %v676_v5  ;;  %v9151_v21 = vld [vmem:[%s8719_s6 + $0xe8] sm:$0xff] }
  0x7f   : > { %v685_v28 = vsel %vm497_vm0, %v680_v14, %v684_v16  ;;  %v726_v14 = vshrl.u32 %v9144_v60, 16  ;;  %v730_v16 = vshll.u32 %v9151_v21, 16 }
  0x81   : > { %7282 = vmatmul.mubr.bf16.gmra.mrb[28].mxu1 %v629_v20  ;;  %v8546_v20 = vld [vmem:[%s10379_s1 + $0x1a0] sm:$0xff]  }
  0x82   : > { %7602 = vmatmul.mubr.bf16.gmra.mrb[28].mxu0 %v2765_v22  ;;  %7285 = vmatprep.mubr.bf16.mxu1 %v637_v23  ;;  %v690_v22 = vshll.u32 %v9100_v9, 16 }
  0x83   : > { %7653 = vmatprep.mubr.bf16.mxu0 %v3366_v29  ;;  %v698_v29 = vshll.u32 %v9105_v19, 16 }
  0x84   : > { %v692_v32 = vrot.slane %v690_v22, 1 }
  0x86   : > { %v696_v38 = vor.u32 %v694_v46, %v692_v32  ;;  %v693_v43 = vsel %vm497_vm0, %v688_v33, %v692_v32  ;;  %v3389_v46 = vrot.slane %v8980_v59, 2  ;;  %v734_v32 = vshrl.u32 %v9151_v21, 16 }
  0x89   : > { %7286 = vmatmul.mubr.bf16.gmra.mrb[32].mxu1 %v645_v40  ;;  %v700_v40 = vrot.slane %v698_v29, 1  ;;  %v9178_v29 = vld [vmem:[%s8719_s6 + $0xf8] sm:$0xff] }
  0x8a   : > { %7654 = vmatmul.mubr.bf16.vlgmr.msra.gmra.mrb[0].mxu0 %v3368_v61  ;;  %7289 = vmatprep.mubr.bf16.mxu1 %v653_v6  ;;  %v8550_v61 = vld [vmem:[%s10379_s1 + $0x1b0] sm:$0xff]   ;;  %v706_v6 = vshll.u32 %v9122_v36, 16 }
  0x8b   : > { %7718 = vmatpush3.bf16.msra.mxu0 %v8993_v2  ;;  %7657 = vmatprep.mubr.bf16.mxu0 %v3370_v45  ;;  %v670_v2 = vshrl.u32 %v9063_v35, 16  ;;  %v3380_v45 = vsel %vm3363_vm2, %v3377_v17, %v3379_v37  ;;  %v701_v47 = vsel %vm497_vm0, %v696_v38, %v700_v40 }
  0x8c   : > { %7719 = vmatprep.subr.bf16.mxu0 %v8540_v42  ;;  %v708_v56 = vrot.slane %v706_v6, 1 }
  0x8d   : > { %v672_v7 = vor.u32 %v670_v2, %v668_v54  ;;  %v8552_v54 = vld [vmem:[%s10379_s1 + $0x1b8] sm:$0xff]  }
  0x8e   : > { %v712_v2 = vor.u32 %v710_v49, %v708_v56  ;;  %v3393_v49 = vrot.slane %v9015_v27, 2 }
  0x8f   : > { %7720 = vmatpush3.bf16.msra.mxu0 %v8540_v42  ;;  %v677_v23 = vsel %vm497_vm0, %v672_v7, %v676_v5  ;;  %v9127_v42 = vld [vmem:[%s8719_s6 + $0xd8] sm:$0xff] }
  0x90   : > { %7721 = vmatprep.subr.bf16.mxu0 %v8542_v58  ;;  %v714_v51 = vshll.u32 %v9127_v42, 16  ;;  %v718_v5 = vshrl.u32 %v9127_v42, 16 }
  0x91   : > { %7290 = vmatmul.mubr.bf16.gmra.mrb[36].mxu1 %v661_v62  ;;  %v9147_v62 = vrot.slane %v8938_v24, 2 }
  0x92   : > { %7658 = vmatmul.mubr.bf16.gmra.mrb[4].mxu0 %v3372_v18  ;;  %7293 = vmatprep.mubr.bf16.mxu1 %v669_v63  ;;  %v716_v18 = vrot.slane %v714_v51, 1  ;;  %v3385_v63 = vrot.slane %v8951_v34, 2 }
  0x93   : > { %7661 = vmatprep.mubr.bf16.mxu0 %v3374_v1  ;;  %7722 = vmatpush3.bf16.msra.mxu0 %v8542_v58  ;;  %v704_v58 = vor.u32 %v702_v44, %v700_v40  ;;  %v722_v1 = vshll.u32 %v9144_v60, 16  ;;  %v3384_v7 = vsel %vm3363_vm2, %v3381_v41, %v9147_v62  ;;  %v746_v40 = vshll.u32 %v9178_v29, 16 }
  0x94   : > { %7723 = vmatprep.subr.bf16.mxu0 %v8544_v3  ;;  %v717_v12 = vsel %vm497_vm0, %v712_v2, %v716_v18  ;;  %v9168_v17 = vsel %vm3363_vm2, %v9147_v62, %v3385_v63  ;;  %v720_v22 = vor.u32 %v718_v5, %v716_v18  ;;  %v9184_v33 = vsel %vm3363_vm2, %v3385_v63, %v3387_v26 }
  0x95   : > { %v9190_v41 = vsel %vm3363_vm2, %v3387_v26, %v3389_v46 }
  0x97   : > { %7724 = vmatpush3.bf16.msra.mxu0 %v8544_v3  ;;  %v709_v3 = vsel %vm497_vm0, %v704_v58, %v708_v56 }
  0x98   : > { %7725 = vmatprep.subr.bf16.mxu0 %v8546_v20 }
  0x99   : > { %7294 = vmatmul.mubr.bf16.gmra.mrb[40].mxu1 %v677_v23  ;;  %v9172_v23 = vld [vmem:[%s8719_s6 + $0xf0] sm:$0xff] }
  0x9a   : > { %7662 = vmatmul.mubr.bf16.gmra.mrb[8].mxu0 %v3376_v39  ;;  %7297 = vmatprep.mubr.bf16.mxu1 %v685_v28  ;;  %v732_v28 = vrot.slane %v730_v16, 1  ;;  %v742_v38 = vshrl.u32 %v9172_v23, 16  ;;  %v3399_v16 = vrot.slane %v9046_v15, 2 }
  0x9b   : > { %7665 = vmatprep.mubr.bf16.mxu0 %v3378_v53  ;;  %7726 = vmatpush3.bf16.msra.mxu0 %v8546_v20  ;;  %v724_v20 = vrot.slane %v722_v1, 1  ;;  %v738_v53 = vshll.u32 %v9172_v23, 16  ;;  %v3395_v1 = vrot.slane %v9031_v48, 2 }
  0x9c   : > { %7727 = vmatprep.subr.bf16.mxu0 %v8548_v31  ;;  %v736_v6 = vor.u32 %v734_v32, %v732_v28  ;;  %v3405_v32 = vrot.slane %v9077_v50, 2 }
  0x9d   : > { %v728_v39 = vor.u32 %v726_v14, %v724_v20  ;;  %v8581_v14 = vld [vmem:[%s8719_s6] sm:$0xff] }
  0x9f   : > { %7728 = vmatpush3.bf16.msra.mxu0 %v8548_v31  ;;  %v725_v31 = vsel %vm497_vm0, %v720_v22, %v724_v20  ;;  %v733_v37 = vsel %vm497_vm0, %v728_v39, %v732_v28  ;;  %v3401_v20 = vrot.slane %v9058_v30, 2  ;;  %v8547_v39 = vld [vmem:[%s10379_s1 + $0x88] sm:$0xff]  }
  0xa0   : > { %7729 = vmatprep.subr.bf16.mxu0 %v8550_v61  ;;  %v9235_v28 = vld [vmem:[%s8719_s6 + $0x8] sm:$0xff] }
  0xa1   : > { %7298 = vmatmul.mubr.bf16.gmra.mrb[44].mxu1 %v693_v43  ;;  %v3391_v43 = vrot.slane %v9011_v25, 2  ;;  %v9229_v26 = vsel %vm3363_vm2, %v3399_v16, %v3401_v20 }
  0xa2   : > { %7666 = vmatmul.mubr.bf16.gmra.mrb[12].mxu0 %v3380_v45  ;;  %7301 = vmatprep.mubr.bf16.mxu1 %v701_v47  ;;  %v748_v45 = vrot.slane %v746_v40, 1  ;;  %v9196_v47 = vld [vmem:[%s8719_s6 + $0x100] sm:$0x1]  ;;  %v9260_v40 = vld [vmem:[%s8719_s6 + $0x18] sm:$0xff] }
  0xa3   : > { %7669 = vmatprep.mubr.bf16.mxu0 %v3382_v52  ;;  %7730 = vmatpush3.bf16.msra.mxu0 %v8550_v61  ;;  %v740_v61 = vrot.slane %v738_v53, 1  ;;  %10418 = vst [vmem:[#allocation8_spill] sm:$0xff] %v9196_v47  ;;  %v750_v52 = vshrl.u32 %v9178_v29, 16  ;;  %v9203_v56 = vsel %vm3363_vm2, %v3389_v46, %v3391_v43  ;;  %v9207_v2 = vsel %vm3363_vm2, %v3391_v43, %v3393_v49  ;;  %v9241_v46 = vld [vmem:[%s8719_s6 + $0x10] sm:$0xff] }
  0xa4   : > { %7731 = vmatprep.subr.bf16.mxu0 %v8552_v54  ;;  %v3403_v53 = vrot.slane %v9063_v35, 2  ;;  %v3409_v43 = vrot.slane %v9100_v9, 2 }
  0xa5   : > { %v744_v44 = vor.u32 %v742_v38, %v740_v61  ;;  %v741_v51 = vsel %vm497_vm0, %v736_v6, %v740_v61  ;;  %v752_v18 = vor.u32 %v750_v52, %v748_v45  ;;  %v8551_v38 = vld [vmem:[%s10379_s1 + $0x98] sm:$0xff]   ;;  %v3407_v6 = vrot.slane %v9083_v57, 2  ;;  %v9284_v52 = vld [vmem:[%s8719_s6 + $0x28] sm:$0xff] }
  0xa6   : > { %v9265_v61 = vld [vmem:[%s8719_s6 + $0x20] sm:$0xff] }
  0xa7   : > { %7732 = vmatpush3.bf16.msra.mxu0 %v8552_v54  ;;  %v754_v54 = vshll.u32 %v9196_v47, 16  ;;  %v749_v58 = vsel %vm497_vm0, %v744_v44, %v748_v45  ;;  %v8553_v44 = vld [vmem:[%s10379_s1 + $0xa0] sm:$0xff]   ;;  %v9275_v45 = vsel %vm3363_vm2, %v3405_v32, %v3407_v6 }
  0xa8   : > { %7797 = vmatprep.subr.bf16.mxu0 %v9156_v0 }
  0xa9   : > { %7302 = vmatmul.mubr.bf16.gmra.mrb[48].mxu1 %v709_v3  ;;  %v756_v63 = vrot.slane %v754_v54, 1  ;;  %v3397_v3 = vrot.slane %v9041_v10, 2  ;;  %v9289_v54 = vld [vmem:[%s8719_s6 + $0x30] sm:$0xff] }
  0xaa   : > { %7670 = vmatmul.mubr.bf16.gmra.mrb[16].mxu0 %v3384_v7  ;;  %7305 = vmatprep.mubr.bf16.mxu1 %v717_v12  ;;  %v9215_v7 = vsel %vm3363_vm2, %v3393_v49, %v3395_v1  ;;  %v9278_v49 = vsel %vm3363_vm2, %v3407_v6, %v3409_v43  ;;  %v3421_v6 = vrot.slane %v9172_v23, 2 }
  0xab   : > { %7673 = vmatprep.mubr.bf16.mxu0 %v9168_v17  ;;  %v757_v5 = vsel %vm497_vm0, %v752_v18, %v756_v63  ;;  %v9218_v12 = vsel %vm3363_vm2, %v3395_v1, %v3397_v3  ;;  %v9226_v22 = vsel %vm3363_vm2, %v3397_v3, %v3399_v16  ;;  %v3413_v18 = vrot.slane %v9122_v36, 2  ;;  %v8557_v63 = vld [vmem:[%s10379_s1 + $0xb0] sm:$0xff]   ;;  %v9313_v16 = vld [vmem:[%s8719_s6 + $0x40] sm:$0xff] }
  0xb1   : > { %7306 = vmatmul.mubr.bf16.gmra.mrb[52].mxu1 %v725_v31  ;;  %v8549_v31 = vld [vmem:[%s10379_s1 + $0x90] sm:$0xff]  }
  0xb2   : > { %7674 = vmatmul.mubr.bf16.gmra.mrb[20].mxu0 %v9184_v33  ;;  %7309 = vmatprep.mubr.bf16.mxu1 %v733_v37  ;;  %v9251_v37 = vsel %vm3363_vm2, %v3401_v20, %v3403_v53  ;;  %v3415_v20 = vrot.slane %v9127_v42, 2 }
  0xb3   : > { %7677 = vmatprep.mubr.bf16.mxu0 %v9190_v41 }
  0xb9   : > { %7310 = vmatmul.mubr.bf16.gmra.mrb[56].mxu1 %v741_v51  ;;  %v8555_v51 = vld [vmem:[%s10379_s1 + $0xa8] sm:$0xff]  }
  0xba   : > { %7678 = vmatmul.mubr.bf16.gmra.mrb[24].mxu0 %v9203_v56  ;;  %7313 = vmatprep.mubr.bf16.mxu1 %v749_v58  ;;  %v3411_v58 = vrot.slane %v9105_v19, 2 }
  0xbb   : > { %7681 = vmatprep.mubr.bf16.mxu0 %v9207_v2 }
  0xbc   : > { %v9299_v1 = vsel %vm3363_vm2, %v3409_v43, %v3411_v58  ;;  %v9302_v3 = vsel %vm3363_vm2, %v3411_v58, %v3413_v18 }
  0xc1   : > { %7314 = vmatmul.mubr.bf16.gmra.mrb[60].mxu1 %v757_v5  ;;  %v8559_v5 = vld [vmem:[%s10379_s1 + $0xb8] sm:$0xff]  }
  0xc2   : > { %7682 = vmatmul.mubr.bf16.gmra.mrb[28].mxu0 %v9215_v7  ;;  %7333 = vmatprep.mubr.bf16.mxu1 %v8581_v14  ;;  %v9308_v14 = vld [vmem:[%s8719_s6 + $0x38] sm:$0xff] }
  0xc3   : > { %7685 = vmatprep.mubr.bf16.mxu0 %v9218_v12 }
  0xc9   : > { %7334 = vmatmul.mubr.bf16.vlgmr.msra.gmra.mrb[0].mxu1 %v9235_v28 }
  0xca   : > { %7686 = vmatmul.mubr.bf16.gmra.mrb[32].mxu0 %v9226_v22  ;;  %7398 = vmatpush3.bf16.msra.mxu1 %v9004_v13  ;;  %v9254_v13 = vsel %vm3363_vm2, %v3403_v53, %v3405_v32  ;;  %v9322_v53 = vld [vmem:[%s10379_s1 + $0xc0] sm:$0xff]  }
  0xcb   : > { %7337 = vmatprep.mubr.bf16.mxu1 %v9241_v46  ;;  %7689 = vmatprep.mubr.bf16.mxu0 %v9229_v26 }
  0xcc   : > { %7399 = vmatprep.subr.bf16.mxu1 %v8547_v39 }
  0xce   : > { %7400 = vmatpush3.bf16.msra.mxu1 %v8547_v39  ;;  %v3417_v39 = vrot.slane %v9144_v60, 2 }
  0xcf   : > { %7401 = vmatprep.subr.bf16.mxu1 %v8549_v31 }
  0xd0   : > { %v9328_v32 = vsel %vm3363_vm2, %v3415_v20, %v3417_v39 }
  0xd1   : > { %7338 = vmatmul.mubr.bf16.gmra.mrb[4].mxu1 %v9260_v40 }
  0xd2   : > { %7690 = vmatmul.mubr.bf16.gmra.mrb[36].mxu0 %v9251_v37  ;;  %7341 = vmatprep.mubr.bf16.mxu1 %v9265_v61 }
  0xd3   : > { %7693 = vmatprep.mubr.bf16.mxu0 %v9254_v13  ;;  %7402 = vmatpush3.bf16.msra.mxu1 %v8549_v31  ;;  %v9325_v31 = vsel %vm3363_vm2, %v3413_v18, %v3415_v20  ;;  %v2595_v18 = vld [vmem:[%s8719_s6 + $0x108] sm:$0x3] }
  0xd4   : > { %7403 = vmatprep.subr.bf16.mxu1 %v8551_v38 }
  0xd7   : > { %7404 = vmatpush3.bf16.msra.mxu1 %v8551_v38  ;;  %v3419_v38 = vrot.slane %v9151_v21, 2 }
  0xd8   : > { %7405 = vmatprep.subr.bf16.mxu1 %v8553_v44 }
  0xd9   : > { %7342 = vmatmul.mubr.bf16.gmra.mrb[8].mxu1 %v9284_v52  ;;  %v9338_v43 = vsel %vm3363_vm2, %v3417_v39, %v3419_v38 }
  0xda   : > { %7694 = vmatmul.mubr.bf16.gmra.mrb[40].mxu0 %v9275_v45  ;;  %7345 = vmatprep.mubr.bf16.mxu1 %v9289_v54 }
  0xdb   : > { %7697 = vmatprep.mubr.bf16.mxu0 %v9278_v49  ;;  %7406 = vmatpush3.bf16.msra.mxu1 %v8553_v44  ;;  %v9341_v44 = vsel %vm3363_vm2, %v3419_v38, %v3421_v6 }
  0xdc   : > { %7407 = vmatprep.subr.bf16.mxu1 %v8555_v51 }
  0xdf   : > { %7408 = vmatpush3.bf16.msra.mxu1 %v8555_v51 }
  0xe0   : > { %7409 = vmatprep.subr.bf16.mxu1 %v8557_v63 }
  0xe1   : > { %7346 = vmatmul.mubr.bf16.gmra.mrb[12].mxu1 %v9308_v14 }
  0xe2   : > { %7698 = vmatmul.mubr.bf16.gmra.mrb[44].mxu0 %v9299_v1  ;;  %7349 = vmatprep.mubr.bf16.mxu1 %v9313_v16 }
  0xe3   : > { %7701 = vmatprep.mubr.bf16.mxu0 %v9302_v3  ;;  %7410 = vmatpush3.bf16.msra.mxu1 %v8557_v63  ;;  %v9367_v63 = vld [vmem:[%s8719_s6 + $0x18] sm:$0xff] }
  0xe4   : > { %7411 = vmatprep.subr.bf16.mxu1 %v8559_v5  ;;  %v3946_v39 = vrot.slane %v9367_v63, 2 }
  0xe7   : > { %7412 = vmatpush3.bf16.msra.mxu1 %v8559_v5  ;;  %v3427_v5 = vrot.slane %v2595_v18, 2 }
  0xe8   : > { %7477 = vmatprep.subr.bf16.mxu1 %v9322_v53 }
  0xe9   : > { %7350 = vmatmul.mubr.bf16.gmra.mrb[16].mxu1 %v8911_v4  ;;  %v9345_v4 = vld [vmem:[%s8719_s6 + $0x100] sm:$0xff] }
  0xea   : > { %7702 = vmatmul.mubr.bf16.gmra.mrb[48].mxu0 %v9325_v31  ;;  %7353 = vmatprep.mubr.bf16.mxu1 %v8917_v8  ;;  %10419 = vst [vmem:[#allocation9_spill] sm:$0xff] %v9345_v4  ;;  %v3423_v8 = vrot.slane %v9178_v29, 2  ;;  %v9352_v51 = vrot.slane %v9345_v4, 2 }
  0xeb   : > { %7705 = vmatprep.mubr.bf16.mxu0 %v9328_v32 }
  0xec   : > { %v9355_v58 = vsel %vm3363_vm2, %v3421_v6, %v3423_v8  ;;  %v9378_v6 = vld [vmem:[%s8719_s6 + $0x20] sm:$0xff] }
  0xf1   : > { %7354 = vmatmul.mubr.bf16.gmra.mrb[20].mxu1 %v8938_v24  ;;  %v9359_v24 = vsel %vm3363_vm2, %v3423_v8, %v9352_v51  ;;  %v9382_v8 = vld [vmem:[%s8719_s6 + $0x28] sm:$0xff] }
  0xf2   : > { %7706 = vmatmul.mubr.bf16.gmra.mrb[52].mxu0 %v9338_v43  ;;  %7357 = vmatprep.mubr.bf16.mxu1 %v8951_v34  ;;  %v9364_v34 = vld [vmem:[%s8719_s6 + $0x10] sm:$0xfc]  ;;  %v3950_v18 = vrot.slane %v9382_v8, 2 }
  0xf3   : > { %7709 = vmatprep.mubr.bf16.mxu0 %v9341_v44  ;;  %v3945_v20 = vrot.slane %v9364_v34, 2 }
  0xf5   : > { %v3947_v38 = vsel %vm3363_vm2, %v3945_v20, %v3946_v39  ;;  %v9390_v20 = vld [vmem:[%s8719_s6 + $0x30] sm:$0xff] }
  0xf9   : > { %7358 = vmatmul.mubr.bf16.gmra.mrb[24].mxu1 %v8974_v55  ;;  %v3428_v55 = vsel %vm3363_vm2, %v9352_v51, %v3427_v5 }
  0xfa   : > { %7710 = vmatmul.mubr.bf16.gmra.mrb[56].mxu0 %v9355_v58  ;;  %7361 = vmatprep.mubr.bf16.mxu1 %v8980_v59  ;;  %v3948_v59 = vrot.slane %v9378_v6, 2 }
  0xfb   : > { %7713 = vmatprep.mubr.bf16.mxu0 %v9359_v24 }
  0xfc   : > { %v3949_v11 = vsel %vm3363_vm2, %v3946_v39, %v3948_v59  ;;  %v3951_v5 = vsel %vm3363_vm2, %v3948_v59, %v3950_v18 }
 0x101   : > { %7362 = vmatmul.mubr.bf16.gmra.mrb[28].mxu1 %v9011_v25  ;;  %v8556_v25 = vld [vmem:[%s10379_s1 + $0x1c8] sm:$0xff]  }
 0x102   : > { %7714 = vmatmul.mubr.bf16.gmra.mrb[60].mxu0 %v3428_v55  ;;  %7365 = vmatprep.mubr.bf16.mxu1 %v9015_v27  ;;  %v9397_v55 = vld [vmem:[%s8719_s6 + $0x38] sm:$0xff]  ;;  %v3952_v27 = vrot.slane %v9390_v20, 2 }
 0x103   : > { %7733 = vmatprep.mubr.bf16.mxu0 %v3947_v38  ;;  %10420 = vst [vmem:[#allocation10_spill] sm:$0xff] %v9397_v55  ;;  %v3954_v39 = vrot.slane %v9397_v55, 2  ;;  %v8558_v38 = vld [vmem:[%s10379_s1 + $0x1d0] sm:$0xff]  }
 0x104   : > { %v9427_v55 = vld [vmem:[%s8719_s6 + $0x50] sm:$0xff] }
 0x105   : > { %v3955_v59 = vsel %vm3363_vm2, %v3952_v27, %v3954_v39 }
 0x109   : > { %7366 = vmatmul.mubr.bf16.gmra.mrb[32].mxu1 %v9031_v48  ;;  %v3953_v48 = vsel %vm3363_vm2, %v3950_v18, %v3952_v27  ;;  %v8562_v27 = vld [vmem:[%s10379_s1 + $0x1e0] sm:$0xff]  }
 0x10a   : > { %7734 = vmatmul.mubr.bf16.vlgmr.msra.gmra.mrb[0].mxu0 %v3949_v11  ;;  %7369 = vmatprep.mubr.bf16.mxu1 %v9041_v10  ;;  %v9409_v11 = vld [vmem:[%s8719_s6 + $0x40] sm:$0xff] }
 0x10b   : > { %7798 = vmatpush3.bf16.msra.mxu0 %v9156_v0  ;;  %7737 = vmatprep.mubr.bf16.mxu0 %v3951_v5  ;;  %v8560_v0 = vld [vmem:[%s10379_s1 + $0x1d8] sm:$0xff]   ;;  %v9416_v5 = vld [vmem:[%s8719_s6 + $0x48] sm:$0xff]  ;;  %v3956_v18 = vrot.slane %v9409_v11, 2 }
 0x10c   : > { %7799 = vmatprep.subr.bf16.mxu0 %v8556_v25 }
 0x10d   : > { %v3957_v4 = vsel %vm3363_vm2, %v3954_v39, %v3956_v18  ;;  %v8566_v39 = vld [vmem:[%s10379_s1 + $0x1f0] sm:$0xff]  }
 0x10f   : > { %7800 = vmatpush3.bf16.msra.mxu0 %v8556_v25  ;;  %v3958_v25 = vrot.slane %v9416_v5, 2 }
 0x110   : > { %7801 = vmatprep.subr.bf16.mxu0 %v8558_v38 }
 0x111   : > { %7370 = vmatmul.mubr.bf16.gmra.mrb[36].mxu1 %v9046_v15  ;;  %v3959_v47 = vsel %vm3363_vm2, %v3956_v18, %v3958_v25 }
 0x112   : > { %7738 = vmatmul.mubr.bf16.gmra.mrb[4].mxu0 %v3953_v48  ;;  %7373 = vmatprep.mubr.bf16.mxu1 %v9058_v30  ;;  %v8564_v48 = vld [vmem:[%s10379_s1 + $0x1e8] sm:$0xff]  }
 0x113   : > { %7741 = vmatprep.mubr.bf16.mxu0 %v3955_v59  ;;  %7802 = vmatpush3.bf16.msra.mxu0 %v8558_v38  ;;  %v3960_v38 = vrot.slane %v9427_v55, 2 }
 0x114   : > { %7803 = vmatprep.subr.bf16.mxu0 %v8560_v0 }
 0x115   : > { %v3961_v59 = vsel %vm3363_vm2, %v3958_v25, %v3960_v38 }
 0x117   : > { %7804 = vmatpush3.bf16.msra.mxu0 %v8560_v0  ;;  %v3963_v0 = vsel %vm3363_vm2, %v3960_v38, %v9147_v62  ;;  %v1464_v62 = vld [vmem:[%s8719_s6] sm:$0xfe] }
 0x118   : > { %7805 = vmatprep.subr.bf16.mxu0 %v8562_v27 }
 0x119   : > { %7374 = vmatmul.mubr.bf16.gmra.mrb[40].mxu1 %v9063_v35 }
 0x11a   : > { %7742 = vmatmul.mubr.bf16.gmra.mrb[8].mxu0 %v3957_v4  ;;  %7377 = vmatprep.mubr.bf16.mxu1 %v9077_v50  ;;  %v8568_v4 = vld [vmem:[%s10379_s1 + $0x1f8] sm:$0xff]  }
 0x11b   : > { %7745 = vmatprep.mubr.bf16.mxu0 %v3959_v47  ;;  %7806 = vmatpush3.bf16.msra.mxu0 %v8562_v27  ;;  %v9449_v47 = vld [vmem:[%s10379_s1 + $0x200] sm:$0xff]  }
 0x11c   : > { %7807 = vmatprep.subr.bf16.mxu0 %v8564_v48 }
 0x11f   : > { %7808 = vmatpush3.bf16.msra.mxu0 %v8564_v48  ;;  %v8573_v48 = vld [vmem:[%s10379_s1 + $0xf0] sm:$0xff]  }
 0x120   : > { %7809 = vmatprep.subr.bf16.mxu0 %v8566_v39 }
 0x121   : > { %7378 = vmatmul.mubr.bf16.gmra.mrb[44].mxu1 %v9083_v57 }
 0x122   : > { %7746 = vmatmul.mubr.bf16.gmra.mrb[12].mxu0 %v3961_v59  ;;  %7381 = vmatprep.mubr.bf16.mxu1 %v9100_v9  ;;  %v9543_v59 = vld [vmem:[%s8719_s6 + $0x58] sm:$0xff] }
 0x123   : > { %7749 = vmatprep.mubr.bf16.mxu0 %v3963_v0  ;;  %7810 = vmatpush3.bf16.msra.mxu0 %v8566_v39  ;;  %v1537_v0 = vrot.slane %v9543_v59, 1 }
 0x124   : > { %7811 = vmatprep.subr.bf16.mxu0 %v8568_v4 }
 0x127   : > { %7812 = vmatpush3.bf16.msra.mxu0 %v8568_v4 }
 0x128   : > { %7877 = vmatprep.subr.bf16.mxu0 %v9449_v47 }
 0x129   : > { %7382 = vmatmul.mubr.bf16.gmra.mrb[48].mxu1 %v9105_v19 }
 0x12a   : > { %7750 = vmatmul.mubr.bf16.gmra.mrb[16].mxu0 %v9168_v17  ;;  %7385 = vmatprep.mubr.bf16.mxu1 %v9122_v36  ;;  %v1516_v17 = vrot.slane %v1464_v62, 1  ;;  %v9555_v62 = vld [vmem:[%s10379_s1 + $0x100] sm:$0xff]  }
 0x12b   : > { %7753 = vmatprep.mubr.bf16.mxu0 %v9184_v33  ;;  %v1517_v33 = vrot.slane %v9235_v28, 1  ;;  %v8563_v28 = vld [vmem:[%s10379_s1 + $0xc8] sm:$0xff]  }
 0x12d   : > { %v1518_v18 = vsel %vm1515_vm3, %v1516_v17, %v1517_v33 }
 0x131   : > { %7386 = vmatmul.mubr.bf16.gmra.mrb[52].mxu1 %v9127_v42 }
 0x132   : > { %7754 = vmatmul.mubr.bf16.gmra.mrb[20].mxu0 %v9190_v41  ;;  %7389 = vmatprep.mubr.bf16.mxu1 %v9144_v60  ;;  %v9470_v41 = vrot.slane %v9241_v46, 1  ;;  %v8565_v46 = vld [vmem:[%s10379_s1 + $0xd0] sm:$0xff]  }
 0x133   : > { %7757 = vmatprep.mubr.bf16.mxu0 %v9203_v56  ;;  %v1521_v56 = vrot.slane %v9260_v40, 1 }
 0x139   : > { %7390 = vmatmul.mubr.bf16.gmra.mrb[56].mxu1 %v9151_v21 }
 0x13a   : > { %7758 = vmatmul.mubr.bf16.gmra.mrb[24].mxu0 %v9207_v2  ;;  %7393 = vmatprep.mubr.bf16.mxu1 %v9172_v23  ;;  %v1520_v2 = vsel %vm1515_vm3, %v1517_v33, %v9470_v41  ;;  %v9567_v33 = vld [vmem:[%s8719_s6 + $0x68] sm:$0xff] }
 0x13b   : > { %7761 = vmatprep.mubr.bf16.mxu0 %v9215_v7  ;;  %v9478_v7 = vsel %vm1515_vm3, %v9470_v41, %v1521_v56 }
 0x141   : > { %7394 = vmatmul.mubr.bf16.gmra.mrb[60].mxu1 %v9178_v29 }
 0x142   : > { %7762 = vmatmul.mubr.bf16.gmra.mrb[28].mxu0 %v9218_v12  ;;  %7413 = vmatprep.mubr.bf16.mxu1 %v1518_v18  ;;  %v1523_v12 = vrot.slane %v9265_v61, 1  ;;  %v8567_v61 = vld [vmem:[%s10379_s1 + $0xd8] sm:$0xff]   ;;  %v1541_v18 = vrot.slane %v9567_v33, 1 }
 0x143   : > { %7765 = vmatprep.mubr.bf16.mxu0 %v9226_v22  ;;  %v1525_v22 = vrot.slane %v9284_v52, 1  ;;  %v1529_v52 = vrot.slane %v9308_v14, 1  ;;  %v8590_v14 = vld [vmem:[%s8719_s6 + $0x48] sm:$0xff] }
 0x144   : > { %v9493_v40 = vsel %vm1515_vm3, %v1521_v56, %v1523_v12  ;;  %v1533_v27 = vrot.slane %v8590_v14, 1 }
 0x149   : > { %7414 = vmatmul.mubr.bf16.vlgmr.msra.gmra.mrb[0].mxu1 %v1520_v2 }
 0x14a   : > { %7766 = vmatmul.mubr.bf16.gmra.mrb[32].mxu0 %v9229_v26  ;;  %7478 = vmatpush3.bf16.msra.mxu1 %v9322_v53  ;;  %v9496_v26 = vsel %vm1515_vm3, %v1523_v12, %v1525_v22  ;;  %v8569_v53 = vld [vmem:[%s10379_s1 + $0xe0] sm:$0xff]   ;;  %v9588_v12 = vld [vmem:[%s8719_s6 + $0x78] sm:$0xff] }
 0x14b   : > { %7417 = vmatprep.mubr.bf16.mxu1 %v9478_v7  ;;  %7769 = vmatprep.mubr.bf16.mxu0 %v9251_v37  ;;  %v1527_v37 = vrot.slane %v9289_v54, 1  ;;  %v1531_v54 = vrot.slane %v9313_v16, 1  ;;  %v8591_v16 = vld [vmem:[%s8719_s6 + $0x50] sm:$0xff] }
 0x14c   : > { %7479 = vmatprep.subr.bf16.mxu1 %v8563_v28  ;;  %v1535_v39 = vrot.slane %v8591_v16, 1 }
 0x14d   : > { %v9511_v25 = vsel %vm1515_vm3, %v1525_v22, %v1527_v37  ;;  %v9529_v38 = vsel %vm1515_vm3, %v1529_v52, %v1531_v54  ;;  %v1545_v22 = vrot.slane %v9588_v12, 1 }
 0x14e   : > { %7480 = vmatpush3.bf16.msra.mxu1 %v8563_v28  ;;  %v9547_v4 = vsel %vm1515_vm3, %v1533_v27, %v1535_v39 }
 0x14f   : > { %7481 = vmatprep.subr.bf16.mxu1 %v8565_v46 }
 0x151   : > { %7418 = vmatmul.mubr.bf16.gmra.mrb[4].mxu1 %v9493_v40 }
 0x152   : > { %7770 = vmatmul.mubr.bf16.gmra.mrb[36].mxu0 %v9254_v13  ;;  %7421 = vmatprep.mubr.bf16.mxu1 %v9496_v26  ;;  %v9514_v13 = vsel %vm1515_vm3, %v1527_v37, %v1529_v52  ;;  %v4466_v37 = vshll.u32 %v9364_v34, 16  ;;  %v4474_v52 = vshll.u32 %v9367_v63, 16 }
 0x153   : > { %7773 = vmatprep.mubr.bf16.mxu0 %v9275_v45  ;;  %7482 = vmatpush3.bf16.msra.mxu1 %v8565_v46  ;;  %v8571_v45 = vld [vmem:[%s10379_s1 + $0xe8] sm:$0xff]  }
 0x154   : > { %7483 = vmatprep.subr.bf16.mxu1 %v8567_v61 }
 0x157   : > { %7484 = vmatpush3.bf16.msra.mxu1 %v8567_v61  ;;  %v4463_v61 = vshrl.u32 %v9364_v34, 16  ;;  %v9609_v34 = vld [vmem:[%s8719_s6 + $0x80] sm:$0xff] }
 0x158   : > { %7485 = vmatprep.subr.bf16.mxu1 %v8569_v53 }
 0x159   : > { %7422 = vmatmul.mubr.bf16.gmra.mrb[8].mxu1 %v9511_v25  ;;  %v4465_v14 = vrot.slane %v4463_v61, 2  ;;  %v4492_v61 = vshll.u32 %v9382_v8, 16 }
 0x15a   : > { %7774 = vmatmul.mubr.bf16.gmra.mrb[40].mxu0 %v9278_v49  ;;  %7425 = vmatprep.mubr.bf16.mxu1 %v9514_v13  ;;  %v9532_v49 = vsel %vm1515_vm3, %v1531_v54, %v1533_v27  ;;  %v3894_v54 = vld [vmem:[%s8719_s6 + $0x110] sm:$0x3]  ;;  %v4468_v27 = vrot.slane %v4466_v37, 3 }
 0x15b   : > { %7777 = vmatprep.mubr.bf16.mxu0 %v9299_v1  ;;  %7486 = vmatpush3.bf16.msra.mxu1 %v8569_v53  ;;  %v8575_v1 = vld [vmem:[%s10379_s1 + $0xf8] sm:$0xff]   ;;  %v4008_v16 = vrot.slane %v3894_v54, 2 }
 0x15c   : > { %7487 = vmatprep.subr.bf16.mxu1 %v8571_v45 }
 0x15f   : > { %7488 = vmatpush3.bf16.msra.mxu1 %v8571_v45 }
 0x160   : > { %7489 = vmatprep.subr.bf16.mxu1 %v8573_v48 }
 0x161   : > { %7426 = vmatmul.mubr.bf16.gmra.mrb[12].mxu1 %v9529_v38 }
 0x162   : > { %7778 = vmatmul.mubr.bf16.gmra.mrb[44].mxu0 %v9302_v3  ;;  %7429 = vmatprep.mubr.bf16.mxu1 %v9532_v49  ;;  %v9550_v3 = vsel %vm1515_vm3, %v1535_v39, %v1537_v0  ;;  %v9613_v39 = vld [vmem:[%s8719_s6 + $0x88] sm:$0xff] }
 0x163   : > { %7781 = vmatprep.mubr.bf16.mxu0 %v9325_v31  ;;  %7490 = vmatpush3.bf16.msra.mxu1 %v8573_v48  ;;  %v9562_v31 = vld [vmem:[%s8719_s6 + $0x60] sm:$0xff] }
 0x164   : > { %7491 = vmatprep.subr.bf16.mxu1 %v8575_v1  ;;  %v1539_v17 = vrot.slane %v9562_v31, 1 }
 0x166   : > { %v9571_v56 = vsel %vm1515_vm3, %v1537_v0, %v1539_v17  ;;  %v9574_v2 = vsel %vm1515_vm3, %v1539_v17, %v1541_v18  ;;  %v4480_v0 = vshrl.u32 %v9378_v6, 16  ;;  %v4483_v17 = vshll.u32 %v9378_v6, 16 }
 0x167   : > { %7492 = vmatpush3.bf16.msra.mxu1 %v8575_v1  ;;  %v4476_v1 = vrot.slane %v4474_v52, 3 }
 0x168   : > { %7957 = vmatprep.subr.bf16.mxu1 %v9555_v62  ;;  %v4485_v54 = vrot.slane %v4483_v17, 3 }
 0x169   : > { %7430 = vmatmul.mubr.bf16.gmra.mrb[16].mxu1 %v9547_v4 }
 0x16a   : > { %7782 = vmatmul.mubr.bf16.gmra.mrb[48].mxu0 %v9328_v32  ;;  %7433 = vmatprep.mubr.bf16.mxu1 %v9550_v3  ;;  %v9577_v32 = vld [vmem:[%s8719_s6 + $0x108] sm:$0xff] }
 0x16b   : > { %7785 = vmatprep.mubr.bf16.mxu0 %v9338_v43  ;;  %v9583_v43 = vld [vmem:[%s8719_s6 + $0x70] sm:$0xff]  ;;  %v4006_v46 = vrot.slane %v9577_v32, 2 }
 0x16c   : > { %v1543_v28 = vrot.slane %v9583_v43, 1 }
 0x16d   : > { %v4007_v45 = vsel %vm3363_vm2, %v9352_v51, %v4006_v46  ;;  %v1549_v51 = vrot.slane %v9613_v39, 1 }
 0x16e   : > { %v9597_v53 = vsel %vm1515_vm3, %v1541_v18, %v1543_v28  ;;  %v4469_v18 = vor.u32 %v4468_v27, %v4465_v14  ;;  %v4494_v14 = vrot.slane %v4492_v61, 3  ;;  %v4498_v27 = vshrl.u32 %v9390_v20, 16 }
 0x171   : > { %7434 = vmatmul.mubr.bf16.gmra.mrb[20].mxu1 %v9571_v56 }
 0x172   : > { %7786 = vmatmul.mubr.bf16.gmra.mrb[52].mxu0 %v9341_v44  ;;  %7437 = vmatprep.mubr.bf16.mxu1 %v9574_v2  ;;  %v4471_v44 = vshrl.u32 %v9367_v63, 16  ;;  %v1547_v63 = vrot.slane %v9609_v34, 1 }
 0x173   : > { %7789 = vmatprep.mubr.bf16.mxu0 %v9355_v58  ;;  %v9600_v58 = vsel %vm1515_vm3, %v1543_v28, %v1545_v22 }
 0x174   : > { %10421 = vst [vmem:[#allocation11_spill] sm:$0xff] %v9600_v58  ;;  %v4473_v48 = vrot.slane %v4471_v44, 2  ;;  %v9621_v37 = vsel %vm1515_vm3, %v1545_v22, %v1547_v63  ;;  %v4009_v44 = vsel %vm3363_vm2, %v4006_v46, %v4008_v16  ;;  %v9625_v52 = vsel %vm1515_vm3, %v1547_v63, %v1549_v51  ;;  %v10422_v63 = vld [vmem:[#allocation10_spill] sm:$0xff] }
 0x175   : > { %v1553_v46 = vrot.slane %v9046_v15, 1  ;;  %v4507_v16 = vshrl.u32 %v10422_v63, 16 }
 0x176   : > { %v4477_v28 = vor.u32 %v4476_v1, %v4473_v48  ;;  %v4501_v48 = vshll.u32 %v9390_v20, 16  ;;  %v8572_v20 = vld [vmem:[%s10379_s1 + $0x208] sm:$0xff]  }
 0x177   : > { %v4509_v61 = vrot.slane %v4507_v16, 2 }
 0x179   : > { %7438 = vmatmul.mubr.bf16.gmra.mrb[24].mxu1 %v9597_v53 }
 0x17a   : > { %7790 = vmatmul.mubr.bf16.gmra.mrb[56].mxu0 %v9359_v24  ;;  %7441 = vmatprep.mubr.bf16.mxu1 %v9600_v58  ;;  %v4489_v24 = vshrl.u32 %v9382_v8, 16  ;;  %v4478_v58 = vsel %vm4461_vm4, %v4469_v18, %v4477_v28  ;;  %v1551_v8 = vrot.slane %v9041_v10, 1 }
 0x17b   : > { %7793 = vmatprep.mubr.bf16.mxu0 %v4007_v45  ;;  %v4482_v45 = vrot.slane %v4480_v0, 2  ;;  %v4510_v0 = vshll.u32 %v10422_v63, 16 }
 0x17c   : > { %v4491_v6 = vrot.slane %v4489_v24, 2  ;;  %v9637_v17 = vsel %vm1515_vm3, %v1549_v51, %v1551_v8  ;;  %v9641_v10 = vsel %vm1515_vm3, %v1551_v8, %v1553_v46  ;;  %v4503_v24 = vrot.slane %v4501_v48, 3 }
 0x17d   : > { %v4486_v22 = vor.u32 %v4485_v54, %v4482_v45  ;;  %v1555_v51 = vrot.slane %v9058_v30, 1  ;;  %v1557_v45 = vrot.slane %v9063_v35, 1  ;;  %v4516_v54 = vshrl.u32 %v9409_v11, 16  ;;  %v8574_v30 = vld [vmem:[%s10379_s1 + $0x210] sm:$0xff]  }
 0x17e   : > { %v4495_v1 = vor.u32 %v4494_v14, %v4491_v6  ;;  %v4519_v6 = vshll.u32 %v9409_v11, 16  ;;  %v4525_v8 = vshrl.u32 %v9416_v5, 16 }
 0x17f   : > { %v4487_v18 = vsel %vm4461_vm4, %v4477_v28, %v4486_v22  ;;  %v9664_v35 = vsel %vm1515_vm3, %v1555_v51, %v1557_v45  ;;  %v4518_v48 = vrot.slane %v4516_v54, 2 }
 0x180   : > { %v4496_v15 = vsel %vm4461_vm4, %v4486_v22, %v4495_v1  ;;  %v4528_v22 = vshll.u32 %v9416_v5, 16  ;;  %v4521_v63 = vrot.slane %v4519_v6, 3 }
 0x181   : > { %7442 = vmatmul.mubr.bf16.gmra.mrb[28].mxu1 %v9621_v37 }
 0x182   : > { %7794 = vmatmul.mubr.bf16.gmra.mrb[60].mxu0 %v4009_v44  ;;  %7445 = vmatprep.mubr.bf16.mxu1 %v9625_v52  ;;  %v4512_v44 = vrot.slane %v4510_v0, 3  ;;  %v4527_v0 = vrot.slane %v4525_v8, 2 }
 0x183   : > { %7813 = vmatprep.mubr.bf16.mxu0 %v4478_v58  ;;  %v4500_v58 = vrot.slane %v4498_v27, 2 }
 0x184   : > { %v4513_v14 = vor.u32 %v4512_v44, %v4509_v61  ;;  %v4537_v61 = vshll.u32 %v9427_v55, 16 }
 0x185   : > { %v4504_v28 = vor.u32 %v4503_v24, %v4500_v58  ;;  %v8576_v58 = vld [vmem:[%s10379_s1 + $0x218] sm:$0xff]   ;;  %v1561_v24 = vrot.slane %v9083_v57, 1 }
 0x186   : > { %v4539_v8 = vrot.slane %v4537_v61, 3 }
 0x187   : > { %v4505_v27 = vsel %vm4461_vm4, %v4495_v1, %v4504_v28  ;;  %v4514_v16 = vsel %vm4461_vm4, %v4504_v28, %v4513_v14  ;;  %v4522_v1 = vor.u32 %v4521_v63, %v4518_v48  ;;  %v8577_v28 = vld [vmem:[%s10379_s1 + $0x220] sm:$0xff]   ;;  %v8578_v48 = vld [vmem:[%s10379_s1 + $0x228] sm:$0xff]   ;;  %v1565_v63 = vrot.slane %v9105_v19, 1 }
 0x189   : > { %7446 = vmatmul.mubr.bf16.gmra.mrb[32].mxu1 %v9637_v17  ;;  %v4523_v57 = vsel %vm4461_vm4, %v4513_v14, %v4522_v1 }
 0x18a   : > { %7814 = vmatmul.mubr.bf16.vlgmr.msra.gmra.mrb[0].mxu0 %v4487_v18  ;;  %7449 = vmatprep.mubr.bf16.mxu1 %v9641_v10  ;;  %v4530_v18 = vrot.slane %v4528_v22, 3 }
 0x18b   : > { %7878 = vmatpush3.bf16.msra.mxu0 %v9449_v47  ;;  %7817 = vmatprep.mubr.bf16.mxu0 %v4496_v15  ;;  %v9660_v47 = vsel %vm1515_vm3, %v1553_v46, %v1555_v51  ;;  %v1559_v46 = vrot.slane %v9077_v50, 1  ;;  %v4534_v15 = vshrl.u32 %v9427_v55, 16  ;;  %v4546_v51 = vshll.u32 %v9543_v59, 16 }
 0x18c   : > { %7879 = vmatprep.subr.bf16.mxu0 %v8572_v20  ;;  %v4531_v44 = vor.u32 %v4530_v18, %v4527_v0  ;;  %v4555_v0 = vshll.u32 %v9562_v31, 16 }
 0x18d   : > { %v9682_v50 = vsel %vm1515_vm3, %v1557_v45, %v1559_v46  ;;  %v9686_v54 = vsel %vm1515_vm3, %v1559_v46, %v1561_v24  ;;  %v4536_v6 = vrot.slane %v4534_v15, 2  ;;  %v1563_v45 = vrot.slane %v9100_v9, 1 }
 0x18e   : > { %v4532_v22 = vsel %vm4461_vm4, %v4522_v1, %v4531_v44  ;;  %v4564_v46 = vshll.u32 %v9567_v33, 16  ;;  %v8579_v1 = vld [vmem:[%s10379_s1 + $0x230] sm:$0xff]  }
 0x18f   : > { %7880 = vmatpush3.bf16.msra.mxu0 %v8572_v20  ;;  %v4543_v20 = vshrl.u32 %v9543_v59, 16  ;;  %v4540_v14 = vor.u32 %v4539_v8, %v4536_v6  ;;  %v9704_v9 = vsel %vm1515_vm3, %v1561_v24, %v1563_v45  ;;  %v9708_v15 = vsel %vm1515_vm3, %v1563_v45, %v1565_v63  ;;  %v8580_v6 = vld [vmem:[%s10379_s1 + $0x238] sm:$0xff]  }
 0x190   : > { %7881 = vmatprep.subr.bf16.mxu0 %v8574_v30  ;;  %v1567_v24 = vrot.slane %v9122_v36, 1  ;;  %v1569_v8 = vrot.slane %v9127_v42, 1  ;;  %v4582_v45 = vshll.u32 %v9588_v12, 16 }
 0x191   : > { %7450 = vmatmul.mubr.bf16.gmra.mrb[36].mxu1 %v9660_v47  ;;  %v4541_v19 = vsel %vm4461_vm4, %v4531_v44, %v4540_v14 }
 0x192   : > { %7818 = vmatmul.mubr.bf16.gmra.mrb[4].mxu0 %v4505_v27  ;;  %7453 = vmatprep.mubr.bf16.mxu1 %v9664_v35  ;;  %v4548_v27 = vrot.slane %v4546_v51, 3 }
 0x193   : > { %7821 = vmatprep.mubr.bf16.mxu0 %v4514_v16  ;;  %7882 = vmatpush3.bf16.msra.mxu0 %v8574_v30  ;;  %v4545_v30 = vrot.slane %v4543_v20, 2  ;;  %v4552_v16 = vshrl.u32 %v9562_v31, 16  ;;  %v4557_v20 = vrot.slane %v4555_v0, 3 }
 0x194   : > { %7883 = vmatprep.subr.bf16.mxu0 %v8576_v58 }
 0x195   : > { %v4549_v18 = vor.u32 %v4548_v27, %v4545_v30  ;;  %v4554_v61 = vrot.slane %v4552_v16, 2  ;;  %v4573_v30 = vshll.u32 %v9583_v43, 16  ;;  %v9727_v16 = vsel %vm1515_vm3, %v1567_v24, %v1569_v8 }
 0x197   : > { %7884 = vmatpush3.bf16.msra.mxu0 %v8576_v58  ;;  %v4561_v58 = vshrl.u32 %v9567_v33, 16  ;;  %v4550_v51 = vsel %vm4461_vm4, %v4540_v14, %v4549_v18  ;;  %v4558_v44 = vor.u32 %v4557_v20, %v4554_v61  ;;  %v9723_v14 = vsel %vm1515_vm3, %v1565_v63, %v1567_v24 }
 0x198   : > { %7885 = vmatprep.subr.bf16.mxu0 %v8577_v28  ;;  %v4575_v0 = vrot.slane %v4573_v30, 3  ;;  %v1571_v63 = vrot.slane %v9144_v60, 1  ;;  %v4588_v61 = vshrl.u32 %v9609_v34, 16  ;;  %v4591_v20 = vshll.u32 %v9609_v34, 16 }
 0x199   : > { %7454 = vmatmul.mubr.bf16.gmra.mrb[40].mxu1 %v9682_v50  ;;  %v4559_v36 = vsel %vm4461_vm4, %v4549_v18, %v4558_v44  ;;  %v1573_v18 = vrot.slane %v9151_v21, 1 }
 0x19a   : > { %7822 = vmatmul.mubr.bf16.gmra.mrb[8].mxu0 %v4523_v57  ;;  %7457 = vmatprep.mubr.bf16.mxu1 %v9686_v54  ;;  %v4566_v57 = vrot.slane %v4564_v46, 3  ;;  %v4593_v21 = vrot.slane %v4591_v20, 3 }
 0x19b   : > { %7825 = vmatprep.mubr.bf16.mxu0 %v4532_v22  ;;  %7886 = vmatpush3.bf16.msra.mxu0 %v8577_v28  ;;  %v4563_v28 = vrot.slane %v4561_v58, 2  ;;  %v4570_v22 = vshrl.u32 %v9583_v43, 16  ;;  %v9743_v60 = vsel %vm1515_vm3, %v1571_v63, %v1573_v18 }
 0x19c   : > { %7887 = vmatprep.subr.bf16.mxu0 %v8578_v48 }
 0x19d   : > { %v4567_v27 = vor.u32 %v4566_v57, %v4563_v28  ;;  %v4572_v42 = vrot.slane %v4570_v22, 2  ;;  %v4597_v28 = vshrl.u32 %v9613_v39, 16  ;;  %v4600_v57 = vshll.u32 %v9613_v39, 16 }
 0x19f   : > { %7888 = vmatpush3.bf16.msra.mxu0 %v8578_v48  ;;  %v4579_v48 = vshrl.u32 %v9588_v12, 16  ;;  %v4568_v58 = vsel %vm4461_vm4, %v4558_v44, %v4567_v27  ;;  %v4590_v44 = vrot.slane %v4588_v61, 2  ;;  %v4599_v30 = vrot.slane %v4597_v28, 2 }
 0x1a0   : > { %7889 = vmatprep.subr.bf16.mxu0 %v8579_v1 }
 0x1a1   : > { %7458 = vmatmul.mubr.bf16.gmra.mrb[44].mxu1 %v9704_v9  ;;  %v4581_v46 = vrot.slane %v4579_v48, 2  ;;  %v4602_v48 = vrot.slane %v4600_v57, 3 }
 0x1a2   : > { %7826 = vmatmul.mubr.bf16.gmra.mrb[12].mxu0 %v4541_v19  ;;  %7461 = vmatprep.mubr.bf16.mxu1 %v9708_v15  ;;  %v4576_v19 = vor.u32 %v4575_v0, %v4572_v42 }
 0x1a3   : > { %7829 = vmatprep.mubr.bf16.mxu0 %v4550_v51  ;;  %7890 = vmatpush3.bf16.msra.mxu0 %v8579_v1  ;;  %v4584_v1 = vrot.slane %v4582_v45, 3  ;;  %v4594_v45 = vor.u32 %v4593_v21, %v4590_v44  ;;  %v8602_v21 = vld [vmem:[%s8719_s6 + $0x8] sm:$0xfe] }
 0x1a4   : > { %7891 = vmatprep.subr.bf16.mxu0 %v8580_v6  ;;  %v4577_v24 = vsel %vm4461_vm4, %v4567_v27, %v4576_v19  ;;  %v9750_v27 = vrot.slane %v9178_v29, 1 }
 0x1a5   : > { %v4585_v51 = vor.u32 %v4584_v1, %v4581_v46  ;;  %v9758_v46 = vld [vmem:[%s8719_s6 + $0x98] sm:$0xff] }
 0x1a6   : > { %v10390_v1 = vshrl.u32 %v9758_v46, 16 }
 0x1a7   : > { %7892 = vmatpush3.bf16.msra.mxu0 %v8580_v6  ;;  %v9739_v6 = vsel %vm1515_vm3, %v1569_v8, %v1571_v63  ;;  %v4586_v22 = vsel %vm4461_vm4, %v4576_v19, %v4585_v51  ;;  %v1575_v8 = vrot.slane %v9172_v23, 1  ;;  %v10391_v63 = vshll.u32 %v9758_v46, 16 }
 0x1a8   : > { %v4595_v29 = vsel %vm4461_vm4, %v4585_v51, %v4594_v45  ;;  %v10423_v51 = vld [vmem:[#allocation8_spill] sm:$0xff] }
 0x1a9   : > { %7462 = vmatmul.mubr.bf16.gmra.mrb[48].mxu1 %v9723_v14  ;;  %v9763_v23 = vsel %vm1515_vm3, %v1573_v18, %v1575_v8  ;;  %v9768_v19 = vsel %vm1515_vm3, %v1575_v8, %v9750_v27  ;;  %v4617_v18 = vrot.slane %v10390_v1, 2  ;;  %v4620_v57 = vrot.slane %v10391_v63, 3  ;;  %v9789_v1 = vld [vmem:[%s8719_s6 + $0xa8] sm:$0xff] }
 0x1aa   : > { %7830 = vmatmul.mubr.bf16.gmra.mrb[16].mxu0 %v4559_v36  ;;  %7465 = vmatprep.mubr.bf16.mxu1 %v9727_v16  ;;  %v9753_v36 = vld [vmem:[%s8719_s6 + $0x90] sm:$0xff]  ;;  %v4636_v63 = vshll.u32 %v9789_v1, 16 }
 0x1ab   : > { %7833 = vmatprep.mubr.bf16.mxu0 %v4568_v58  ;;  %v4606_v42 = vshrl.u32 %v9753_v36, 16  ;;  %v10395_v0 = vshll.u32 %v9753_v36, 16  ;;  %v4603_v58 = vor.u32 %v4602_v48, %v4599_v30  ;;  %v9784_v30 = vld [vmem:[%s8719_s6 + $0xa0] sm:$0xff] }
 0x1ac   : > { %v10392_v48 = vshrl.u32 %v9784_v30, 16  ;;  %v10393_v8 = vshll.u32 %v9784_v30, 16 }
 0x1ad   : > { %v4608_v61 = vrot.slane %v4606_v42, 2  ;;  %v4611_v20 = vrot.slane %v10395_v0, 3  ;;  %v4604_v28 = vsel %vm4461_vm4, %v4594_v45, %v4603_v58  ;;  %v4621_v45 = vor.u32 %v4620_v57, %v4617_v18 }
 0x1ae   : > { %v4629_v18 = vrot.slane %v10393_v8, 3 }
 0x1af   : > { %v4612_v44 = vor.u32 %v4611_v20, %v4608_v61 }
 0x1b1   : > { %7466 = vmatmul.mubr.bf16.gmra.mrb[52].mxu1 %v9739_v6  ;;  %v4613_v61 = vsel %vm4461_vm4, %v4603_v58, %v4612_v44  ;;  %v4622_v57 = vsel %vm4461_vm4, %v4612_v44, %v4621_v45  ;;  %v9813_v44 = vld [vmem:[%s8719_s6 + $0xb8] sm:$0xff] }
 0x1b2   : > { %7834 = vmatmul.mubr.bf16.gmra.mrb[20].mxu0 %v4577_v24  ;;  %7469 = vmatprep.mubr.bf16.mxu1 %v9743_v60  ;;  %v1579_v24 = vrot.slane %v10423_v51, 1  ;;  %v4626_v51 = vrot.slane %v10392_v48, 2  ;;  %v10397_v0 = vshll.u32 %v9813_v44, 16 }
 0x1b3   : > { %7837 = vmatprep.mubr.bf16.mxu0 %v4586_v22  ;;  %v2097_v22 = vrot.slane %v8602_v21, 1 }
 0x1b4   : > { %v4630_v58 = vor.u32 %v4629_v18, %v4626_v51 }
 0x1b5   : > { %v2099_v20 = vsel %vm1515_vm3, %v2097_v22, %v9470_v41  ;;  %v9808_v41 = vld [vmem:[%s8719_s6 + $0xb0] sm:$0xff] }
 0x1b6   : > { %v10401_v22 = vshrl.u32 %v9808_v41, 16  ;;  %v10396_v48 = vshll.u32 %v9808_v41, 16 }
 0x1b9   : > { %7470 = vmatmul.mubr.bf16.gmra.mrb[56].mxu1 %v9763_v23 }
 0x1ba   : > { %7838 = vmatmul.mubr.bf16.gmra.mrb[24].mxu0 %v4595_v29  ;;  %7473 = vmatprep.mubr.bf16.mxu1 %v9768_v19  ;;  %v10394_v29 = vshrl.u32 %v9789_v1, 16 }
 0x1bb   : > { %7841 = vmatprep.mubr.bf16.mxu0 %v4604_v28  ;;  %v1580_v28 = vsel %vm1515_vm3, %v9750_v27, %v1579_v24  ;;  %v4638_v24 = vrot.slane %v4636_v63, 3 }
 0x1bc   : > { %v4635_v21 = vrot.slane %v10394_v29, 2  ;;  %v10400_v29 = vshrl.u32 %v9813_v44, 16 }
 0x1be   : > { %v4639_v8 = vor.u32 %v4638_v24, %v4635_v21  ;;  %v4653_v18 = vrot.slane %v10400_v29, 2  ;;  %v9831_v21 = vld [vmem:[%s8719_s6 + $0xc0] sm:$0xff] }
 0x1bf   : > { %v10399_v24 = vshrl.u32 %v9831_v21, 16 }
 0x1c0   : > { %v4640_v51 = vsel %vm4461_vm4, %v4630_v58, %v4639_v8 }
 0x1c1   : > { %7474 = vmatmul.mubr.bf16.gmra.mrb[60].mxu1 %v1580_v28  ;;  %v4631_v28 = vsel %vm4461_vm4, %v4621_v45, %v4630_v58  ;;  %v10398_v58 = vshll.u32 %v9831_v21, 16 }
 0x1c2   : > { %7842 = vmatmul.mubr.bf16.gmra.mrb[28].mxu0 %v4613_v61  ;;  %7493 = vmatprep.mubr.bf16.mxu1 %v2099_v20  ;;  %v4644_v61 = vrot.slane %v10401_v22, 2  ;;  %v4647_v20 = vrot.slane %v10396_v48, 3  ;;  %v9864_v22 = vld [vmem:[%s8719_s6 + $0xd8] sm:$0xff] }
 0x1c3   : > { %7845 = vmatprep.mubr.bf16.mxu0 %v4622_v57  ;;  %v4656_v57 = vrot.slane %v10397_v0, 3  ;;  %v8608_v0 = vld [vmem:[%s10379_s1 + $0x108] sm:$0xff]  }
 0x1c4   : > { %v4648_v45 = vor.u32 %v4647_v20, %v4644_v61  ;;  %v4662_v61 = vrot.slane %v10399_v24, 2  ;;  %v4665_v20 = vrot.slane %v10398_v58, 3  ;;  %v9859_v58 = vld [vmem:[%s8719_s6 + $0xd0] sm:$0xff] }
 0x1c5   : > { %v4657_v48 = vor.u32 %v4656_v57, %v4653_v18  ;;  %v10407_v24 = vshrl.u32 %v9859_v58, 16  ;;  %v10406_v29 = vshll.u32 %v9859_v58, 16 }
 0x1c7   : > { %v4658_v18 = vsel %vm4461_vm4, %v4648_v45, %v4657_v48 }
 0x1c9   : > { %7494 = vmatmul.mubr.bf16.vlgmr.msra.gmra.mrb[0].mxu1 %v9478_v7  ;;  %v9839_v7 = vld [vmem:[%s8719_s6 + $0xc8] sm:$0xff] }
 0x1ca   : > { %7846 = vmatmul.mubr.bf16.gmra.mrb[32].mxu0 %v4631_v28  ;;  %7965 = vmatpush3.bf16.msra.mxu1 %v9555_v62  ;;  %v10402_v62 = vshrl.u32 %v9839_v7, 16  ;;  %v4649_v28 = vsel %vm4461_vm4, %v4639_v8, %v4648_v45  ;;  %v4666_v8 = vor.u32 %v4665_v20, %v4662_v61  ;;  %v4683_v61 = vrot.slane %v10406_v29, 3 }
 0x1cb   : > { %7497 = vmatprep.mubr.bf16.mxu1 %v9493_v40  ;;  %7849 = vmatprep.mubr.bf16.mxu0 %v4640_v51  ;;  %v10403_v40 = vshll.u32 %v9839_v7, 16  ;;  %v8610_v51 = vld [vmem:[%s10379_s1 + $0x110] sm:$0xff]  }
 0x1cc   : > { %7958 = vmatprep.subr.bf16.mxu1 %v8608_v0  ;;  %v4671_v57 = vrot.slane %v10402_v62, 2  ;;  %v10405_v62 = vshrl.u32 %v9864_v22, 16 }
 0x1ce   : > { %7966 = vmatpush3.bf16.msra.mxu1 %v8608_v0  ;;  %v4674_v0 = vrot.slane %v10403_v40, 3  ;;  %v10404_v40 = vshll.u32 %v9864_v22, 16 }
 0x1cf   : > { %7959 = vmatprep.subr.bf16.mxu1 %v8610_v51 }
 0x1d0   : > { %v4675_v45 = vor.u32 %v4674_v0, %v4671_v57  ;;  %v9887_v0 = vld [vmem:[%s8719_s6 + $0xe0] sm:$0xff] }
 0x1d1   : > { %7498 = vmatmul.mubr.bf16.gmra.mrb[4].mxu1 %v9496_v26  ;;  %v8613_v26 = vld [vmem:[%s10379_s1 + $0x118] sm:$0xff]  }
 0x1d2   : > { %7850 = vmatmul.mubr.bf16.gmra.mrb[36].mxu0 %v4649_v28  ;;  %7501 = vmatprep.mubr.bf16.mxu1 %v9511_v25  ;;  %v4667_v25 = vsel %vm4461_vm4, %v4657_v48, %v4666_v8  ;;  %v4680_v28 = vrot.slane %v10407_v24, 2  ;;  %v4676_v20 = vsel %vm4461_vm4, %v4666_v8, %v4675_v45  ;;  %v8614_v48 = vld [vmem:[%s10379_s1 + $0x120] sm:$0xff]   ;;  %v10411_v8 = vshrl.u32 %v9887_v0, 16 }
 0x1d3   : > { %7853 = vmatprep.mubr.bf16.mxu0 %v4658_v18  ;;  %7967 = vmatpush3.bf16.msra.mxu1 %v8610_v51  ;;  %v4689_v51 = vrot.slane %v10405_v62, 2  ;;  %v4692_v18 = vrot.slane %v10404_v40, 3  ;;  %v9892_v62 = vld [vmem:[%s8719_s6 + $0xe8] sm:$0xff] }
 0x1d4   : > { %7960 = vmatprep.subr.bf16.mxu1 %v8613_v26  ;;  %v4684_v57 = vor.u32 %v4683_v61, %v4680_v28  ;;  %v10409_v29 = vshrl.u32 %v9892_v62, 16  ;;  %v10408_v24 = vshll.u32 %v9892_v62, 16 }
 0x1d5   : > { %v4693_v40 = vor.u32 %v4692_v18, %v4689_v51 }
 0x1d6   : > { %v4710_v51 = vrot.slane %v10408_v24, 3 }
 0x1d7   : > { %7968 = vmatpush3.bf16.msra.mxu1 %v8613_v26  ;;  %v10410_v26 = vshll.u32 %v9887_v0, 16  ;;  %v4694_v61 = vsel %vm4461_vm4, %v4684_v57, %v4693_v40 }
 0x1d8   : > { %7961 = vmatprep.subr.bf16.mxu1 %v8614_v48 }
 0x1d9   : > { %7502 = vmatmul.mubr.bf16.gmra.mrb[8].mxu1 %v9514_v13  ;;  %v8617_v13 = vld [vmem:[%s10379_s1 + $0x128] sm:$0xff]   ;;  %v4701_v28 = vrot.slane %v10410_v26, 3 }
 0x1da   : > { %7854 = vmatmul.mubr.bf16.gmra.mrb[40].mxu0 %v4667_v25  ;;  %7505 = vmatprep.mubr.bf16.mxu1 %v9529_v38  ;;  %v4685_v38 = vsel %vm4461_vm4, %v4675_v45, %v4684_v57  ;;  %v4698_v25 = vrot.slane %v10411_v8, 2  ;;  %v8618_v45 = vld [vmem:[%s10379_s1 + $0x130] sm:$0xff]  }
 0x1db   : > { %7857 = vmatprep.mubr.bf16.mxu0 %v4676_v20  ;;  %7969 = vmatpush3.bf16.msra.mxu1 %v8614_v48  ;;  %v4707_v20 = vrot.slane %v10409_v29, 2  ;;  %v9915_v48 = vld [vmem:[%s8719_s6 + $0xf0] sm:$0xff]  ;;  %v9920_v29 = vld [vmem:[%s8719_s6 + $0xf8] sm:$0xff] }
 0x1dc   : > { %7962 = vmatprep.subr.bf16.mxu1 %v8617_v13  ;;  %v4702_v18 = vor.u32 %v4701_v28, %v4698_v25  ;;  %v10414_v57 = vshrl.u32 %v9915_v48, 16  ;;  %v10413_v26 = vshrl.u32 %v9920_v29, 16  ;;  %v4726_v8 = vshll.u32 %v9920_v29, 16 }
 0x1dd   : > { %v4711_v24 = vor.u32 %v4710_v51, %v4707_v20  ;;  %v10424_v51 = vld [vmem:[#allocation9_spill] sm:$0xff] }
 0x1de   : > { %v4728_v20 = vrot.slane %v4726_v8, 3 }
 0x1df   : > { %7970 = vmatpush3.bf16.msra.mxu1 %v8617_v13  ;;  %v10412_v13 = vshll.u32 %v9915_v48, 16  ;;  %v4712_v28 = vsel %vm4461_vm4, %v4702_v18, %v4711_v24 }
 0x1e0   : > { %7963 = vmatprep.subr.bf16.mxu1 %v8618_v45 }
 0x1e1   : > { %7506 = vmatmul.mubr.bf16.gmra.mrb[12].mxu1 %v9532_v49  ;;  %v8621_v49 = vld [vmem:[%s10379_s1 + $0x138] sm:$0xff]   ;;  %v4719_v25 = vrot.slane %v10412_v13, 3 }
 0x1e2   : > { %7858 = vmatmul.mubr.bf16.gmra.mrb[44].mxu0 %v4685_v38  ;;  %7509 = vmatprep.mubr.bf16.mxu1 %v9547_v4  ;;  %v4703_v4 = vsel %vm4461_vm4, %v4693_v40, %v4702_v18  ;;  %v4716_v38 = vrot.slane %v10414_v57, 2  ;;  %v4741_v18 = vshrl.u32 %v9577_v32, 16 }
 0x1e3   : > { %7861 = vmatprep.mubr.bf16.mxu0 %v4694_v61  ;;  %7971 = vmatpush3.bf16.msra.mxu1 %v8618_v45  ;;  %v4725_v61 = vrot.slane %v10413_v26, 2  ;;  %v10416_v45 = vshrl.u32 %v10424_v51, 16  ;;  %v4744_v26 = vshll.u32 %v9577_v32, 16 }
 0x1e4   : > { %7964 = vmatprep.subr.bf16.mxu1 %v8621_v49  ;;  %v4720_v40 = vor.u32 %v4719_v25, %v4716_v38  ;;  %v4743_v38 = vrot.slane %v4741_v18, 2 }
 0x1e5   : > { %v4729_v13 = vor.u32 %v4728_v20, %v4725_v61  ;;  %v4746_v25 = vrot.slane %v4744_v26, 3 }
 0x1e6   : > { %v4721_v57 = vsel %vm4461_vm4, %v4711_v24, %v4720_v40 }
 0x1e7   : > { %7972 = vmatpush3.bf16.msra.mxu1 %v8621_v49  ;;  %v10415_v49 = vshll.u32 %v10424_v51, 16  ;;  %v4747_v20 = vor.u32 %v4746_v25, %v4743_v38  ;;  %v8624_v38 = vld [vmem:[%s8719_s6 + $0x28] sm:$0xff] }
 0x1e9   : > { %7510 = vmatmul.mubr.bf16.gmra.mrb[16].mxu1 %v9550_v3  ;;  %v4734_v3 = vrot.slane %v10416_v45, 2  ;;  %v10425_v45 = vld [vmem:[#allocation11_spill] sm:$0xff] }
 0x1ea   : > { %7862 = vmatmul.mubr.bf16.gmra.mrb[48].mxu0 %v4703_v4  ;;  %7513 = vmatprep.mubr.bf16.mxu1 %v9571_v56  ;;  %v4737_v4 = vrot.slane %v10415_v49, 3  ;;  %v4730_v56 = vsel %vm4461_vm4, %v4720_v40, %v4729_v13 }
 0x1eb   : > { %7865 = vmatprep.mubr.bf16.mxu0 %v4712_v28  ;;  %v9950_v28 = vld [vmem:[%s8719_s6 + $0x110] sm:$0x7] }
 0x1ec   : > { %v4738_v32 = vor.u32 %v4737_v4, %v4734_v3  ;;  %v4750_v24 = vshrl.u32 %v9950_v28, 16  ;;  %v4753_v61 = vshll.u32 %v9950_v28, 16  ;;  %v8622_v3 = vld [vmem:[%s8719_s6 + $0x18] sm:$0xff] }
 0x1ed   : > { %v5213_v4 = vrot.slane %v8622_v3, 3 }
 0x1ee   : > { %v4739_v40 = vsel %vm4461_vm4, %v4729_v13, %v4738_v32  ;;  %v4752_v18 = vrot.slane %v4750_v24, 2  ;;  %v4755_v49 = vrot.slane %v4753_v61, 3  ;;  %v4748_v26 = vsel %vm4461_vm4, %v4738_v32, %v4747_v20  ;;  %v8626_v61 = vld [vmem:[%s8719_s6 + $0x38] sm:$0xff] }
 0x1f1   : > { %7514 = vmatmul.mubr.bf16.gmra.mrb[20].mxu1 %v9574_v2  ;;  %v5191_v2 = vld [vmem:[%s8719_s6 + $0x10] sm:$0xf8] }
 0x1f2   : > { %7866 = vmatmul.mubr.bf16.gmra.mrb[52].mxu0 %v4721_v57  ;;  %7517 = vmatprep.mubr.bf16.mxu1 %v9597_v53  ;;  %v4756_v53 = vor.u32 %v4755_v49, %v4752_v18  ;;  %v5212_v57 = vrot.slane %v5191_v2, 3  ;;  %v5217_v49 = vrot.slane %v8624_v38, 3  ;;  %v5225_v18 = vrot.slane %v9416_v5, 3 }
 0x1f3   : > { %7869 = vmatprep.mubr.bf16.mxu0 %v4730_v56  ;;  %v5229_v2 = vrot.slane %v9543_v59, 3  ;;  %v5231_v5 = vrot.slane %v9562_v31, 3  ;;  %v5235_v59 = vrot.slane %v9583_v43, 3  ;;  %v5241_v43 = vrot.slane %v9613_v39, 3 }
 0x1f4   : > { %v4757_v13 = vsel %vm4461_vm4, %v4747_v20, %v4756_v53  ;;  %v5214_v56 = vsel %vm5211_vm5, %v5212_v57, %v5213_v4  ;;  %v5221_v20 = vrot.slane %v8626_v61, 3  ;;  %v2046_v57 = vld [vmem:[%s8719_s6 + $0x108] sm:$0x1]  ;;  %v5243_v39 = vrot.slane %v9753_v36, 3 }
 0x1f9   : > { %7518 = vmatmul.mubr.bf16.gmra.mrb[24].mxu1 %v10425_v45  ;;  %v8623_v45 = vld [vmem:[%s8719_s6 + $0x20] sm:$0xff] }
 0x1fa   : > { %7870 = vmatmul.mubr.bf16.gmra.mrb[56].mxu0 %v4739_v40  ;;  %7521 = vmatprep.mubr.bf16.mxu1 %v9621_v37  ;;  %v5215_v37 = vrot.slane %v8623_v45, 3 }
 0x1fb   : > { %7873 = vmatprep.mubr.bf16.mxu0 %v4748_v26 }
 0x1fc   : > { %v5216_v25 = vsel %vm5211_vm5, %v5213_v4, %v5215_v37  ;;  %v5218_v32 = vsel %vm5211_vm5, %v5215_v37, %v5217_v49  ;;  %v2160_v4 = vrot.slane %v2046_v57, 1  ;;  %v10428_v37 = vshll.u32 %v9758_v46, 16 }
 0x1fe   : > { %v2781_v38 = vrot.slane %v10428_v37, 2  ;;  %v10441_v37 = vshrl.u32 %v9859_v58, 16 }
 0x201   : > { %7522 = vmatmul.mubr.bf16.gmra.mrb[28].mxu1 %v9625_v52  ;;  %v8625_v52 = vld [vmem:[%s8719_s6 + $0x30] sm:$0xff] }
 0x202   : > { %7874 = vmatmul.mubr.bf16.gmra.mrb[60].mxu0 %v4757_v13  ;;  %7525 = vmatprep.mubr.bf16.mxu1 %v9637_v17  ;;  %v5219_v24 = vrot.slane %v8625_v52, 3 }
 0x203   : > { %7893 = vmatprep.mubr.bf16.mxu0 %v5214_v56 }
 0x204   : > { %v5220_v17 = vsel %vm5211_vm5, %v5217_v49, %v5219_v24  ;;  %v5222_v40 = vsel %vm5211_vm5, %v5219_v24, %v5221_v20  ;;  %v5244_v49 = vsel %vm5211_vm5, %v5241_v43, %v5243_v39 }
 0x209   : > { %7526 = vmatmul.mubr.bf16.gmra.mrb[32].mxu1 %v9641_v10  ;;  %v5223_v10 = vrot.slane %v9409_v11, 3 }
 0x20a   : > { %7894 = vmatmul.mubr.bf16.vlgmr.msra.gmra.mrb[0].mxu0 %v5216_v25  ;;  %7529 = vmatprep.mubr.bf16.mxu1 %v9660_v47 }
 0x20b   : > { %7897 = vmatprep.mubr.bf16.mxu0 %v5218_v32  ;;  %v5224_v47 = vsel %vm5211_vm5, %v5221_v20, %v5223_v10  ;;  %v5226_v26 = vsel %vm5211_vm5, %v5223_v10, %v5225_v18  ;;  %v10430_v32 = vshrl.u32 %v9784_v30, 16 }
 0x20d   : > { %v2787_v52 = vrot.slane %v10430_v32, 1 }
 0x211   : > { %7530 = vmatmul.mubr.bf16.gmra.mrb[36].mxu1 %v9664_v35  ;;  %v5227_v35 = vrot.slane %v9427_v55, 3 }
 0x212   : > { %7898 = vmatmul.mubr.bf16.gmra.mrb[4].mxu0 %v5220_v17  ;;  %7533 = vmatprep.mubr.bf16.mxu1 %v9682_v50 }
 0x213   : > { %7901 = vmatprep.mubr.bf16.mxu0 %v5222_v40  ;;  %v5228_v50 = vsel %vm5211_vm5, %v5225_v18, %v5227_v35  ;;  %v5230_v11 = vsel %vm5211_vm5, %v5227_v35, %v5229_v2  ;;  %v5249_v40 = vrot.slane %v9789_v1, 3  ;;  %v10432_v18 = vshrl.u32 %v9789_v1, 16 }
 0x214   : > { %v5251_v1 = vrot.slane %v9808_v41, 3 }
 0x219   : > { %7534 = vmatmul.mubr.bf16.gmra.mrb[40].mxu1 %v9686_v54  ;;  %v5233_v54 = vrot.slane %v9567_v33, 3 }
 0x21a   : > { %7902 = vmatmul.mubr.bf16.gmra.mrb[8].mxu0 %v5224_v47  ;;  %7537 = vmatprep.mubr.bf16.mxu1 %v9704_v9  ;;  %v5232_v9 = vsel %vm5211_vm5, %v5229_v2, %v5231_v5  ;;  %v2796_v47 = vrot.slane %v10432_v18, 1 }
 0x21b   : > { %7905 = vmatprep.mubr.bf16.mxu0 %v5226_v26  ;;  %v5234_v55 = vsel %vm5211_vm5, %v5231_v5, %v5233_v54  ;;  %v5236_v31 = vsel %vm5211_vm5, %v5233_v54, %v5235_v59  ;;  %v2799_v26 = vrot.slane %v4636_v63, 2 }
 0x221   : > { %7538 = vmatmul.mubr.bf16.gmra.mrb[44].mxu1 %v9708_v15  ;;  %v5237_v15 = vrot.slane %v9588_v12, 3 }
 0x222   : > { %7906 = vmatmul.mubr.bf16.gmra.mrb[12].mxu0 %v5228_v50  ;;  %7541 = vmatprep.mubr.bf16.mxu1 %v9723_v14  ;;  %v5239_v14 = vrot.slane %v9609_v34, 3  ;;  %v10433_v50 = vshrl.u32 %v9808_v41, 16 }
 0x223   : > { %7909 = vmatprep.mubr.bf16.mxu0 %v5230_v11  ;;  %v5238_v33 = vsel %vm5211_vm5, %v5235_v59, %v5237_v15 }
 0x224   : > { %v5240_v12 = vsel %vm5211_vm5, %v5237_v15, %v5239_v14  ;;  %v5242_v34 = vsel %vm5211_vm5, %v5239_v14, %v5241_v43  ;;  %v2805_v11 = vrot.slane %v10433_v50, 1  ;;  %v10435_v15 = vshrl.u32 %v9813_v44, 16 }
 0x225   : > { %v5265_v50 = vrot.slane %v9892_v62, 3 }
 0x229   : > { %7542 = vmatmul.mubr.bf16.gmra.mrb[48].mxu1 %v9727_v16  ;;  %v10004_v16 = vld [vmem:[%s8719_s6 + $0x100] sm:$0xff] }
 0x22a   : > { %7910 = vmatmul.mubr.bf16.gmra.mrb[16].mxu0 %v5232_v9  ;;  %7545 = vmatprep.mubr.bf16.mxu1 %v9739_v6  ;;  %v2158_v6 = vrot.slane %v10004_v16, 1  ;;  %v2800_v9 = vor.u32 %v2799_v26, %v2796_v47 }
 0x22b   : > { %7913 = vmatprep.mubr.bf16.mxu0 %v5234_v55  ;;  %v5253_v55 = vrot.slane %v9813_v44, 3 }
 0x22c   : > { %v2159_v53 = vsel %vm1515_vm3, %v9750_v27, %v2158_v6  ;;  %v5245_v27 = vrot.slane %v9758_v46, 3  ;;  %v2161_v56 = vsel %vm1515_vm3, %v2158_v6, %v2160_v4  ;;  %v5252_v6 = vsel %vm5211_vm5, %v5249_v40, %v5251_v1 }
 0x22e   : > { %v5246_v61 = vsel %vm5211_vm5, %v5243_v39, %v5245_v27  ;;  %v10439_v39 = vshrl.u32 %v9839_v7, 16 }
 0x231   : > { %7546 = vmatmul.mubr.bf16.gmra.mrb[52].mxu1 %v9743_v60  ;;  %v2769_v60 = vrot.slane %v4606_v42, 1  ;;  %v10427_v42 = vshrl.u32 %v9758_v46, 16  ;;  %v5247_v46 = vrot.slane %v9784_v30, 3 }
 0x232   : > { %7914 = vmatmul.mubr.bf16.gmra.mrb[20].mxu0 %v5236_v31  ;;  %7549 = vmatprep.mubr.bf16.mxu1 %v9763_v23  ;;  %v10426_v23 = vshll.u32 %v9753_v36, 16  ;;  %v10431_v36 = vshll.u32 %v9784_v30, 16  ;;  %v10434_v30 = vshll.u32 %v9808_v41, 16  ;;  %v2814_v31 = vrot.slane %v10435_v15, 1 }
 0x233   : > { %7917 = vmatprep.mubr.bf16.mxu0 %v5238_v33  ;;  %v2778_v45 = vrot.slane %v10427_v42, 1  ;;  %v5248_v35 = vsel %vm5211_vm5, %v5245_v27, %v5247_v46  ;;  %v5250_v54 = vsel %vm5211_vm5, %v5247_v46, %v5249_v40  ;;  %v10436_v33 = vshll.u32 %v9813_v44, 16 }
 0x234   : > { %v2772_v3 = vrot.slane %v10426_v23, 2  ;;  %v2790_v24 = vrot.slane %v10431_v36, 2  ;;  %v2808_v5 = vrot.slane %v10434_v30, 2  ;;  %v10438_v41 = vshll.u32 %v9831_v21, 16 }
 0x235   : > { %v2782_v20 = vor.u32 %v2781_v38, %v2778_v45  ;;  %v2817_v14 = vrot.slane %v10436_v33, 2  ;;  %v5255_v44 = vrot.slane %v9831_v21, 3  ;;  %v10440_v27 = vshll.u32 %v9839_v7, 16 }
 0x236   : > { %v2773_v13 = vor.u32 %v2772_v3, %v2769_v60  ;;  %v2791_v17 = vor.u32 %v2790_v24, %v2787_v52  ;;  %v2809_v63 = vor.u32 %v2808_v5, %v2805_v11  ;;  %v2826_v57 = vrot.slane %v10438_v41, 2 }
 0x237   : > { %v5254_v60 = vsel %vm5211_vm5, %v5251_v1, %v5253_v55  ;;  %v2818_v23 = vor.u32 %v2817_v14, %v2814_v31  ;;  %v5256_v42 = vsel %vm5211_vm5, %v5253_v55, %v5255_v44  ;;  %v2841_v38 = vrot.slane %v10441_v37, 1 }
 0x238   : > { %v2783_v10 = vsel %vm2613_vm1, %v2773_v13, %v2782_v20  ;;  %v2792_v2 = vsel %vm2613_vm1, %v2782_v20, %v2791_v17  ;;  %v2801_v59 = vsel %vm2613_vm1, %v2791_v17, %v2800_v9  ;;  %v2810_v43 = vsel %vm2613_vm1, %v2800_v9, %v2809_v63 }
 0x239   : > { %7550 = vmatmul.mubr.bf16.gmra.mrb[56].mxu1 %v9768_v19  ;;  %v10429_v19 = vld [vmem:[#allocation7_spill] sm:$0xff]  ;;  %v2819_v4 = vsel %vm2613_vm1, %v2809_v63, %v2818_v23  ;;  %v5261_v52 = vrot.slane %v9864_v22, 3  ;;  %v10443_v24 = vshrl.u32 %v9864_v22, 16  ;;  %v10444_v20 = vshll.u32 %v9864_v22, 16 }
 0x23a   : > { %7918 = vmatmul.mubr.bf16.gmra.mrb[24].mxu0 %v5240_v12  ;;  %7553 = vmatprep.mubr.bf16.mxu1 %v2159_v53  ;;  %v2774_v25 = vsel %vm2613_vm1, %v10429_v19, %v2773_v13  ;;  %v10437_v12 = vshrl.u32 %v9831_v21, 16  ;;  %v2832_v13 = vrot.slane %v10439_v39, 1  ;;  %v10442_v21 = vshll.u32 %v9859_v58, 16  ;;  %v8628_v39 = vld [vmem:[%s8719_s6 + $0x108] sm:$0x3] }
 0x23b   : > { %7921 = vmatprep.mubr.bf16.mxu0 %v5242_v34  ;;  %v5257_v34 = vrot.slane %v9839_v7, 3  ;;  %v5259_v7 = vrot.slane %v9859_v58, 3  ;;  %v2853_v46 = vrot.slane %v10444_v20, 2  ;;  %v10446_v58 = vshll.u32 %v9887_v0, 16 }
 0x23c   : > { %v2823_v53 = vrot.slane %v10437_v12, 1  ;;  %v5263_v22 = vrot.slane %v9887_v0, 3  ;;  %v10447_v30 = vshrl.u32 %v9892_v62, 16  ;;  %v10449_v55 = vshrl.u32 %v9915_v48, 16 }
 0x23d   : > { %v5258_v19 = vsel %vm5211_vm5, %v5255_v44, %v5257_v34  ;;  %v5260_v17 = vsel %vm5211_vm5, %v5257_v34, %v5259_v7  ;;  %v2862_v47 = vrot.slane %v10446_v58, 2  ;;  %v5262_v26 = vsel %vm5211_vm5, %v5259_v7, %v5261_v52 }
 0x23e   : > { %v2827_v3 = vor.u32 %v2826_v57, %v2823_v53  ;;  %v2868_v5 = vrot.slane %v10447_v30, 1  ;;  %v5264_v1 = vsel %vm5211_vm5, %v5261_v52, %v5263_v22  ;;  %v5266_v31 = vsel %vm5211_vm5, %v5263_v22, %v5265_v50 }
 0x23f   : > { %v10451_v12 = vshrl.u32 %v9920_v29, 16  ;;  %v2889_v41 = vrot.slane %v4726_v8, 2  ;;  %v2905_v8 = vshll.u32 %v8628_v39, 16 }
 0x240   : > { %v2828_v45 = vsel %vm2613_vm1, %v2818_v23, %v2827_v3  ;;  %v10452_v23 = vshrl.u32 %v10424_v51, 16 }
 0x241   : > { %7554 = vmatmul.mubr.bf16.gmra.mrb[60].mxu1 %v2161_v56  ;;  %v2835_v56 = vrot.slane %v10440_v27, 2  ;;  %v2886_v53 = vrot.slane %v10451_v12, 1  ;;  %v10183_v12 = vld [vmem:[%s10381_s3] ss:$0 sm:$0xff] }
 0x242   : > { %7922 = vmatmul.mubr.bf16.gmra.mrb[28].mxu0 %v5244_v49  ;;  %7605 = vmatprep.mubr.bf16.mxu1 %v2774_v25  ;;  %v2844_v49 = vrot.slane %v10442_v21, 2  ;;  %v2895_v44 = vrot.slane %v10452_v23, 1 }
 0x243   : > { %7925 = vmatprep.mubr.bf16.mxu0 %v5246_v61  ;;  %v2836_v25 = vor.u32 %v2835_v56, %v2832_v13  ;;  %v2850_v61 = vrot.slane %v10443_v24, 1  ;;  %v5271_v13 = vrot.slane %v10004_v16, 3  ;;  %v8629_v56 = vld [vmem:[%s8719_s6 + $0x108] sm:$0xff]  ;;  %v5275_v16 = vrot.slane %v9950_v28, 3 }
 0x244   : > { %v2845_v32 = vor.u32 %v2844_v49, %v2841_v38 }
 0x245   : > { %v2837_v36 = vsel %vm2613_vm1, %v2827_v3, %v2836_v25 }
 0x246   : > { %v2846_v40 = vsel %vm2613_vm1, %v2836_v25, %v2845_v32 }
 0x249   : > { %7606 = vmatmul.mubr.bf16.vlgmr.msra.gmra.mrb[32].mxu1 %v2783_v10  ;;  %v10445_v10 = vshrl.u32 %v9887_v0, 16  ;;  %v10450_v0 = vshll.u32 %v9915_v48, 16 }
 0x24a   : > { %7926 = vmatmul.mubr.bf16.gmra.mrb[32].mxu0 %v5248_v35  ;;  %7609 = vmatprep.mubr.bf16.mxu1 %v2792_v2  ;;  %v2854_v35 = vor.u32 %v2853_v46, %v2850_v61 }
 0x24b   : > { %7929 = vmatprep.mubr.bf16.mxu0 %v5250_v54  ;;  %v2859_v18 = vrot.slane %v10445_v10, 1  ;;  %v10448_v54 = vshll.u32 %v9892_v62, 16  ;;  %v2880_v15 = vrot.slane %v10450_v0, 2  ;;  %v5267_v62 = vrot.slane %v9915_v48, 3 }
 0x24c   : > { %v2855_v11 = vsel %vm2613_vm1, %v2845_v32, %v2854_v35  ;;  %v10453_v48 = vshll.u32 %v10424_v51, 16  ;;  %v2907_v51 = vrot.slane %v2905_v8, 2 }
 0x24d   : > { %v2863_v2 = vor.u32 %v2862_v47, %v2859_v18  ;;  %v2871_v9 = vrot.slane %v10448_v54, 2  ;;  %v5268_v57 = vsel %vm5211_vm5, %v5265_v50, %v5267_v62 }
 0x24e   : > { %v2898_v3 = vrot.slane %v10453_v48, 2 }
 0x24f   : > { %v2864_v63 = vsel %vm2613_vm1, %v2854_v35, %v2863_v2  ;;  %v2872_v33 = vor.u32 %v2871_v9, %v2868_v5 }
 0x250   : > { %v2899_v27 = vor.u32 %v2898_v3, %v2895_v44 }
 0x251   : > { %7610 = vmatmul.mubr.bf16.gmra.mrb[36].mxu1 %v2801_v59  ;;  %v2877_v59 = vrot.slane %v10449_v55, 1 }
 0x252   : > { %7930 = vmatmul.mubr.bf16.gmra.mrb[36].mxu0 %v5252_v6  ;;  %7613 = vmatprep.mubr.bf16.mxu1 %v2810_v43  ;;  %v5269_v6 = vrot.slane %v9920_v29, 3  ;;  %v2873_v43 = vsel %vm2613_vm1, %v2863_v2, %v2872_v33  ;;  %v2902_v29 = vshrl.u32 %v8628_v39, 16 }
 0x253   : > { %7933 = vmatprep.mubr.bf16.mxu0 %v5254_v60  ;;  %v2881_v14 = vor.u32 %v2880_v15, %v2877_v59 }
 0x254   : > { %v5270_v34 = vsel %vm5211_vm5, %v5267_v62, %v5269_v6  ;;  %v2904_v37 = vrot.slane %v2902_v29, 1  ;;  %v5272_v38 = vsel %vm5211_vm5, %v5269_v6, %v5271_v13 }
 0x255   : > { %v2882_v60 = vsel %vm2613_vm1, %v2872_v33, %v2881_v14 }
 0x259   : > { %7614 = vmatmul.mubr.bf16.gmra.mrb[40].mxu1 %v2819_v4  ;;  %v2890_v4 = vor.u32 %v2889_v41, %v2886_v53 }
 0x25a   : > { %7934 = vmatmul.mubr.bf16.gmra.mrb[40].mxu0 %v5256_v42  ;;  %7617 = vmatprep.mubr.bf16.mxu1 %v2828_v45  ;;  %v5273_v42 = vrot.slane %v8629_v56, 3 }
 0x25b   : > { %7937 = vmatprep.mubr.bf16.mxu0 %v5258_v19  ;;  %v2891_v45 = vsel %vm2613_vm1, %v2881_v14, %v2890_v4  ;;  %v2900_v21 = vsel %vm2613_vm1, %v2890_v4, %v2899_v27  ;;  %v2908_v19 = vor.u32 %v2907_v51, %v2904_v37  ;;  %v10178_v14 = vld [vmem:[%s10380_s2] ss:$0 sm:$0xff] }
 0x25c   : > { %v5274_v49 = vsel %vm5211_vm5, %v5271_v13, %v5273_v42  ;;  %v5276_v7 = vsel %vm5211_vm5, %v5273_v42, %v5275_v16 }
 0x25d   : > { %v2909_v25 = vsel %vm2613_vm1, %v2899_v27, %v2908_v19 }
 0x261   : > { %7618 = vmatmul.mubr.bf16.gmra.mrb[44].mxu1 %v2837_v36 }
 0x262   : > { %7938 = vmatmul.mubr.bf16.gmra.mrb[44].mxu0 %v5260_v17  ;;  %7621 = vmatprep.mubr.bf16.mxu1 %v2846_v40 }
 0x263   : > { %7941 = vmatprep.mubr.bf16.mxu0 %v5262_v26 }
 0x269   : > { %7622 = vmatmul.mubr.bf16.gmra.mrb[48].mxu1 %v2855_v11 }
 0x26a   : > { %7942 = vmatmul.mubr.bf16.gmra.mrb[48].mxu0 %v5264_v1  ;;  %7625 = vmatprep.mubr.bf16.mxu1 %v2864_v63 }
 0x26b   : > { %7945 = vmatprep.mubr.bf16.mxu0 %v5266_v31 }
 0x271   : > { %7626 = vmatmul.mubr.bf16.gmra.mrb[52].mxu1 %v2873_v43 }
 0x272   : > { %7946 = vmatmul.mubr.bf16.gmra.mrb[52].mxu0 %v5268_v57  ;;  %7629 = vmatprep.mubr.bf16.mxu1 %v2882_v60 }
 0x273   : > { %7949 = vmatprep.mubr.bf16.mxu0 %v5270_v34 }
 0x279   : > { %7630 = vmatmul.mubr.bf16.gmra.mrb[56].mxu1 %v2891_v45 }
 0x27a   : > { %7950 = vmatmul.mubr.bf16.gmra.mrb[56].mxu0 %v5272_v38  ;;  %7633 = vmatprep.mubr.bf16.mxu1 %v2900_v21 }
 0x27b   : > { %7953 = vmatprep.mubr.bf16.mxu0 %v5274_v49 }
 0x281   : > { %7634 = vmatmul.mubr.bf16.gmra.mrb[60].mxu1 %v2909_v25 }
 0x282   : > { %7954 = vmatmul.mubr.bf16.gmra.mrb[60].mxu0 %v5276_v7 }
 0x29c   : > { %v7495_v32 = vpop.f32.mrb[0].mxu1 }
 0x29d   : > { %v2276_v52 = vpop.f32.mrb[1].mxu1 }
 0x29e   : > { %v7496_v36 = vpop.f32.mrb[2].mxu1 }
 0x29f   : > { %v2279_v24 = vpop.f32.mrb[3].mxu1 }
 0x2a4   : > { %v7499_v61 = vpop.f32.mrb[4].mxu1 }
 0x2a5   : > { %v2292_v20 = vpop.f32.mrb[5].mxu1 }
 0x2a6   : > { %v7500_v46 = vpop.f32.mrb[6].mxu1 }
 0x2a7   : > { %v2295_v17 = vpop.f32.mrb[7].mxu1 }
 0x2ac   : > { %v10127_v40 = vpop.f32.mrb[8].mxu1 }
 0x2ad   : > { %v10129_v10 = vpop.f32.mrb[9].mxu1 }
 0x2ae   : > { %v10131_v18 = vpop.f32.mrb[10].mxu1 }
 0x2af   : > { %v10133_v28 = vpop.f32.mrb[11].mxu1 }
 0x2b4   : > { %v10135_v58 = vpop.f32.mrb[12].mxu1 }
 0x2b5   : > { %v10137_v47 = vpop.f32.mrb[13].mxu1 }
 0x2b6   : > { %v10139_v26 = vpop.f32.mrb[14].mxu1 }
 0x2b7   : > { %v10141_v35 = vpop.f32.mrb[15].mxu1 }
 0x2bc   : > { %v10143_v22 = vpop.f32.mrb[16].mxu1 }
 0x2bd   : > { %v10145_v2 = vpop.f32.mrb[17].mxu1 }
 0x2be   : > { %v10147_v50 = vpop.f32.mrb[18].mxu1 }
 0x2bf   : > { %v10149_v11 = vpop.f32.mrb[19].mxu1 }
 0x2c4   : > { %v10151_v30 = vpop.f32.mrb[20].mxu1 }
 0x2c5   : > { %v10153_v5 = vpop.f32.mrb[21].mxu1 }
 0x2c6   : > { %v10155_v54 = vpop.f32.mrb[22].mxu1 }
 0x2c7   : > { %v10157_v9 = vpop.f32.mrb[23].mxu1 }
 0x2cc   : > { %v10159_v1 = vpop.f32.mrb[24].mxu1 }
 0x2cd   : > { %v10161_v63 = vpop.f32.mrb[25].mxu1 }
 0x2ce   : > { %v10163_v55 = vpop.f32.mrb[26].mxu1 }
 0x2cf   : > { %v10165_v59 = vpop.f32.mrb[27].mxu1 }
 0x2d4   : > { %v10167_v0 = vpop.f32.mrb[28].mxu1 }
 0x2d5   : > { %v10169_v15 = vpop.f32.mrb[29].mxu1 }
 0x2d6   : > { %v10171_v31 = vpop.f32.mrb[30].mxu1 }
 0x2d7   : > { %v10173_v33 = vpop.f32.mrb[31].mxu1 }
 0x2dd   : > { %v7895_v62 = vpop.f32.mrb[0].mxu0 }
 0x2de   : > { %v7973_v6 = vadd.f32 %v7895_v62, %v7495_v32  ;;  %v5391_v43 = vpop.f32.mrb[1].mxu0 }
 0x2df   : > { %v7974_v53 = vadd.f32 %v5391_v43, %v2276_v52  ;;  %v7896_v41 = vpop.f32.mrb[2].mxu0 }
 0x2e0   : > { %v5719_v57 = vmul.f32 %v7973_v6, %v10178_v14  ;;  %v7975_v60 = vadd.f32 %v7896_v41, %v7496_v36  ;;  %v5394_v23 = vpop.f32.mrb[3].mxu0 }
 0x2e1   : > { %v5717_v44 = vmul.f32 %v7974_v53, %v10178_v14  ;;  %v7976_v48 = vadd.f32 %v5394_v23, %v2279_v24 }
 0x2e2   : > { %v5790_v3 = vadd.f32 %v10183_v12, %v5719_v57  ;;  %v5720_v34 = vmul.f32 %v7975_v60, %v10178_v14 }
 0x2e3   : > { %v5788_v4 = vadd.f32 %v10183_v12, %v5717_v44  ;;  %v5718_v39 = vmul.f32 %v7976_v48, %v10178_v14 }
 0x2e4   : > { %v5791_v29 = vadd.f32 %v10183_v12, %v5720_v34  ;;  %v5854_v27 = vmax.f32 %v5790_v3, 0.0 }
 0x2e5   : > { %v5789_v8 = vadd.f32 %v10183_v12, %v5718_v39  ;;  %v7899_v13 = vpop.f32.mrb[4].mxu0  ;;  %v5852_v37 = vmax.f32 %v5788_v4, 0.0 }
 0x2e6   : > { %v5855_v56 = vmax.f32 %v5791_v29, 0.0  ;;  %v7977_v42 = vadd.f32 %v7899_v13, %v7499_v61  ;;  %v5407_v45 = vpop.f32.mrb[5].mxu0 }
 0x2e7   : > { %v5853_v51 = vmax.f32 %v5789_v8, 0.0  ;;  %v7978_v38 = vadd.f32 %v5407_v45, %v2292_v20  ;;  %v7900_v21 = vpop.f32.mrb[6].mxu0 }
 0x2e8   : > { %v6694_v49 = vpack.c.bf16 %v5855_v56, %v5854_v27  ;;  %v5723_v19 = vmul.f32 %v7977_v42, %v10178_v14  ;;  %v7979_v16 = vadd.f32 %v7900_v21, %v7500_v46  ;;  %v5410_v25 = vpop.f32.mrb[7].mxu0 }
 0x2e9   : > { %v6689_v7 = vpack.c.bf16 %v5853_v51, %v5852_v37  ;;  %v5721_v32 = vmul.f32 %v7978_v38, %v10178_v14  ;;  %v7980_v52 = vadd.f32 %v5410_v25, %v2295_v17 }
 0x2ea   : > { %6846 = vst [vmem:[%s8714_s5 + $0x8] sm:$0xff] %v6694_v49   ;;  %v5794_v36 = vadd.f32 %v10183_v12, %v5723_v19  ;;  %v5724_v24 = vmul.f32 %v7979_v16, %v10178_v14 }
 0x2eb   : > { %6690 = vst [vmem:[%s8714_s5] sm:$0xff] %v6689_v7   ;;  %v5792_v61 = vadd.f32 %v10183_v12, %v5721_v32  ;;  %v5722_v20 = vmul.f32 %v7980_v52, %v10178_v14 }
 0x2ec   : > { %v5795_v62 = vadd.f32 %v10183_v12, %v5724_v24  ;;  %v5858_v43 = vmax.f32 %v5794_v36, 0.0 }
 0x2ed   : > { %v5793_v6 = vadd.f32 %v10183_v12, %v5722_v20  ;;  %v7903_v46 = vpop.f32.mrb[8].mxu0  ;;  %v5856_v57 = vmax.f32 %v5792_v61, 0.0 }
 0x2ee   : > { %v5859_v53 = vmax.f32 %v5795_v62, 0.0  ;;  %v7981_v17 = vadd.f32 %v7903_v46, %v10127_v40  ;;  %v5423_v41 = vpop.f32.mrb[9].mxu0 }
 0x2ef   : > { %v5857_v60 = vmax.f32 %v5793_v6, 0.0  ;;  %v7982_v23 = vadd.f32 %v5423_v41, %v10129_v10  ;;  %v7904_v44 = vpop.f32.mrb[10].mxu0 }
 0x2f0   : > { %v6704_v48 = vpack.c.bf16 %v5859_v53, %v5858_v43  ;;  %v5727_v3 = vmul.f32 %v7981_v17, %v10178_v14  ;;  %v7983_v34 = vadd.f32 %v7904_v44, %v10131_v18  ;;  %v5426_v4 = vpop.f32.mrb[11].mxu0 }
 0x2f1   : > { %v6699_v39 = vpack.c.bf16 %v5857_v60, %v5856_v57  ;;  %v5725_v29 = vmul.f32 %v7982_v23, %v10178_v14  ;;  %v7984_v8 = vadd.f32 %v5426_v4, %v10133_v28 }
 0x2f2   : > { %6848 = vst [vmem:[%s8714_s5 + $0x18] sm:$0xff] %v6704_v48   ;;  %v5798_v40 = vadd.f32 %v10183_v12, %v5727_v3  ;;  %v5728_v13 = vmul.f32 %v7983_v34, %v10178_v14 }
 0x2f3   : > { %6847 = vst [vmem:[%s8714_s5 + $0x10] sm:$0xff] %v6699_v39   ;;  %v5796_v10 = vadd.f32 %v10183_v12, %v5725_v29  ;;  %v5726_v27 = vmul.f32 %v7984_v8, %v10178_v14 }
 0x2f4   : > { %v5799_v56 = vadd.f32 %v10183_v12, %v5728_v13  ;;  %v5862_v45 = vmax.f32 %v5798_v40, 0.0 }
 0x2f5   : > { %v5797_v18 = vadd.f32 %v10183_v12, %v5726_v27  ;;  %v7907_v42 = vpop.f32.mrb[12].mxu0  ;;  %v5860_v38 = vmax.f32 %v5796_v10, 0.0 }
 0x2f6   : > { %v5863_v37 = vmax.f32 %v5799_v56, 0.0  ;;  %v7985_v28 = vadd.f32 %v7907_v42, %v10135_v58  ;;  %v5439_v51 = vpop.f32.mrb[13].mxu0 }
 0x2f7   : > { %v5861_v21 = vmax.f32 %v5797_v18, 0.0  ;;  %v7986_v49 = vadd.f32 %v5439_v51, %v10137_v47  ;;  %v7908_v19 = vpop.f32.mrb[14].mxu0 }
 0x2f8   : > { %v6714_v16 = vpack.c.bf16 %v5863_v37, %v5862_v45  ;;  %v5731_v25 = vmul.f32 %v7985_v28, %v10178_v14  ;;  %v7987_v7 = vadd.f32 %v7908_v19, %v10139_v26  ;;  %v5442_v32 = vpop.f32.mrb[15].mxu0 }
 0x2f9   : > { %v6709_v52 = vpack.c.bf16 %v5861_v21, %v5860_v38  ;;  %v5729_v36 = vmul.f32 %v7986_v49, %v10178_v14  ;;  %v7988_v24 = vadd.f32 %v5442_v32, %v10141_v35 }
 0x2fa   : > { %6850 = vst [vmem:[%s8714_s5 + $0x28] sm:$0xff] %v6714_v16   ;;  %v5802_v58 = vadd.f32 %v10183_v12, %v5731_v25  ;;  %v5732_v61 = vmul.f32 %v7987_v7, %v10178_v14 }
 0x2fb   : > { %6849 = vst [vmem:[%s8714_s5 + $0x20] sm:$0xff] %v6709_v52   ;;  %v5800_v47 = vadd.f32 %v10183_v12, %v5729_v36  ;;  %v5730_v20 = vmul.f32 %v7988_v24, %v10178_v14 }
 0x2fc   : > { %v5803_v62 = vadd.f32 %v10183_v12, %v5732_v61  ;;  %v5866_v46 = vmax.f32 %v5802_v58, 0.0 }
 0x2fd   : > { %v5801_v26 = vadd.f32 %v10183_v12, %v5730_v20  ;;  %v7911_v6 = vpop.f32.mrb[16].mxu0  ;;  %v5864_v17 = vmax.f32 %v5800_v47, 0.0 }
 0x2fe   : > { %v5867_v43 = vmax.f32 %v5803_v62, 0.0  ;;  %v7989_v35 = vadd.f32 %v7911_v6, %v10143_v22  ;;  %v5455_v53 = vpop.f32.mrb[17].mxu0 }
 0x2ff   : > { %v5865_v41 = vmax.f32 %v5801_v26, 0.0  ;;  %v7990_v57 = vadd.f32 %v5455_v53, %v10145_v2  ;;  %v7912_v60 = vpop.f32.mrb[18].mxu0 }
 0x300   : > { %v6724_v23 = vpack.c.bf16 %v5867_v43, %v5866_v46  ;;  %v5735_v44 = vmul.f32 %v7989_v35, %v10178_v14  ;;  %v7991_v48 = vadd.f32 %v7912_v60, %v10147_v50  ;;  %v5458_v3 = vpop.f32.mrb[19].mxu0 }
 0x301   : > { %v6719_v34 = vpack.c.bf16 %v5865_v41, %v5864_v17  ;;  %v5733_v4 = vmul.f32 %v7990_v57, %v10178_v14  ;;  %v7992_v39 = vadd.f32 %v5458_v3, %v10149_v11 }
 0x302   : > { %6852 = vst [vmem:[%s8714_s5 + $0x38] sm:$0xff] %v6724_v23   ;;  %v5806_v22 = vadd.f32 %v10183_v12, %v5735_v44  ;;  %v5736_v29 = vmul.f32 %v7991_v48, %v10178_v14 }
 0x303   : > { %6851 = vst [vmem:[%s8714_s5 + $0x30] sm:$0xff] %v6719_v34   ;;  %v5804_v2 = vadd.f32 %v10183_v12, %v5733_v4  ;;  %v5734_v8 = vmul.f32 %v7992_v39, %v10178_v14 }
 0x304   : > { %v5807_v40 = vadd.f32 %v10183_v12, %v5736_v29  ;;  %v5870_v10 = vmax.f32 %v5806_v22, 0.0 }
 0x305   : > { %v5805_v50 = vadd.f32 %v10183_v12, %v5734_v8  ;;  %v7915_v13 = vpop.f32.mrb[20].mxu0  ;;  %v5868_v18 = vmax.f32 %v5804_v2, 0.0 }
 0x306   : > { %v5871_v27 = vmax.f32 %v5807_v40, 0.0  ;;  %v7993_v11 = vadd.f32 %v7915_v13, %v10151_v30  ;;  %v5471_v56 = vpop.f32.mrb[21].mxu0 }
 0x307   : > { %v5869_v42 = vmax.f32 %v5805_v50, 0.0  ;;  %v7994_v45 = vadd.f32 %v5471_v56, %v10153_v5  ;;  %v7916_v37 = vpop.f32.mrb[22].mxu0 }
 0x308   : > { %v6734_v28 = vpack.c.bf16 %v5871_v27, %v5870_v10  ;;  %v5739_v51 = vmul.f32 %v7993_v11, %v10178_v14  ;;  %v7995_v38 = vadd.f32 %v7916_v37, %v10155_v54  ;;  %v5474_v21 = vpop.f32.mrb[23].mxu0 }
 0x309   : > { %v6729_v49 = vpack.c.bf16 %v5869_v42, %v5868_v18  ;;  %v5737_v19 = vmul.f32 %v7994_v45, %v10178_v14  ;;  %v7996_v16 = vadd.f32 %v5474_v21, %v10157_v9 }
 0x30a   : > { %6854 = vst [vmem:[%s8714_s5 + $0x48] sm:$0xff] %v6734_v28   ;;  %v5810_v30 = vadd.f32 %v10183_v12, %v5739_v51  ;;  %v5740_v25 = vmul.f32 %v7995_v38, %v10178_v14 }
 0x30b   : > { %6853 = vst [vmem:[%s8714_s5 + $0x40] sm:$0xff] %v6729_v49   ;;  %v5808_v5 = vadd.f32 %v10183_v12, %v5737_v19  ;;  %v5738_v7 = vmul.f32 %v7996_v16, %v10178_v14 }
 0x30c   : > { %v5811_v32 = vadd.f32 %v10183_v12, %v5740_v25  ;;  %v5874_v36 = vmax.f32 %v5810_v30, 0.0 }
 0x30d   : > { %v5809_v54 = vadd.f32 %v10183_v12, %v5738_v7  ;;  %v7919_v52 = vpop.f32.mrb[24].mxu0  ;;  %v5872_v61 = vmax.f32 %v5808_v5, 0.0 }
 0x30e   : > { %v5875_v24 = vmax.f32 %v5811_v32, 0.0  ;;  %v7997_v9 = vadd.f32 %v7919_v52, %v10159_v1  ;;  %v5487_v58 = vpop.f32.mrb[25].mxu0 }
 0x30f   : > { %v5873_v47 = vmax.f32 %v5809_v54, 0.0  ;;  %v7998_v20 = vadd.f32 %v5487_v58, %v10161_v63  ;;  %v7920_v62 = vpop.f32.mrb[26].mxu0 }
 0x310   : > { %v6744_v26 = vpack.c.bf16 %v5875_v24, %v5874_v36  ;;  %v5743_v6 = vmul.f32 %v7997_v9, %v10178_v14  ;;  %v7999_v46 = vadd.f32 %v7920_v62, %v10163_v55  ;;  %v5490_v43 = vpop.f32.mrb[27].mxu0 }
 0x311   : > { %v6739_v35 = vpack.c.bf16 %v5873_v47, %v5872_v61  ;;  %v5741_v53 = vmul.f32 %v7998_v20, %v10178_v14  ;;  %v8000_v17 = vadd.f32 %v5490_v43, %v10165_v59 }
 0x312   : > { %6856 = vst [vmem:[%s8714_s5 + $0x58] sm:$0xff] %v6744_v26   ;;  %v5814_v1 = vadd.f32 %v10183_v12, %v5743_v6  ;;  %v5744_v41 = vmul.f32 %v7999_v46, %v10178_v14 }
 0x313   : > { %6855 = vst [vmem:[%s8714_s5 + $0x50] sm:$0xff] %v6739_v35   ;;  %v5812_v63 = vadd.f32 %v10183_v12, %v5741_v53  ;;  %v5742_v57 = vmul.f32 %v8000_v17, %v10178_v14 }
 0x314   : > { %v5815_v60 = vadd.f32 %v10183_v12, %v5744_v41  ;;  %v5878_v44 = vmax.f32 %v5814_v1, 0.0 }
 0x315   : > { %v5813_v55 = vadd.f32 %v10183_v12, %v5742_v57  ;;  %v7923_v23 = vpop.f32.mrb[28].mxu0  ;;  %v5876_v34 = vmax.f32 %v5812_v63, 0.0 }
 0x316   : > { %v5879_v48 = vmax.f32 %v5815_v60, 0.0  ;;  %v8001_v59 = vadd.f32 %v7923_v23, %v10167_v0  ;;  %v5503_v3 = vpop.f32.mrb[29].mxu0 }
 0x317   : > { %v5877_v4 = vmax.f32 %v5813_v55, 0.0  ;;  %v8002_v39 = vadd.f32 %v5503_v3, %v10169_v15  ;;  %v7924_v22 = vpop.f32.mrb[30].mxu0 }
 0x318   : > { %v6754_v29 = vpack.c.bf16 %v5879_v48, %v5878_v44  ;;  %v5747_v2 = vmul.f32 %v8001_v59, %v10178_v14  ;;  %v8003_v8 = vadd.f32 %v7924_v22, %v10171_v31  ;;  %v5506_v40 = vpop.f32.mrb[31].mxu0 }
 0x319   : > { %v6749_v50 = vpack.c.bf16 %v5877_v4, %v5876_v34  ;;  %v5745_v13 = vmul.f32 %v8002_v39, %v10178_v14  ;;  %v8004_v10 = vadd.f32 %v5506_v40, %v10173_v33 }
 0x31a   : > { %6858 = vst [vmem:[%s8714_s5 + $0x68] sm:$0xff] %v6754_v29   ;;  %v5818_v0 = vadd.f32 %v10183_v12, %v5747_v2  ;;  %v5748_v27 = vmul.f32 %v8003_v8, %v10178_v14 }
 0x31b   : > { %6857 = vst [vmem:[%s8714_s5 + $0x60] sm:$0xff] %v6749_v50   ;;  %v5816_v15 = vadd.f32 %v10183_v12, %v5745_v13  ;;  %v5746_v11 = vmul.f32 %v8004_v10, %v10178_v14 }
 0x31c   : > { %v5819_v56 = vadd.f32 %v10183_v12, %v5748_v27  ;;  %v7607_v18 = vpop.f32.mrb[32].mxu1  ;;  %v5882_v37 = vmax.f32 %v5818_v0, 0.0 }
 0x31d   : > { %v5817_v31 = vadd.f32 %v10183_v12, %v5746_v11  ;;  %v7927_v42 = vpop.f32.mrb[32].mxu0  ;;  %v3152_v45 = vpop.f32.mrb[33].mxu1  ;;  %v5880_v21 = vmax.f32 %v5816_v15, 0.0 }
 0x31e   : > { %v5883_v28 = vmax.f32 %v5819_v56, 0.0  ;;  %v8005_v33 = vadd.f32 %v7927_v42, %v7607_v18  ;;  %v5519_v51 = vpop.f32.mrb[33].mxu0  ;;  %v7608_v38 = vpop.f32.mrb[34].mxu1 }
 0x31f   : > { %v5881_v49 = vmax.f32 %v5817_v31, 0.0  ;;  %v8006_v19 = vadd.f32 %v5519_v51, %v3152_v45  ;;  %v7928_v16 = vpop.f32.mrb[34].mxu0  ;;  %v3155_v30 = vpop.f32.mrb[35].mxu1 }
 0x320   : > { %v6764_v25 = vpack.c.bf16 %v5883_v28, %v5882_v37  ;;  %v5751_v5 = vmul.f32 %v8005_v33, %v10178_v14  ;;  %v8007_v7 = vadd.f32 %v7928_v16, %v7608_v38  ;;  %v5522_v32 = vpop.f32.mrb[35].mxu0 }
 0x321   : > { %v6759_v54 = vpack.c.bf16 %v5881_v49, %v5880_v21  ;;  %v5749_v52 = vmul.f32 %v8006_v19, %v10178_v14  ;;  %v8008_v36 = vadd.f32 %v5522_v32, %v3155_v30 }
 0x322   : > { %6860 = vst [vmem:[%s8714_s5 + $0x78] sm:$0xff] %v6764_v25   ;;  %v5822_v24 = vadd.f32 %v10183_v12, %v5751_v5  ;;  %v5752_v9 = vmul.f32 %v8007_v7, %v10178_v14 }
 0x323   : > { %6859 = vst [vmem:[%s8714_s5 + $0x70] sm:$0xff] %v6759_v54   ;;  %v5820_v58 = vadd.f32 %v10183_v12, %v5749_v52  ;;  %v5750_v61 = vmul.f32 %v8008_v36, %v10178_v14 }
 0x324   : > { %v5823_v47 = vadd.f32 %v10183_v12, %v5752_v9  ;;  %v7611_v20 = vpop.f32.mrb[36].mxu1  ;;  %v5886_v46 = vmax.f32 %v5822_v24, 0.0 }
 0x325   : > { %v5821_v62 = vadd.f32 %v10183_v12, %v5750_v61  ;;  %v7931_v26 = vpop.f32.mrb[36].mxu0  ;;  %v3168_v6 = vpop.f32.mrb[37].mxu1  ;;  %v5884_v1 = vmax.f32 %v5820_v58, 0.0 }
 0x326   : > { %v5887_v43 = vmax.f32 %v5823_v47, 0.0  ;;  %v8009_v35 = vadd.f32 %v7931_v26, %v7611_v20  ;;  %v5535_v53 = vpop.f32.mrb[37].mxu0  ;;  %v7612_v17 = vpop.f32.mrb[38].mxu1 }
 0x327   : > { %v5885_v41 = vmax.f32 %v5821_v62, 0.0  ;;  %v8010_v63 = vadd.f32 %v5535_v53, %v3168_v6  ;;  %v7932_v57 = vpop.f32.mrb[38].mxu0  ;;  %v3171_v60 = vpop.f32.mrb[39].mxu1 }
 0x328   : > { %v6774_v55 = vpack.c.bf16 %v5887_v43, %v5886_v46  ;;  %v5755_v23 = vmul.f32 %v8009_v35, %v10178_v14  ;;  %v8011_v44 = vadd.f32 %v7932_v57, %v7612_v17  ;;  %v5538_v48 = vpop.f32.mrb[39].mxu0 }
 0x329   : > { %v6769_v59 = vpack.c.bf16 %v5885_v41, %v5884_v1  ;;  %v5753_v3 = vmul.f32 %v8010_v63, %v10178_v14  ;;  %v8012_v34 = vadd.f32 %v5538_v48, %v3171_v60 }
 0x32a   : > { %6862 = vst [vmem:[%s8714_s5 + $0x88] sm:$0xff] %v6774_v55   ;;  %v5826_v4 = vadd.f32 %v10183_v12, %v5755_v23  ;;  %v5756_v39 = vmul.f32 %v8011_v44, %v10178_v14 }
 0x32b   : > { %6861 = vst [vmem:[%s8714_s5 + $0x80] sm:$0xff] %v6769_v59   ;;  %v5824_v22 = vadd.f32 %v10183_v12, %v5753_v3  ;;  %v5754_v29 = vmul.f32 %v8012_v34, %v10178_v14 }
 0x32c   : > { %v5827_v2 = vadd.f32 %v10183_v12, %v5756_v39  ;;  %v7615_v8 = vpop.f32.mrb[40].mxu1  ;;  %v5890_v10 = vmax.f32 %v5826_v4, 0.0 }
 0x32d   : > { %v5825_v40 = vadd.f32 %v10183_v12, %v5754_v29  ;;  %v7935_v50 = vpop.f32.mrb[40].mxu0  ;;  %v3184_v13 = vpop.f32.mrb[41].mxu1  ;;  %v5888_v56 = vmax.f32 %v5824_v22, 0.0 }
 0x32e   : > { %v5891_v0 = vmax.f32 %v5827_v2, 0.0  ;;  %v8013_v27 = vadd.f32 %v7935_v50, %v7615_v8  ;;  %v5551_v15 = vpop.f32.mrb[41].mxu0  ;;  %v7616_v11 = vpop.f32.mrb[42].mxu1 }
 0x32f   : > { %v5889_v18 = vmax.f32 %v5825_v40, 0.0  ;;  %v8014_v31 = vadd.f32 %v5551_v15, %v3184_v13  ;;  %v7936_v42 = vpop.f32.mrb[42].mxu0  ;;  %v3187_v45 = vpop.f32.mrb[43].mxu1 }
 0x330   : > { %v6784_v37 = vpack.c.bf16 %v5891_v0, %v5890_v10  ;;  %v5759_v28 = vmul.f32 %v8013_v27, %v10178_v14  ;;  %v8015_v33 = vadd.f32 %v7936_v42, %v7616_v11  ;;  %v5554_v51 = vpop.f32.mrb[43].mxu0 }
 0x331   : > { %v6779_v38 = vpack.c.bf16 %v5889_v18, %v5888_v56  ;;  %v5757_v21 = vmul.f32 %v8014_v31, %v10178_v14  ;;  %v8016_v49 = vadd.f32 %v5554_v51, %v3187_v45 }
 0x332   : > { %6864 = vst [vmem:[%s8714_s5 + $0x98] sm:$0xff] %v6784_v37   ;;  %v5830_v19 = vadd.f32 %v10183_v12, %v5759_v28  ;;  %v5760_v16 = vmul.f32 %v8015_v33, %v10178_v14 }
 0x333   : > { %6863 = vst [vmem:[%s8714_s5 + $0x90] sm:$0xff] %v6779_v38   ;;  %v5828_v30 = vadd.f32 %v10183_v12, %v5757_v21  ;;  %v5758_v25 = vmul.f32 %v8016_v49, %v10178_v14 }
 0x334   : > { %v5831_v5 = vadd.f32 %v10183_v12, %v5760_v16  ;;  %v7619_v7 = vpop.f32.mrb[44].mxu1  ;;  %v5894_v36 = vmax.f32 %v5830_v19, 0.0 }
 0x335   : > { %v5829_v32 = vadd.f32 %v10183_v12, %v5758_v25  ;;  %v7939_v54 = vpop.f32.mrb[44].mxu0  ;;  %v3200_v52 = vpop.f32.mrb[45].mxu1  ;;  %v5892_v47 = vmax.f32 %v5828_v30, 0.0 }
 0x336   : > { %v5895_v24 = vmax.f32 %v5831_v5, 0.0  ;;  %v8017_v9 = vadd.f32 %v7939_v54, %v7619_v7  ;;  %v5567_v58 = vpop.f32.mrb[45].mxu0  ;;  %v7620_v61 = vpop.f32.mrb[46].mxu1 }
 0x337   : > { %v5893_v20 = vmax.f32 %v5829_v32, 0.0  ;;  %v8018_v62 = vadd.f32 %v5567_v58, %v3200_v52  ;;  %v7940_v26 = vpop.f32.mrb[46].mxu0  ;;  %v3203_v6 = vpop.f32.mrb[47].mxu1 }
 0x338   : > { %v6794_v46 = vpack.c.bf16 %v5895_v24, %v5894_v36  ;;  %v5763_v43 = vmul.f32 %v8017_v9, %v10178_v14  ;;  %v8019_v35 = vadd.f32 %v7940_v26, %v7620_v61  ;;  %v5570_v53 = vpop.f32.mrb[47].mxu0 }
 0x339   : > { %v6789_v17 = vpack.c.bf16 %v5893_v20, %v5892_v47  ;;  %v5761_v1 = vmul.f32 %v8018_v62, %v10178_v14  ;;  %v8020_v41 = vadd.f32 %v5570_v53, %v3203_v6 }
 0x33a   : > { %6866 = vst [vmem:[%s8714_s5 + $0xa8] sm:$0xff] %v6794_v46   ;;  %v5834_v63 = vadd.f32 %v10183_v12, %v5763_v43  ;;  %v5764_v57 = vmul.f32 %v8019_v35, %v10178_v14 }
 0x33b   : > { %6865 = vst [vmem:[%s8714_s5 + $0xa0] sm:$0xff] %v6789_v17   ;;  %v5832_v60 = vadd.f32 %v10183_v12, %v5761_v1  ;;  %v5762_v55 = vmul.f32 %v8020_v41, %v10178_v14 }
 0x33c   : > { %v5835_v23 = vadd.f32 %v10183_v12, %v5764_v57  ;;  %v7623_v44 = vpop.f32.mrb[48].mxu1  ;;  %v5898_v34 = vmax.f32 %v5834_v63, 0.0 }
 0x33d   : > { %v5833_v48 = vadd.f32 %v10183_v12, %v5762_v55  ;;  %v7943_v59 = vpop.f32.mrb[48].mxu0  ;;  %v3216_v3 = vpop.f32.mrb[49].mxu1  ;;  %v5896_v2 = vmax.f32 %v5832_v60, 0.0 }
 0x33e   : > { %v5899_v4 = vmax.f32 %v5835_v23, 0.0  ;;  %v8021_v39 = vadd.f32 %v7943_v59, %v7623_v44  ;;  %v5583_v22 = vpop.f32.mrb[49].mxu0  ;;  %v7624_v29 = vpop.f32.mrb[50].mxu1 }
 0x33f   : > { %v5897_v8 = vmax.f32 %v5833_v48, 0.0  ;;  %v8022_v40 = vadd.f32 %v5583_v22, %v3216_v3  ;;  %v7944_v50 = vpop.f32.mrb[50].mxu0  ;;  %v3219_v13 = vpop.f32.mrb[51].mxu1 }
 0x340   : > { %v6804_v10 = vpack.c.bf16 %v5899_v4, %v5898_v34  ;;  %v5767_v0 = vmul.f32 %v8021_v39, %v10178_v14  ;;  %v8023_v27 = vadd.f32 %v7944_v50, %v7624_v29  ;;  %v5586_v15 = vpop.f32.mrb[51].mxu0 }
 0x341   : > { %v6799_v11 = vpack.c.bf16 %v5897_v8, %v5896_v2  ;;  %v5765_v56 = vmul.f32 %v8022_v40, %v10178_v14  ;;  %v8024_v18 = vadd.f32 %v5586_v15, %v3219_v13 }
 0x342   : > { %6868 = vst [vmem:[%s8714_s5 + $0xb8] sm:$0xff] %v6804_v10   ;;  %v5838_v31 = vadd.f32 %v10183_v12, %v5767_v0  ;;  %v5768_v42 = vmul.f32 %v8023_v27, %v10178_v14 }
 0x343   : > { %6867 = vst [vmem:[%s8714_s5 + $0xb0] sm:$0xff] %v6799_v11   ;;  %v5836_v45 = vadd.f32 %v10183_v12, %v5765_v56  ;;  %v5766_v37 = vmul.f32 %v8024_v18, %v10178_v14 }
 0x344   : > { %v5839_v28 = vadd.f32 %v10183_v12, %v5768_v42  ;;  %v7627_v33 = vpop.f32.mrb[52].mxu1  ;;  %v5902_v49 = vmax.f32 %v5838_v31, 0.0 }
 0x345   : > { %v5837_v51 = vadd.f32 %v10183_v12, %v5766_v37  ;;  %v7947_v38 = vpop.f32.mrb[52].mxu0  ;;  %v3232_v21 = vpop.f32.mrb[53].mxu1  ;;  %v5900_v5 = vmax.f32 %v5836_v45, 0.0 }
 0x346   : > { %v5903_v19 = vmax.f32 %v5839_v28, 0.0  ;;  %v8025_v16 = vadd.f32 %v7947_v38, %v7627_v33  ;;  %v5599_v30 = vpop.f32.mrb[53].mxu0  ;;  %v7628_v25 = vpop.f32.mrb[54].mxu1 }
 0x347   : > { %v5901_v7 = vmax.f32 %v5837_v51, 0.0  ;;  %v8026_v32 = vadd.f32 %v5599_v30, %v3232_v21  ;;  %v7948_v54 = vpop.f32.mrb[54].mxu0  ;;  %v3235_v52 = vpop.f32.mrb[55].mxu1 }
 0x348   : > { %v6814_v36 = vpack.c.bf16 %v5903_v19, %v5902_v49  ;;  %v5771_v24 = vmul.f32 %v8025_v16, %v10178_v14  ;;  %v8027_v9 = vadd.f32 %v7948_v54, %v7628_v25  ;;  %v5602_v58 = vpop.f32.mrb[55].mxu0 }
 0x349   : > { %v6809_v61 = vpack.c.bf16 %v5901_v7, %v5900_v5  ;;  %v5769_v47 = vmul.f32 %v8026_v32, %v10178_v14  ;;  %v8028_v20 = vadd.f32 %v5602_v58, %v3235_v52 }
 0x34a   : > { %6870 = vst [vmem:[%s8714_s5 + $0xc8] sm:$0xff] %v6814_v36   ;;  %v5842_v62 = vadd.f32 %v10183_v12, %v5771_v24  ;;  %v5772_v26 = vmul.f32 %v8027_v9, %v10178_v14 }
 0x34b   : > { %6869 = vst [vmem:[%s8714_s5 + $0xc0] sm:$0xff] %v6809_v61   ;;  %v5840_v6 = vadd.f32 %v10183_v12, %v5769_v47  ;;  %v5770_v46 = vmul.f32 %v8028_v20, %v10178_v14 }
 0x34c   : > { %v5843_v43 = vadd.f32 %v10183_v12, %v5772_v26  ;;  %v7631_v35 = vpop.f32.mrb[56].mxu1  ;;  %v5906_v41 = vmax.f32 %v5842_v62, 0.0 }
 0x34d   : > { %v5841_v53 = vadd.f32 %v10183_v12, %v5770_v46  ;;  %v7951_v17 = vpop.f32.mrb[56].mxu0  ;;  %v3248_v1 = vpop.f32.mrb[57].mxu1  ;;  %v5904_v23 = vmax.f32 %v5840_v6, 0.0 }
 0x34e   : > { %v5907_v63 = vmax.f32 %v5843_v43, 0.0  ;;  %v8029_v57 = vadd.f32 %v7951_v17, %v7631_v35  ;;  %v5615_v60 = vpop.f32.mrb[57].mxu0  ;;  %v7632_v55 = vpop.f32.mrb[58].mxu1 }
 0x34f   : > { %v5905_v44 = vmax.f32 %v5841_v53, 0.0  ;;  %v8030_v48 = vadd.f32 %v5615_v60, %v3248_v1  ;;  %v7952_v59 = vpop.f32.mrb[58].mxu0  ;;  %v3251_v3 = vpop.f32.mrb[59].mxu1 }
 0x350   : > { %v6824_v34 = vpack.c.bf16 %v5907_v63, %v5906_v41  ;;  %v5775_v4 = vmul.f32 %v8029_v57, %v10178_v14  ;;  %v8031_v39 = vadd.f32 %v7952_v59, %v7632_v55  ;;  %v5618_v22 = vpop.f32.mrb[59].mxu0 }
 0x351   : > { %v6819_v29 = vpack.c.bf16 %v5905_v44, %v5904_v23  ;;  %v5773_v2 = vmul.f32 %v8030_v48, %v10178_v14  ;;  %v8032_v8 = vadd.f32 %v5618_v22, %v3251_v3 }
 0x352   : > { %6872 = vst [vmem:[%s8714_s5 + $0xd8] sm:$0xff] %v6824_v34   ;;  %v5846_v40 = vadd.f32 %v10183_v12, %v5775_v4  ;;  %v5776_v50 = vmul.f32 %v8031_v39, %v10178_v14 }
 0x353   : > { %6871 = vst [vmem:[%s8714_s5 + $0xd0] sm:$0xff] %v6819_v29   ;;  %v5844_v13 = vadd.f32 %v10183_v12, %v5773_v2  ;;  %v5774_v10 = vmul.f32 %v8032_v8, %v10178_v14 }
 0x354   : > { %v5847_v0 = vadd.f32 %v10183_v12, %v5776_v50  ;;  %v7635_v27 = vpop.f32.mrb[60].mxu1  ;;  %v5910_v18 = vmax.f32 %v5846_v40, 0.0 }
 0x355   : > { %v5845_v15 = vadd.f32 %v10183_v12, %v5774_v10  ;;  %v7955_v11 = vpop.f32.mrb[60].mxu0  ;;  %v3264_v56 = vpop.f32.mrb[61].mxu1  ;;  %v5908_v28 = vmax.f32 %v5844_v13, 0.0 }
 0x356   : > { %v5911_v31 = vmax.f32 %v5847_v0, 0.0  ;;  %v8033_v42 = vadd.f32 %v7955_v11, %v7635_v27  ;;  %v5631_v45 = vpop.f32.mrb[61].mxu0  ;;  %v7636_v37 = vpop.f32.mrb[62].mxu1 }
 0x357   : > { %v5909_v33 = vmax.f32 %v5845_v15, 0.0  ;;  %v8034_v51 = vadd.f32 %v5631_v45, %v3264_v56  ;;  %v7956_v38 = vpop.f32.mrb[62].mxu0  ;;  %v3267_v21 = vpop.f32.mrb[63].mxu1 }
 0x358   : > { %v6834_v49 = vpack.c.bf16 %v5911_v31, %v5910_v18  ;;  %v5779_v19 = vmul.f32 %v8033_v42, %v10178_v14  ;;  %v8035_v16 = vadd.f32 %v7956_v38, %v7636_v37  ;;  %v5634_v30 = vpop.f32.mrb[63].mxu0 }
 0x359   : > { %v6829_v25 = vpack.c.bf16 %v5909_v33, %v5908_v28  ;;  %v5777_v5 = vmul.f32 %v8034_v51, %v10178_v14  ;;  %v8036_v7 = vadd.f32 %v5634_v30, %v3267_v21 }
 0x35a   : > { %6874 = vst [vmem:[%s8714_s5 + $0xe8] sm:$0xff] %v6834_v49   ;;  %v5850_v32 = vadd.f32 %v10183_v12, %v5779_v19  ;;  %v5780_v54 = vmul.f32 %v8035_v16, %v10178_v14 }
 0x35b   : > { %6873 = vst [vmem:[%s8714_s5 + $0xe0] sm:$0xff] %v6829_v25   ;;  %v5848_v52 = vadd.f32 %v10183_v12, %v5777_v5  ;;  %v5778_v36 = vmul.f32 %v8036_v7, %v10178_v14 }
 0x35c   : > { %v5851_v24 = vadd.f32 %v10183_v12, %v5780_v54  ;;  %v5914_v58 = vmax.f32 %v5850_v32, 0.0 }
 0x35d   : > { %v5849_v9 = vadd.f32 %v10183_v12, %v5778_v36  ;;  %v5912_v47 = vmax.f32 %v5848_v52, 0.0 }
 0x35e   : > { %v5915_v61 = vmax.f32 %v5851_v24, 0.0 }
 0x35f   : > { %v5913_v20 = vmax.f32 %v5849_v9, 0.0 }
 0x360   : > { %v6844_v62 = vpack.c.bf16 %v5915_v61, %v5914_v58 }
 0x361   : > { %v6839_v26 = vpack.c.bf16 %v5913_v20, %v5912_v47 }
 0x362   : > { %6876 = vst [vmem:[%s8714_s5 + $0xf8] sm:$0xff] %v6844_v62  }
 0x363   : > { %6875 = vst [vmem:[%s8714_s5 + $0xf0] sm:$0xff] %v6839_v26  }
 0x364 PF: > { %s14_s17 = sadd.s32 1, %s8654_s17   ;;  %s10454_s15 = smov %s8650_s16 }
 0x365   : > { %p11_p5 = scmp.ge.s32.totalorder %s14_s17, 4   ;;  %s10455_s16 = smov %s10457_s18 }
 0x367   :  { %13 = sbr.rel (!%p11_p5) target bundleno = 2 (0x2), region = 168 }
 0x36e   :  { %6261 = vsyncmov [#allocation3] }
 0x371   :  { %s6262_s27 = vpop.sfrf %6261 }
 0x372   :  { %p6615_p6 = scmp.ne.s32.totalorder %s6262_s27, 0 }
 0x374   :  { %6266 = shalt.err (%p6615_p6)  }
 0x375   :  { %6268 = vsyncmov [#allocation3 + $0x1] }
 0x378   :  { %s6269_s28 = vpop.sfrf %6268 }
 0x379   :  { %p6616_p7 = scmp.ne.s32.totalorder %s6269_s28, 0 }
 0x37b   :  { %6273 = shalt.err (%p6616_p7)  }

</bundles_post_ra>
